<compile_context>
chip_gen: v7x
topology: tpu7x:2x2x1
jax: 0.10.0
libtpu: 0.0.40
codegen_flags: <defaults>
</compile_context>

<pallas_src>
import functools
import math

import jax
import jax.numpy as jnp
from jax.experimental import pallas as pl
from jax.experimental.pallas import tpu as pltpu

_INV_SQRT2 = 1.0 / math.sqrt(2.0)
_BN_EPS = 1e-5
_LANE = 128
_WPAD = 8          # sublane-aligned left halo width of the VMEM conv slab
_VMEM_LIMIT = 32 * 1024 * 1024   # safe on v5e/v6e (128 MiB) and v7x (64 MiB)


def _round_up(x, m):
    return (x + m - 1) // m * m


def _gelu_exact(x):
    # nn.GELU() default (approximate='none'): 0.5*x*(1+erf(x/sqrt(2)))
    return 0.5 * x * (1.0 + jax.lax.erf(x * _INV_SQRT2))


# ----------------------------------------------------------------------------
# In-kernel helpers
# ----------------------------------------------------------------------------
def _bn_gelu_rows(acc, s_ref, g_ref, beta_ref, count):
    """Training-mode BatchNorm (global stats, biased var) + exact GELU.

    acc: (R, C) rows of one image (any float dtype; promoted to f32).
    s_ref: (2, C) [sum, sum-of-squares] accumulated over the whole batch.
    g_ref / beta_ref: (1, C) f32.
    """
    acc = acc.astype(jnp.float32)
    inv_n = 1.0 / count
    mu = s_ref[0:1, :] * inv_n                                   # (1, C)
    var = jnp.maximum(s_ref[1:2, :] * inv_n - mu * mu, 0.0)      # biased var
    scale = g_ref[...] * jax.lax.rsqrt(var + _BN_EPS)            # (1, C)
    shift = beta_ref[...] - mu * scale
    return _gelu_exact(acc * scale + shift)


def _fill_padded_slab(pad_ref, interior, h, w):
    """Write one image into the zero-haloed (h+2, w+2*_WPAD, C) VMEM slab."""
    @pl.when(pl.program_id(0) == 0)
    def _():
        # The halo stays zero across grid steps; only the interior is rewritten.
        pad_ref[...] = jnp.zeros_like(pad_ref)
    pad_ref[1:h + 1, _WPAD:_WPAD + w, :] = interior


def _conv3x3(pad_ref, w_ref, h, w, cin_p, cout_p):
    """3x3/stride-1/pad-1 conv as 9 shifted MXU matmuls (bf16 x bf16 -> f32)."""
    r = h * w
    acc = jnp.zeros((r, cout_p), jnp.float32)
    for kh in range(3):
        for kw in range(3):
            col0 = _WPAD - 1 + kw
            patch = pad_ref[kh:kh + h, col0:col0 + w, :]         # (h, w, cin_p)
            patch = patch.reshape(r, cin_p).astype(jnp.bfloat16)
            acc = acc + jnp.dot(patch, w_ref[kh * 3 + kw],
                                preferred_element_type=jnp.float32)
    return acc


def _accum_stats(acc, s_ref):
    """Accumulate per-channel sum / sum-of-squares across the grid
    ("arbitrary" axis; the stats output block is revisited every step)."""
    @pl.when(pl.program_id(0) == 0)
    def _():
        s_ref[...] = jnp.zeros_like(s_ref)
    s_ref[0:1, :] = s_ref[0:1, :] + jnp.sum(acc, axis=0, keepdims=True)
    s_ref[1:2, :] = s_ref[1:2, :] + jnp.sum(acc * acc, axis=0, keepdims=True)


# ----------------------------------------------------------------------------
# Kernels
# ----------------------------------------------------------------------------
def _conv1_kernel(h, w, x_ref, w_ref, y_ref, s_ref, pad_ref):
    """conv1 (pre-BN, bf16 output) + global BN1 statistics accumulation."""
    cin_p = pad_ref.shape[-1]
    cout_p = y_ref.shape[-1]
    _fill_padded_slab(pad_ref, x_ref[0].astype(jnp.float32), h, w)
    acc = _conv3x3(pad_ref, w_ref, h, w, cin_p, cout_p)          # (h*w, Cout) f32
    y_ref[0] = acc.reshape(h, w, cout_p).astype(y_ref.dtype)
    _accum_stats(acc, s_ref)


def _conv2_kernel(h, w, count, y1_ref, s1_ref, g1_ref, b1_ref, w_ref,
                  y2_ref, s2_ref, pad_ref):
    """Fused BN1+GELU apply (x1 stays in VMEM) + conv2 + BN2 stats."""
    cout_p = y2_ref.shape[-1]
    r = h * w
    y1 = y1_ref[0].astype(jnp.float32).reshape(r, cout_p)
    a1 = _bn_gelu_rows(y1, s1_ref, g1_ref, b1_ref, count)        # x1 rows (f32)
    _fill_padded_slab(pad_ref, a1.reshape(h, w, cout_p), h, w)
    acc = _conv3x3(pad_ref, w_ref, h, w, cout_p, cout_p)
    y2_ref[0] = acc.reshape(h, w, cout_p).astype(y2_ref.dtype)
    _accum_stats(acc, s2_ref)


def _finalize_kernel(h, w, count, use_x_residual,
                     y2_ref, s2_ref, g2_ref, b2_ref,
                     res_ref, s1_ref, g1_ref, b1_ref, o_ref):
    """BN2 + GELU + residual add + 1/sqrt(2) + H-direction half of MaxPool(2).

    Output block is (1, h//2, w, C): rows already max-reduced over vertical
    2x1 windows; the horizontal pairwise max is a tiny wrapper epilogue.
    """
    cout_p = o_ref.shape[-1]
    r = h * w
    x2 = _bn_gelu_rows(y2_ref[0].astype(jnp.float32).reshape(r, cout_p),
                       s2_ref, g2_ref, b2_ref, count)
    res = res_ref[0].astype(jnp.float32).reshape(r, cout_p)
    if not use_x_residual:
        # Recompute x1 = GELU(BN1(y1)) (cheap elementwise; avoids storing x1).
        res = _bn_gelu_rows(res, s1_ref, g1_ref, b1_ref, count)
    out = ((res + x2) * _INV_SQRT2).reshape(h // 2, 2, w, cout_p)
    o_ref[0] = jnp.maximum(out[:, 0], out[:, 1])                 # (h//2, w, C)


# ----------------------------------------------------------------------------
# pallas_call wrappers
# ----------------------------------------------------------------------------
def _conv1_call(x_bf16, w1, n, h, w, cin_p, cout_p):
    kernel = functools.partial(_conv1_kernel, h, w)
    flops = 2 * n * h * w * 9 * cin_p * cout_p
    bytes_acc = (int(x_bf16.size) * 2 + int(w1.size) * 2
                 + n * h * w * cout_p * 2)
    return pl.pallas_call(
        kernel,
        out_shape=(jax.ShapeDtypeStruct((n, h, w, cout_p), jnp.bfloat16),
                   jax.ShapeDtypeStruct((2, cout_p), jnp.float32)),
        grid=(n,),
        in_specs=[
            pl.BlockSpec((1, h, w, cin_p), lambda i: (i, 0, 0, 0)),
            pl.BlockSpec((9, cin_p, cout_p), lambda i: (0, 0, 0)),
        ],
        out_specs=(
            pl.BlockSpec((1, h, w, cout_p), lambda i: (i, 0, 0, 0)),
            pl.BlockSpec((2, cout_p), lambda i: (0, 0)),
        ),
        scratch_shapes=[pltpu.VMEM((h + 2, w + 2 * _WPAD, cin_p), jnp.float32)],
        compiler_params=pltpu.CompilerParams(
            dimension_semantics=("arbitrary",),   # stats accumulator revisits
            vmem_limit_bytes=_VMEM_LIMIT),
        cost_estimate=pl.CostEstimate(flops=flops, transcendentals=0,
                                      bytes_accessed=bytes_acc),
    )(x_bf16, w1)


def _conv2_call(y1, s1, g1, b1, w2, n, h, w, cout_p, count):
    kernel = functools.partial(_conv2_kernel, h, w, count)
    img_spec = pl.BlockSpec((1, h, w, cout_p), lambda i: (i, 0, 0, 0))
    row_spec = pl.BlockSpec((1, cout_p), lambda i: (0, 0))
    stat_spec = pl.BlockSpec((2, cout_p), lambda i: (0, 0))
    flops = 2 * n * h * w * 9 * cout_p * cout_p
    bytes_acc = (int(y1.size) * 2 + int(w2.size) * 2
                 + n * h * w * cout_p * 2)
    return pl.pallas_call(
        kernel,
        out_shape=(jax.ShapeDtypeStruct((n, h, w, cout_p), jnp.bfloat16),
                   jax.ShapeDtypeStruct((2, cout_p), jnp.float32)),
        grid=(n,),
        in_specs=[img_spec, stat_spec, row_spec, row_spec,
                  pl.BlockSpec((9, cout_p, cout_p), lambda i: (0, 0, 0))],
        out_specs=(img_spec, stat_spec),
        scratch_shapes=[pltpu.VMEM((h + 2, w + 2 * _WPAD, cout_p), jnp.float32)],
        compiler_params=pltpu.CompilerParams(
            dimension_semantics=("arbitrary",),
            vmem_limit_bytes=_VMEM_LIMIT),
        cost_estimate=pl.CostEstimate(flops=flops,
                                      transcendentals=n * h * w * cout_p,
                                      bytes_accessed=bytes_acc),
    )(y1, s1, g1, b1, w2)


def _finalize_call(y2, s2, g2, b2, res, s1, g1, b1,
                   n, h, w, cout_p, count, use_x_residual):
    kernel = functools.partial(_finalize_kernel, h, w, count, use_x_residual)
    img_spec = pl.BlockSpec((1, h, w, cout_p), lambda i: (i, 0, 0, 0))
    half_spec = pl.BlockSpec((1, h // 2, w, cout_p), lambda i: (i, 0, 0, 0))
    row_spec = pl.BlockSpec((1, cout_p), lambda i: (0, 0))
    stat_spec = pl.BlockSpec((2, cout_p), lambda i: (0, 0))
    flops = 14 * n * h * w * cout_p
    bytes_acc = ((int(y2.size) + int(res.size)) * 2
                 + n * (h // 2) * w * cout_p * 4)
    return pl.pallas_call(
        kernel,
        out_shape=jax.ShapeDtypeStruct((n, h // 2, w, cout_p), jnp.float32),
        grid=(n,),
        in_specs=[img_spec, stat_spec, row_spec, row_spec,
                  img_spec, stat_spec, row_spec, row_spec],
        out_specs=half_spec,
        compiler_params=pltpu.CompilerParams(
            dimension_semantics=("parallel",),    # megacore-shardable on v7x
            vmem_limit_bytes=_VMEM_LIMIT),
        cost_estimate=pl.CostEstimate(flops=flops,
                                      transcendentals=2 * n * h * w * cout_p,
                                      bytes_accessed=bytes_acc),
    )(y2, s2, g2, b2, res, s1, g1, b1)


# ----------------------------------------------------------------------------
# Parameter / layout plumbing (wrapper side)
# ----------------------------------------------------------------------------
def _weight_to_taps(w_oihw, cin_p, cout_p):
    """PyTorch (Cout, Cin, 3, 3) -> (9, Cin_p, Cout_p) bf16, tap-major (kh,kw)."""
    cout, cin, kh, kw = w_oihw.shape
    w = jnp.transpose(w_oihw.astype(jnp.float32), (2, 3, 1, 0))
    w = w.reshape(kh * kw, cin, cout)
    w = jnp.pad(w, ((0, 0), (0, cin_p - cin), (0, cout_p - cout)))
    return w.astype(jnp.bfloat16)


def _pad_row(v, c_p):
    v = jnp.asarray(v, jnp.float32)
    return jnp.pad(v, (0, c_p - v.shape[0])).reshape(1, c_p)


def make_params(key, in_channels, out_channels):
    ks = jax.random.split(key, 8)
    return {
        "w1": 0.1 * jax.random.normal(ks[0], (out_channels, in_channels, 3, 3), jnp.float32),
        "b1": 0.1 * jax.random.normal(ks[1], (out_channels,), jnp.float32),
        "g1": 1.0 + 0.1 * jax.random.normal(ks[2], (out_channels,), jnp.float32),
        "beta1": 0.1 * jax.random.normal(ks[3], (out_channels,), jnp.float32),
        "w2": 0.1 * jax.random.normal(ks[4], (out_channels, out_channels, 3, 3), jnp.float32),
        "b2": 0.1 * jax.random.normal(ks[5], (out_channels,), jnp.float32),
        "g2": 1.0 + 0.1 * jax.random.normal(ks[6], (out_channels,), jnp.float32),
        "beta2": 0.1 * jax.random.normal(ks[7], (out_channels,), jnp.float32),
    }
    # Note: b1/b2 cancel exactly under training-mode BatchNorm; the kernels do
    # not use them (the reference below keeps them and still matches).


def unet_down_forward(x_nchw, params, in_channels, out_channels):
    """UnetDown forward: ResConvBlock(in,out) followed by MaxPool2d(2)."""
    n, cin, h, w = x_nchw.shape
    assert cin == in_channels
    assert h % 2 == 0 and w % 2 == 0, "MaxPool2d(2) needs even spatial dims"
    assert w % 8 == 0, "sublane-friendly layout assumed (W multiple of 8)"

    cin_p = _round_up(in_channels, _LANE)
    cout_p = _round_up(out_channels, _LANE)
    count = float(n * h * w)

    # NCHW -> NHWC, channel pad to lane multiple, bf16 for the MXU stream.
    x_nhwc = jnp.transpose(x_nchw, (0, 2, 3, 1)).astype(jnp.float32)
    x_pad = jnp.pad(x_nhwc, ((0, 0), (0, 0), (0, 0), (0, cin_p - in_channels)))
    x_bf16 = x_pad.astype(jnp.bfloat16)

    w1 = _weight_to_taps(params["w1"], cin_p, cout_p)
    w2 = _weight_to_taps(params["w2"], cout_p, cout_p)
    g1 = _pad_row(params["g1"], cout_p)
    beta1 = _pad_row(params["beta1"], cout_p)
    g2 = _pad_row(params["g2"], cout_p)
    beta2 = _pad_row(params["beta2"], cout_p)

    # conv1 (pre-BN, bf16) + global BN1 statistics.
    y1, s1 = _conv1_call(x_bf16, w1, n, h, w, cin_p, cout_p)
    # BN1+GELU apply (in VMEM) + conv2 (pre-BN, bf16) + global BN2 statistics.
    y2, s2 = _conv2_call(y1, s1, g1, beta1, w2, n, h, w, cout_p, count)

    # BN2+GELU + residual + 1/sqrt(2) + vertical half of MaxPool2d(2).
    use_x_residual = (in_channels == out_channels)
    res = x_bf16 if use_x_residual else y1     # bf16 residual stream
    half = _finalize_call(y2, s2, g2, beta2, res, s1, g1, beta1,
                          n, h, w, cout_p, count, use_x_residual)

    # Horizontal half of MaxPool2d(2) + channel unpad + NHWC -> NCHW
    # (tiny memory-bound XLA epilogue on the already height-halved tensor).
    pooled = half.reshape(n, h // 2, w // 2, 2, cout_p).max(axis=3)
    pooled = pooled[..., :out_channels]
    return jnp.transpose(pooled, (0, 3, 1, 2))


# ----------------------------------------------------------------------------
# Pure-JAX reference (f32, includes conv biases) for correctness checking.
# ----------------------------------------------------------------------------
def _reference_forward(x_nchw, params, in_channels, out_channels):
    x = x_nchw.astype(jnp.float32)

    def conv(z, wgt, bias):
        out = jax.lax.conv_general_dilated(
            z, wgt, window_strides=(1, 1), padding=((1, 1), (1, 1)),
            dimension_numbers=("NCHW", "OIHW", "NCHW"))
        return out + bias.reshape(1, -1, 1, 1)

    def bn(z, g, beta):
        mu = jnp.mean(z, axis=(0, 2, 3), keepdims=True)
        var = jnp.mean(jnp.square(z - mu), axis=(0, 2, 3), keepdims=True)
        return ((z - mu) * jax.lax.rsqrt(var + _BN_EPS) * g.reshape(1, -1, 1, 1)
                + beta.reshape(1, -1, 1, 1))

    x1 = _gelu_exact(bn(conv(x, params["w1"], params["b1"]),
                        params["g1"], params["beta1"]))
    x2 = _gelu_exact(bn(conv(x1, params["w2"], params["b2"]),
                        params["g2"], params["beta2"]))
    res = x if in_channels == out_channels else x1
    out = (res + x2) * _INV_SQRT2
    nb, c, hh, ww = out.shape
    return out.reshape(nb, c, hh // 2, 2, ww // 2, 2).max(axis=(3, 5))


if __name__ == "__main__":
    N, H, W = 2, 16, 16
    # (4, 8): x1-residual branch; (8, 8): identity-residual branch.
    configs = [(4, 8), (8, 8)]
    base_key = jax.random.PRNGKey(0)
    for idx, (cin, cout) in enumerate(configs):
        kx, kp = jax.random.split(jax.random.fold_in(base_key, idx))
        x = jax.random.normal(kx, (N, cin, H, W), jnp.float32)
        params = make_params(kp, cin, cout)

        fwd = jax.jit(functools.partial(unet_down_forward, params=params,
                                        in_channels=cin, out_channels=cout))
        out = fwd(x)
        jax.block_until_ready(out)

        assert out.shape == (N, cout, H // 2, W // 2)
        assert out.dtype == jnp.float32

        ref = _reference_forward(x, params, cin, cout)
        # bf16 MXU operands / bf16 intermediates vs f32 reference -> loose tol.
        assert jnp.allclose(out, ref, atol=1e-1, rtol=1e-1), (
            "max abs err = %f" % float(jnp.max(jnp.abs(out - ref))))

    print("KERNEL_OK")
</pallas_src>

<mosaic_0001>
module attributes {stable_mosaic.version = 11 : i64} {
  func.func @_conv1_kernel(%arg0: i32, %arg1: memref<1x16x16x128xbf16, #tpu.memory_space<vmem>>, %arg2: memref<9x128x128xbf16, #tpu.memory_space<vmem>>, %arg3: memref<1x16x16x128xbf16, #tpu.memory_space<vmem>>, %arg4: memref<2x128xf32, #tpu.memory_space<vmem>>, %arg5: memref<18x32x128xf32, #tpu.memory_space<vmem>>) attributes {dimension_semantics = [#tpu.dimension_semantics<arbitrary>], iteration_bounds = array<i64: 2>, scalar_prefetch = 0 : i64, scratch_operands = 1 : i64, tpu.core_type = #tpu.core_type<tc>, window_params = [{transform_indices = @transform_0, window_bounds = array<i64: 1, 16, 16, 128>}, {pipeline_mode = #tpu.pipeline_mode<synchronous>, transform_indices = @transform_1, window_bounds = array<i64: 9, 128, 128>}, {transform_indices = @transform_2, window_bounds = array<i64: 1, 16, 16, 128>}, {pipeline_mode = #tpu.pipeline_mode<synchronous>, transform_indices = @transform_3, window_bounds = array<i64: 2, 128>}]} {
    %c0 = arith.constant 0 : index
    %c0_0 = arith.constant 0 : index
    %c0_1 = arith.constant 0 : index
    %c0_2 = arith.constant 0 : index
    %0 = vector.load %arg1[%c0, %c0_0, %c0_1, %c0_2] : memref<1x16x16x128xbf16, #tpu.memory_space<vmem>>, vector<1x16x16x128xbf16>
    %1 = vector.shape_cast %0 : vector<1x16x16x128xbf16> to vector<16x16x128xbf16>
    %2 = arith.extf %1 : vector<16x16x128xbf16> to vector<16x16x128xf32>
    %c0_i32 = arith.constant 0 : i32
    %3 = arith.cmpi eq, %arg0, %c0_i32 : i32
    %4 = arith.extui %3 : i1 to i32
    %c0_i32_3 = arith.constant 0 : i32
    %5 = arith.cmpi ne, %4, %c0_i32_3 : i32
    scf.if %5 {
      %cst_77 = arith.constant 0.000000e+00 : f32
      %90 = vector.broadcast %cst_77 : f32 to vector<18x32x128xf32>
      %c0_78 = arith.constant 0 : index
      %c0_79 = arith.constant 0 : index
      %c0_80 = arith.constant 0 : index
      %91 = vector.load %arg5[%c0_78, %c0_79, %c0_80] : memref<18x32x128xf32, #tpu.memory_space<vmem>>, vector<18x32x128xf32>
      tpu.vector_store %arg5[%c0_78, %c0_79, %c0_80], %90 {strides = array<i32>} : memref<18x32x128xf32, #tpu.memory_space<vmem>>, vector<18x32x128xf32>,
    } else {
    }
    %c1 = arith.constant 1 : index
    %c8 = arith.constant 8 : index
    %c0_4 = arith.constant 0 : index
    %6 = vector.load %arg5[%c1, %c8, %c0_4] : memref<18x32x128xf32, #tpu.memory_space<vmem>>, vector<16x16x128xf32>
    tpu.vector_store %arg5[%c1, %c8, %c0_4], %2 {strides = array<i32>} : memref<18x32x128xf32, #tpu.memory_space<vmem>>, vector<16x16x128xf32>,
    %cst = arith.constant 0.000000e+00 : f32
    %7 = vector.broadcast %cst : f32 to vector<256x128xf32>
    %c0_5 = arith.constant 0 : index
    %c7 = arith.constant 7 : index
    %c0_6 = arith.constant 0 : index
    %8 = vector.load %arg5[%c0_5, %c7, %c0_6] : memref<18x32x128xf32, #tpu.memory_space<vmem>>, vector<16x16x128xf32>
    %9 = vector.shape_cast %8 : vector<16x16x128xf32> to vector<256x128xf32>
    %10 = arith.truncf %9 : vector<256x128xf32> to vector<256x128xbf16>
    %c0_7 = arith.constant 0 : index
    %c0_8 = arith.constant 0 : index
    %c0_9 = arith.constant 0 : index
    %11 = vector.load %arg2[%c0_7, %c0_8, %c0_9] : memref<9x128x128xbf16, #tpu.memory_space<vmem>>, vector<1x128x128xbf16>
    %12 = vector.shape_cast %11 : vector<1x128x128xbf16> to vector<128x128xbf16>
    %cst_10 = arith.constant dense<0.000000e+00> : vector<256x128xf32>
    %13 = tpu.matmul %10, %12, %cst_10 {dimension_numbers = #tpu.dot_dimension_numbers<[1], [0], [0], [1], [0, 0, 1, 1], [], []>} : vector<256x128xbf16>, vector<128x128xbf16>, vector<256x128xf32> -> vector<256x128xf32>
    %14 = arith.addf %7, %13 : vector<256x128xf32>
    %c0_11 = arith.constant 0 : index
    %c8_12 = arith.constant 8 : index
    %c0_13 = arith.constant 0 : index
    %15 = vector.load %arg5[%c0_11, %c8_12, %c0_13] : memref<18x32x128xf32, #tpu.memory_space<vmem>>, vector<16x16x128xf32>
    %16 = vector.shape_cast %15 : vector<16x16x128xf32> to vector<256x128xf32>
    %17 = arith.truncf %16 : vector<256x128xf32> to vector<256x128xbf16>
    %c1_14 = arith.constant 1 : index
    %c0_15 = arith.constant 0 : index
    %c0_16 = arith.constant 0 : index
    %18 = vector.load %arg2[%c1_14, %c0_15, %c0_16] : memref<9x128x128xbf16, #tpu.memory_space<vmem>>, vector<1x128x128xbf16>
    %19 = vector.shape_cast %18 : vector<1x128x128xbf16> to vector<128x128xbf16>
    %cst_17 = arith.constant dense<0.000000e+00> : vector<256x128xf32>
    %20 = tpu.matmul %17, %19, %cst_17 {dimension_numbers = #tpu.dot_dimension_numbers<[1], [0], [0], [1], [0, 0, 1, 1], [], []>} : vector<256x128xbf16>, vector<128x128xbf16>, vector<256x128xf32> -> vector<256x128xf32>
    %21 = arith.addf %14, %20 : vector<256x128xf32>
    %c0_18 = arith.constant 0 : index
    %c9 = arith.constant 9 : index
    %c0_19 = arith.constant 0 : index
    %22 = vector.load %arg5[%c0_18, %c9, %c0_19] : memref<18x32x128xf32, #tpu.memory_space<vmem>>, vector<16x16x128xf32>
    %23 = vector.shape_cast %22 : vector<16x16x128xf32> to vector<256x128xf32>
    %24 = arith.truncf %23 : vector<256x128xf32> to vector<256x128xbf16>
    %c2 = arith.constant 2 : index
    %c0_20 = arith.constant 0 : index
    %c0_21 = arith.constant 0 : index
    %25 = vector.load %arg2[%c2, %c0_20, %c0_21] : memref<9x128x128xbf16, #tpu.memory_space<vmem>>, vector<1x128x128xbf16>
    %26 = vector.shape_cast %25 : vector<1x128x128xbf16> to vector<128x128xbf16>
    %cst_22 = arith.constant dense<0.000000e+00> : vector<256x128xf32>
    %27 = tpu.matmul %24, %26, %cst_22 {dimension_numbers = #tpu.dot_dimension_numbers<[1], [0], [0], [1], [0, 0, 1, 1], [], []>} : vector<256x128xbf16>, vector<128x128xbf16>, vector<256x128xf32> -> vector<256x128xf32>
    %28 = arith.addf %21, %27 : vector<256x128xf32>
    %c1_23 = arith.constant 1 : index
    %c7_24 = arith.constant 7 : index
    %c0_25 = arith.constant 0 : index
    %29 = vector.load %arg5[%c1_23, %c7_24, %c0_25] : memref<18x32x128xf32, #tpu.memory_space<vmem>>, vector<16x16x128xf32>
    %30 = vector.shape_cast %29 : vector<16x16x128xf32> to vector<256x128xf32>
    %31 = arith.truncf %30 : vector<256x128xf32> to vector<256x128xbf16>
    %c3 = arith.constant 3 : index
    %c0_26 = arith.constant 0 : index
    %c0_27 = arith.constant 0 : index
    %32 = vector.load %arg2[%c3, %c0_26, %c0_27] : memref<9x128x128xbf16, #tpu.memory_space<vmem>>, vector<1x128x128xbf16>
    %33 = vector.shape_cast %32 : vector<1x128x128xbf16> to vector<128x128xbf16>
    %cst_28 = arith.constant dense<0.000000e+00> : vector<256x128xf32>
    %34 = tpu.matmul %31, %33, %cst_28 {dimension_numbers = #tpu.dot_dimension_numbers<[1], [0], [0], [1], [0, 0, 1, 1], [], []>} : vector<256x128xbf16>, vector<128x128xbf16>, vector<256x128xf32> -> vector<256x128xf32>
    %35 = arith.addf %28, %34 : vector<256x128xf32>
    %c1_29 = arith.constant 1 : index
    %c8_30 = arith.constant 8 : index
    %c0_31 = arith.constant 0 : index
    %36 = vector.load %arg5[%c1_29, %c8_30, %c0_31] : memref<18x32x128xf32, #tpu.memory_space<vmem>>, vector<16x16x128xf32>
    %37 = vector.shape_cast %36 : vector<16x16x128xf32> to vector<256x128xf32>
    %38 = arith.truncf %37 : vector<256x128xf32> to vector<256x128xbf16>
    %c4 = arith.constant 4 : index
    %c0_32 = arith.constant 0 : index
    %c0_33 = arith.constant 0 : index
    %39 = vector.load %arg2[%c4, %c0_32, %c0_33] : memref<9x128x128xbf16, #tpu.memory_space<vmem>>, vector<1x128x128xbf16>
    %40 = vector.shape_cast %39 : vector<1x128x128xbf16> to vector<128x128xbf16>
    %cst_34 = arith.constant dense<0.000000e+00> : vector<256x128xf32>
    %41 = tpu.matmul %38, %40, %cst_34 {dimension_numbers = #tpu.dot_dimension_numbers<[1], [0], [0], [1], [0, 0, 1, 1], [], []>} : vector<256x128xbf16>, vector<128x128xbf16>, vector<256x128xf32> -> vector<256x128xf32>
    %42 = arith.addf %35, %41 : vector<256x128xf32>
    %c1_35 = arith.constant 1 : index
    %c9_36 = arith.constant 9 : index
    %c0_37 = arith.constant 0 : index
    %43 = vector.load %arg5[%c1_35, %c9_36, %c0_37] : memref<18x32x128xf32, #tpu.memory_space<vmem>>, vector<16x16x128xf32>
    %44 = vector.shape_cast %43 : vector<16x16x128xf32> to vector<256x128xf32>
    %45 = arith.truncf %44 : vector<256x128xf32> to vector<256x128xbf16>
    %c5 = arith.constant 5 : index
    %c0_38 = arith.constant 0 : index
    %c0_39 = arith.constant 0 : index
    %46 = vector.load %arg2[%c5, %c0_38, %c0_39] : memref<9x128x128xbf16, #tpu.memory_space<vmem>>, vector<1x128x128xbf16>
    %47 = vector.shape_cast %46 : vector<1x128x128xbf16> to vector<128x128xbf16>
    %cst_40 = arith.constant dense<0.000000e+00> : vector<256x128xf32>
    %48 = tpu.matmul %45, %47, %cst_40 {dimension_numbers = #tpu.dot_dimension_numbers<[1], [0], [0], [1], [0, 0, 1, 1], [], []>} : vector<256x128xbf16>, vector<128x128xbf16>, vector<256x128xf32> -> vector<256x128xf32>
    %49 = arith.addf %42, %48 : vector<256x128xf32>
    %c2_41 = arith.constant 2 : index
    %c7_42 = arith.constant 7 : index
    %c0_43 = arith.constant 0 : index
    %50 = vector.load %arg5[%c2_41, %c7_42, %c0_43] : memref<18x32x128xf32, #tpu.memory_space<vmem>>, vector<16x16x128xf32>
    %51 = vector.shape_cast %50 : vector<16x16x128xf32> to vector<256x128xf32>
    %52 = arith.truncf %51 : vector<256x128xf32> to vector<256x128xbf16>
    %c6 = arith.constant 6 : index
    %c0_44 = arith.constant 0 : index
    %c0_45 = arith.constant 0 : index
    %53 = vector.load %arg2[%c6, %c0_44, %c0_45] : memref<9x128x128xbf16, #tpu.memory_space<vmem>>, vector<1x128x128xbf16>
    %54 = vector.shape_cast %53 : vector<1x128x128xbf16> to vector<128x128xbf16>
    %cst_46 = arith.constant dense<0.000000e+00> : vector<256x128xf32>
    %55 = tpu.matmul %52, %54, %cst_46 {dimension_numbers = #tpu.dot_dimension_numbers<[1], [0], [0], [1], [0, 0, 1, 1], [], []>} : vector<256x128xbf16>, vector<128x128xbf16>, vector<256x128xf32> -> vector<256x128xf32>
    %56 = arith.addf %49, %55 : vector<256x128xf32>
    %c2_47 = arith.constant 2 : index
    %c8_48 = arith.constant 8 : index
    %c0_49 = arith.constant 0 : index
    %57 = vector.load %arg5[%c2_47, %c8_48, %c0_49] : memref<18x32x128xf32, #tpu.memory_space<vmem>>, vector<16x16x128xf32>
    %58 = vector.shape_cast %57 : vector<16x16x128xf32> to vector<256x128xf32>
    %59 = arith.truncf %58 : vector<256x128xf32> to vector<256x128xbf16>
    %c7_50 = arith.constant 7 : index
    %c0_51 = arith.constant 0 : index
    %c0_52 = arith.constant 0 : index
    %60 = vector.load %arg2[%c7_50, %c0_51, %c0_52] : memref<9x128x128xbf16, #tpu.memory_space<vmem>>, vector<1x128x128xbf16>
    %61 = vector.shape_cast %60 : vector<1x128x128xbf16> to vector<128x128xbf16>
    %cst_53 = arith.constant dense<0.000000e+00> : vector<256x128xf32>
    %62 = tpu.matmul %59, %61, %cst_53 {dimension_numbers = #tpu.dot_dimension_numbers<[1], [0], [0], [1], [0, 0, 1, 1], [], []>} : vector<256x128xbf16>, vector<128x128xbf16>, vector<256x128xf32> -> vector<256x128xf32>
    %63 = arith.addf %56, %62 : vector<256x128xf32>
    %c2_54 = arith.constant 2 : index
    %c9_55 = arith.constant 9 : index
    %c0_56 = arith.constant 0 : index
    %64 = vector.load %arg5[%c2_54, %c9_55, %c0_56] : memref<18x32x128xf32, #tpu.memory_space<vmem>>, vector<16x16x128xf32>
    %65 = vector.shape_cast %64 : vector<16x16x128xf32> to vector<256x128xf32>
    %66 = arith.truncf %65 : vector<256x128xf32> to vector<256x128xbf16>
    %c8_57 = arith.constant 8 : index
    %c0_58 = arith.constant 0 : index
    %c0_59 = arith.constant 0 : index
    %67 = vector.load %arg2[%c8_57, %c0_58, %c0_59] : memref<9x128x128xbf16, #tpu.memory_space<vmem>>, vector<1x128x128xbf16>
    %68 = vector.shape_cast %67 : vector<1x128x128xbf16> to vector<128x128xbf16>
    %cst_60 = arith.constant dense<0.000000e+00> : vector<256x128xf32>
    %69 = tpu.matmul %66, %68, %cst_60 {dimension_numbers = #tpu.dot_dimension_numbers<[1], [0], [0], [1], [0, 0, 1, 1], [], []>} : vector<256x128xbf16>, vector<128x128xbf16>, vector<256x128xf32> -> vector<256x128xf32>
    %70 = arith.addf %63, %69 : vector<256x128xf32>
    %71 = vector.shape_cast %70 : vector<256x128xf32> to vector<16x16x128xf32>
    %72 = arith.truncf %71 : vector<16x16x128xf32> to vector<16x16x128xbf16>
    %c0_61 = arith.constant 0 : index
    %c0_62 = arith.constant 0 : index
    %c0_63 = arith.constant 0 : index
    %c0_64 = arith.constant 0 : index
    %73 = vector.load %arg3[%c0_61, %c0_62, %c0_63, %c0_64] : memref<1x16x16x128xbf16, #tpu.memory_space<vmem>>, vector<1x16x16x128xbf16>
    %74 = vector.shape_cast %73 : vector<1x16x16x128xbf16> to vector<16x16x128xbf16>
    %75 = vector.shape_cast %72 : vector<16x16x128xbf16> to vector<1x16x16x128xbf16>
    tpu.vector_store %arg3[%c0_61, %c0_62, %c0_63, %c0_64], %75 {strides = array<i32>} : memref<1x16x16x128xbf16, #tpu.memory_space<vmem>>, vector<1x16x16x128xbf16>,
    %c0_i32_65 = arith.constant 0 : i32
    %76 = arith.cmpi eq, %arg0, %c0_i32_65 : i32
    %77 = arith.extui %76 : i1 to i32
    %c0_i32_66 = arith.constant 0 : i32
    %78 = arith.cmpi ne, %77, %c0_i32_66 : i32
    scf.if %78 {
      %cst_77 = arith.constant 0.000000e+00 : f32
      %90 = vector.broadcast %cst_77 : f32 to vector<2x128xf32>
      %c0_78 = arith.constant 0 : index
      %c0_79 = arith.constant 0 : index
      %91 = vector.load %arg4[%c0_78, %c0_79] : memref<2x128xf32, #tpu.memory_space<vmem>>, vector<2x128xf32>
      tpu.vector_store %arg4[%c0_78, %c0_79], %90 {strides = array<i32>} : memref<2x128xf32, #tpu.memory_space<vmem>>, vector<2x128xf32>,
    } else {
    }
    %c0_67 = arith.constant 0 : index
    %c0_68 = arith.constant 0 : index
    %79 = vector.load %arg4[%c0_67, %c0_68] : memref<2x128xf32, #tpu.memory_space<vmem>>, vector<1x128xf32>
    %cst_69 = arith.constant dense<0.000000e+00> : vector<128xf32>
    %80 = vector.multi_reduction <add>, %70, %cst_69 [0] : vector<256x128xf32> to vector<128xf32>
    %81 = vector.shape_cast %80 : vector<128xf32> to vector<1x128xf32>
    %82 = arith.addf %79, %81 : vector<1x128xf32>
    %c0_70 = arith.constant 0 : index
    %c0_71 = arith.constant 0 : index
    %83 = vector.load %arg4[%c0_70, %c0_71] : memref<2x128xf32, #tpu.memory_space<vmem>>, vector<1x128xf32>
    tpu.vector_store %arg4[%c0_70, %c0_71], %82 {strides = array<i32>} : memref<2x128xf32, #tpu.memory_space<vmem>>, vector<1x128xf32>,
    %c1_72 = arith.constant 1 : index
    %c0_73 = arith.constant 0 : index
    %84 = vector.load %arg4[%c1_72, %c0_73] : memref<2x128xf32, #tpu.memory_space<vmem>>, vector<1x128xf32>
    %85 = arith.mulf %70, %70 : vector<256x128xf32>
    %cst_74 = arith.constant dense<0.000000e+00> : vector<128xf32>
    %86 = vector.multi_reduction <add>, %85, %cst_74 [0] : vector<256x128xf32> to vector<128xf32>
    %87 = vector.shape_cast %86 : vector<128xf32> to vector<1x128xf32>
    %88 = arith.addf %84, %87 : vector<1x128xf32>
    %c1_75 = arith.constant 1 : index
    %c0_76 = arith.constant 0 : index
    %89 = vector.load %arg4[%c1_75, %c0_76] : memref<2x128xf32, #tpu.memory_space<vmem>>, vector<1x128xf32>
    tpu.vector_store %arg4[%c1_75, %c0_76], %88 {strides = array<i32>} : memref<2x128xf32, #tpu.memory_space<vmem>>, vector<1x128xf32>,
    return
  }
  func.func @transform_0(%arg0: i32) -> (i32, i32, i32, i32) {
    %c0_i32 = arith.constant 0 : i32
    %c0_i32_0 = arith.constant 0 : i32
    %c0_i32_1 = arith.constant 0 : i32
    %c0_i32_2 = arith.constant 0 : i32
    return %arg0, %c0_i32, %c0_i32_0, %c0_i32_1 : i32, i32, i32, i32
  }
  func.func @transform_1(%arg0: i32) -> (i32, i32, i32) {
    %c0_i32 = arith.constant 0 : i32
    %c0_i32_0 = arith.constant 0 : i32
    %c0_i32_1 = arith.constant 0 : i32
    %c0_i32_2 = arith.constant 0 : i32
    return %c0_i32, %c0_i32_0, %c0_i32_1 : i32, i32, i32
  }
  func.func @transform_2(%arg0: i32) -> (i32, i32, i32, i32) {
    %c0_i32 = arith.constant 0 : i32
    %c0_i32_0 = arith.constant 0 : i32
    %c0_i32_1 = arith.constant 0 : i32
    %c0_i32_2 = arith.constant 0 : i32
    return %arg0, %c0_i32, %c0_i32_0, %c0_i32_1 : i32, i32, i32, i32
  }
  func.func @transform_3(%arg0: i32) -> (i32, i32) {
    %c0_i32 = arith.constant 0 : i32
    %c0_i32_0 = arith.constant 0 : i32
    %c0_i32_1 = arith.constant 0 : i32
    return %c0_i32, %c0_i32_0 : i32, i32
  }
}

module attributes {stable_mosaic.version = 11 : i64} {
  func.func @_finalize_kernel(%arg0: i32, %arg1: memref<1x16x16x128xbf16, #tpu.memory_space<vmem>>, %arg2: memref<2x128xf32, #tpu.memory_space<vmem>>, %arg3: memref<1x128xf32, #tpu.memory_space<vmem>>, %arg4: memref<1x128xf32, #tpu.memory_space<vmem>>, %arg5: memref<1x16x16x128xbf16, #tpu.memory_space<vmem>>, %arg6: memref<2x128xf32, #tpu.memory_space<vmem>>, %arg7: memref<1x128xf32, #tpu.memory_space<vmem>>, %arg8: memref<1x128xf32, #tpu.memory_space<vmem>>, %arg9: memref<1x8x16x128xf32, #tpu.memory_space<vmem>>) attributes {dimension_semantics = [#tpu.dimension_semantics<parallel>], iteration_bounds = array<i64: 2>, scalar_prefetch = 0 : i64, scratch_operands = 0 : i64, tpu.core_type = #tpu.core_type<tc>, window_params = [{transform_indices = @transform_0, window_bounds = array<i64: 1, 16, 16, 128>}, {pipeline_mode = #tpu.pipeline_mode<synchronous>, transform_indices = @transform_1, window_bounds = array<i64: 2, 128>}, {pipeline_mode = #tpu.pipeline_mode<synchronous>, transform_indices = @transform_2, window_bounds = array<i64: 1, 128>}, {pipeline_mode = #tpu.pipeline_mode<synchronous>, transform_indices = @transform_3, window_bounds = array<i64: 1, 128>}, {transform_indices = @transform_4, window_bounds = array<i64: 1, 16, 16, 128>}, {pipeline_mode = #tpu.pipeline_mode<synchronous>, transform_indices = @transform_5, window_bounds = array<i64: 2, 128>}, {pipeline_mode = #tpu.pipeline_mode<synchronous>, transform_indices = @transform_6, window_bounds = array<i64: 1, 128>}, {pipeline_mode = #tpu.pipeline_mode<synchronous>, transform_indices = @transform_7, window_bounds = array<i64: 1, 128>}, {transform_indices = @transform_8, window_bounds = array<i64: 1, 8, 16, 128>}]} {
    %c0 = arith.constant 0 : index
    %c0_0 = arith.constant 0 : index
    %c0_1 = arith.constant 0 : index
    %c0_2 = arith.constant 0 : index
    %0 = vector.load %arg1[%c0, %c0_0, %c0_1, %c0_2] : memref<1x16x16x128xbf16, #tpu.memory_space<vmem>>, vector<1x16x16x128xbf16>
    %1 = vector.shape_cast %0 : vector<1x16x16x128xbf16> to vector<16x16x128xbf16>
    %2 = arith.extf %1 : vector<16x16x128xbf16> to vector<16x16x128xf32>
    %3 = vector.shape_cast %2 : vector<16x16x128xf32> to vector<256x128xf32>
    %c0_3 = arith.constant 0 : index
    %c0_4 = arith.constant 0 : index
    %4 = vector.load %arg2[%c0_3, %c0_4] : memref<2x128xf32, #tpu.memory_space<vmem>>, vector<1x128xf32>
    %cst = arith.constant 0.001953125 : f32
    %5 = vector.broadcast %cst : f32 to vector<1x128xf32>
    %6 = arith.mulf %4, %5 : vector<1x128xf32>
    %c1 = arith.constant 1 : index
    %c0_5 = arith.constant 0 : index
    %7 = vector.load %arg2[%c1, %c0_5] : memref<2x128xf32, #tpu.memory_space<vmem>>, vector<1x128xf32>
    %cst_6 = arith.constant 0.001953125 : f32
    %8 = vector.broadcast %cst_6 : f32 to vector<1x128xf32>
    %9 = arith.mulf %7, %8 : vector<1x128xf32>
    %10 = arith.mulf %6, %6 : vector<1x128xf32>
    %11 = arith.subf %9, %10 : vector<1x128xf32>
    %cst_7 = arith.constant 0.000000e+00 : f32
    %12 = vector.broadcast %cst_7 : f32 to vector<1x128xf32>
    %13 = arith.maximumf %11, %12 : vector<1x128xf32>
    %c0_8 = arith.constant 0 : index
    %c0_9 = arith.constant 0 : index
    %14 = vector.load %arg3[%c0_8, %c0_9] : memref<1x128xf32, #tpu.memory_space<vmem>>, vector<1x128xf32>
    %cst_10 = arith.constant 9.99999974E-6 : f32
    %15 = vector.broadcast %cst_10 : f32 to vector<1x128xf32>
    %16 = arith.addf %13, %15 : vector<1x128xf32>
    %17 = math.rsqrt %16 : vector<1x128xf32>
    %18 = arith.mulf %14, %17 : vector<1x128xf32>
    %c0_11 = arith.constant 0 : index
    %c0_12 = arith.constant 0 : index
    %19 = vector.load %arg4[%c0_11, %c0_12] : memref<1x128xf32, #tpu.memory_space<vmem>>, vector<1x128xf32>
    %20 = arith.mulf %6, %18 : vector<1x128xf32>
    %21 = arith.subf %19, %20 : vector<1x128xf32>
    %22 = vector.broadcast %18 : vector<1x128xf32> to vector<256x128xf32>
    %23 = arith.mulf %3, %22 : vector<256x128xf32>
    %24 = vector.broadcast %21 : vector<1x128xf32> to vector<256x128xf32>
    %25 = arith.addf %23, %24 : vector<256x128xf32>
    %cst_13 = arith.constant 5.000000e-01 : f32
    %26 = vector.broadcast %cst_13 : f32 to vector<256x128xf32>
    %27 = arith.mulf %26, %25 : vector<256x128xf32>
    %cst_14 = arith.constant 0.707106769 : f32
    %28 = vector.broadcast %cst_14 : f32 to vector<256x128xf32>
    %29 = arith.mulf %25, %28 : vector<256x128xf32>
    %30 = math.erf %29 : vector<256x128xf32>
    %cst_15 = arith.constant 1.000000e+00 : f32
    %31 = vector.broadcast %cst_15 : f32 to vector<256x128xf32>
    %32 = arith.addf %31, %30 : vector<256x128xf32>
    %33 = arith.mulf %27, %32 : vector<256x128xf32>
    %c0_16 = arith.constant 0 : index
    %c0_17 = arith.constant 0 : index
    %c0_18 = arith.constant 0 : index
    %c0_19 = arith.constant 0 : index
    %34 = vector.load %arg5[%c0_16, %c0_17, %c0_18, %c0_19] : memref<1x16x16x128xbf16, #tpu.memory_space<vmem>>, vector<1x16x16x128xbf16>
    %35 = vector.shape_cast %34 : vector<1x16x16x128xbf16> to vector<16x16x128xbf16>
    %36 = arith.extf %35 : vector<16x16x128xbf16> to vector<16x16x128xf32>
    %37 = vector.shape_cast %36 : vector<16x16x128xf32> to vector<256x128xf32>
    %c0_20 = arith.constant 0 : index
    %c0_21 = arith.constant 0 : index
    %38 = vector.load %arg6[%c0_20, %c0_21] : memref<2x128xf32, #tpu.memory_space<vmem>>, vector<1x128xf32>
    %cst_22 = arith.constant 0.001953125 : f32
    %39 = vector.broadcast %cst_22 : f32 to vector<1x128xf32>
    %40 = arith.mulf %38, %39 : vector<1x128xf32>
    %c1_23 = arith.constant 1 : index
    %c0_24 = arith.constant 0 : index
    %41 = vector.load %arg6[%c1_23, %c0_24] : memref<2x128xf32, #tpu.memory_space<vmem>>, vector<1x128xf32>
    %cst_25 = arith.constant 0.001953125 : f32
    %42 = vector.broadcast %cst_25 : f32 to vector<1x128xf32>
    %43 = arith.mulf %41, %42 : vector<1x128xf32>
    %44 = arith.mulf %40, %40 : vector<1x128xf32>
    %45 = arith.subf %43, %44 : vector<1x128xf32>
    %cst_26 = arith.constant 0.000000e+00 : f32
    %46 = vector.broadcast %cst_26 : f32 to vector<1x128xf32>
    %47 = arith.maximumf %45, %46 : vector<1x128xf32>
    %c0_27 = arith.constant 0 : index
    %c0_28 = arith.constant 0 : index
    %48 = vector.load %arg7[%c0_27, %c0_28] : memref<1x128xf32, #tpu.memory_space<vmem>>, vector<1x128xf32>
    %cst_29 = arith.constant 9.99999974E-6 : f32
    %49 = vector.broadcast %cst_29 : f32 to vector<1x128xf32>
    %50 = arith.addf %47, %49 : vector<1x128xf32>
    %51 = math.rsqrt %50 : vector<1x128xf32>
    %52 = arith.mulf %48, %51 : vector<1x128xf32>
    %c0_30 = arith.constant 0 : index
    %c0_31 = arith.constant 0 : index
    %53 = vector.load %arg8[%c0_30, %c0_31] : memref<1x128xf32, #tpu.memory_space<vmem>>, vector<1x128xf32>
    %54 = arith.mulf %40, %52 : vector<1x128xf32>
    %55 = arith.subf %53, %54 : vector<1x128xf32>
    %56 = vector.broadcast %52 : vector<1x128xf32> to vector<256x128xf32>
    %57 = arith.mulf %37, %56 : vector<256x128xf32>
    %58 = vector.broadcast %55 : vector<1x128xf32> to vector<256x128xf32>
    %59 = arith.addf %57, %58 : vector<256x128xf32>
    %cst_32 = arith.constant 5.000000e-01 : f32
    %60 = vector.broadcast %cst_32 : f32 to vector<256x128xf32>
    %61 = arith.mulf %60, %59 : vector<256x128xf32>
    %cst_33 = arith.constant 0.707106769 : f32
    %62 = vector.broadcast %cst_33 : f32 to vector<256x128xf32>
    %63 = arith.mulf %59, %62 : vector<256x128xf32>
    %64 = math.erf %63 : vector<256x128xf32>
    %cst_34 = arith.constant 1.000000e+00 : f32
    %65 = vector.broadcast %cst_34 : f32 to vector<256x128xf32>
    %66 = arith.addf %65, %64 : vector<256x128xf32>
    %67 = arith.mulf %61, %66 : vector<256x128xf32>
    %68 = arith.addf %67, %33 : vector<256x128xf32>
    %cst_35 = arith.constant 0.707106769 : f32
    %69 = vector.broadcast %cst_35 : f32 to vector<256x128xf32>
    %70 = arith.mulf %68, %69 : vector<256x128xf32>
    %71 = vector.shape_cast %70 : vector<256x128xf32> to vector<8x2x16x128xf32>
    %72 = vector.extract_strided_slice %71 {offsets = [0, 0, 0, 0], sizes = [8, 1, 16, 128], strides = [1, 1, 1, 1]} : vector<8x2x16x128xf32> to vector<8x1x16x128xf32>
    %73 = vector.shape_cast %72 : vector<8x1x16x128xf32> to vector<8x16x128xf32>
    %74 = vector.extract_strided_slice %71 {offsets = [0, 1, 0, 0], sizes = [8, 1, 16, 128], strides = [1, 1, 1, 1]} : vector<8x2x16x128xf32> to vector<8x1x16x128xf32>
    %75 = vector.shape_cast %74 : vector<8x1x16x128xf32> to vector<8x16x128xf32>
    %76 = arith.maximumf %73, %75 : vector<8x16x128xf32>
    %c0_36 = arith.constant 0 : index
    %c0_37 = arith.constant 0 : index
    %c0_38 = arith.constant 0 : index
    %c0_39 = arith.constant 0 : index
    %77 = vector.load %arg9[%c0_36, %c0_37, %c0_38, %c0_39] : memref<1x8x16x128xf32, #tpu.memory_space<vmem>>, vector<1x8x16x128xf32>
    %78 = vector.shape_cast %77 : vector<1x8x16x128xf32> to vector<8x16x128xf32>
    %79 = vector.shape_cast %76 : vector<8x16x128xf32> to vector<1x8x16x128xf32>
    tpu.vector_store %arg9[%c0_36, %c0_37, %c0_38, %c0_39], %79 {strides = array<i32>} : memref<1x8x16x128xf32, #tpu.memory_space<vmem>>, vector<1x8x16x128xf32>,
    return
  }
  func.func @transform_0(%arg0: i32) -> (i32, i32, i32, i32) {
    %c0_i32 = arith.constant 0 : i32
    %c0_i32_0 = arith.constant 0 : i32
    %c0_i32_1 = arith.constant 0 : i32
    %c0_i32_2 = arith.constant 0 : i32
    return %arg0, %c0_i32, %c0_i32_0, %c0_i32_1 : i32, i32, i32, i32
  }
  func.func @transform_1(%arg0: i32) -> (i32, i32) {
    %c0_i32 = arith.constant 0 : i32
    %c0_i32_0 = arith.constant 0 : i32
    %c0_i32_1 = arith.constant 0 : i32
    return %c0_i32, %c0_i32_0 : i32, i32
  }
  func.func @transform_2(%arg0: i32) -> (i32, i32) {
    %c0_i32 = arith.constant 0 : i32
    %c0_i32_0 = arith.constant 0 : i32
    %c0_i32_1 = arith.constant 0 : i32
    return %c0_i32, %c0_i32_0 : i32, i32
  }
  func.func @transform_3(%arg0: i32) -> (i32, i32) {
    %c0_i32 = arith.constant 0 : i32
    %c0_i32_0 = arith.constant 0 : i32
    %c0_i32_1 = arith.constant 0 : i32
    return %c0_i32, %c0_i32_0 : i32, i32
  }
  func.func @transform_4(%arg0: i32) -> (i32, i32, i32, i32) {
    %c0_i32 = arith.constant 0 : i32
    %c0_i32_0 = arith.constant 0 : i32
    %c0_i32_1 = arith.constant 0 : i32
    %c0_i32_2 = arith.constant 0 : i32
    return %arg0, %c0_i32, %c0_i32_0, %c0_i32_1 : i32, i32, i32, i32
  }
  func.func @transform_5(%arg0: i32) -> (i32, i32) {
    %c0_i32 = arith.constant 0 : i32
    %c0_i32_0 = arith.constant 0 : i32
    %c0_i32_1 = arith.constant 0 : i32
    return %c0_i32, %c0_i32_0 : i32, i32
  }
  func.func @transform_6(%arg0: i32) -> (i32, i32) {
    %c0_i32 = arith.constant 0 : i32
    %c0_i32_0 = arith.constant 0 : i32
    %c0_i32_1 = arith.constant 0 : i32
    return %c0_i32, %c0_i32_0 : i32, i32
  }
  func.func @transform_7(%arg0: i32) -> (i32, i32) {
    %c0_i32 = arith.constant 0 : i32
    %c0_i32_0 = arith.constant 0 : i32
    %c0_i32_1 = arith.constant 0 : i32
    return %c0_i32, %c0_i32_0 : i32, i32
  }
  func.func @transform_8(%arg0: i32) -> (i32, i32, i32, i32) {
    %c0_i32 = arith.constant 0 : i32
    %c0_i32_0 = arith.constant 0 : i32
    %c0_i32_1 = arith.constant 0 : i32
    %c0_i32_2 = arith.constant 0 : i32
    return %arg0, %c0_i32, %c0_i32_0, %c0_i32_1 : i32, i32, i32, i32
  }
}

module attributes {stable_mosaic.version = 11 : i64} {
  func.func @_conv2_kernel(%arg0: i32, %arg1: memref<1x16x16x128xbf16, #tpu.memory_space<vmem>>, %arg2: memref<2x128xf32, #tpu.memory_space<vmem>>, %arg3: memref<1x128xf32, #tpu.memory_space<vmem>>, %arg4: memref<1x128xf32, #tpu.memory_space<vmem>>, %arg5: memref<9x128x128xbf16, #tpu.memory_space<vmem>>, %arg6: memref<1x16x16x128xbf16, #tpu.memory_space<vmem>>, %arg7: memref<2x128xf32, #tpu.memory_space<vmem>>, %arg8: memref<18x32x128xf32, #tpu.memory_space<vmem>>) attributes {dimension_semantics = [#tpu.dimension_semantics<arbitrary>], iteration_bounds = array<i64: 2>, scalar_prefetch = 0 : i64, scratch_operands = 1 : i64, tpu.core_type = #tpu.core_type<tc>, window_params = [{transform_indices = @transform_0, window_bounds = array<i64: 1, 16, 16, 128>}, {pipeline_mode = #tpu.pipeline_mode<synchronous>, transform_indices = @transform_1, window_bounds = array<i64: 2, 128>}, {pipeline_mode = #tpu.pipeline_mode<synchronous>, transform_indices = @transform_2, window_bounds = array<i64: 1, 128>}, {pipeline_mode = #tpu.pipeline_mode<synchronous>, transform_indices = @transform_3, window_bounds = array<i64: 1, 128>}, {pipeline_mode = #tpu.pipeline_mode<synchronous>, transform_indices = @transform_4, window_bounds = array<i64: 9, 128, 128>}, {transform_indices = @transform_5, window_bounds = array<i64: 1, 16, 16, 128>}, {pipeline_mode = #tpu.pipeline_mode<synchronous>, transform_indices = @transform_6, window_bounds = array<i64: 2, 128>}]} {
    %c0 = arith.constant 0 : index
    %c0_0 = arith.constant 0 : index
    %c0_1 = arith.constant 0 : index
    %c0_2 = arith.constant 0 : index
    %0 = vector.load %arg1[%c0, %c0_0, %c0_1, %c0_2] : memref<1x16x16x128xbf16, #tpu.memory_space<vmem>>, vector<1x16x16x128xbf16>
    %1 = vector.shape_cast %0 : vector<1x16x16x128xbf16> to vector<16x16x128xbf16>
    %2 = arith.extf %1 : vector<16x16x128xbf16> to vector<16x16x128xf32>
    %3 = vector.shape_cast %2 : vector<16x16x128xf32> to vector<256x128xf32>
    %c0_3 = arith.constant 0 : index
    %c0_4 = arith.constant 0 : index
    %4 = vector.load %arg2[%c0_3, %c0_4] : memref<2x128xf32, #tpu.memory_space<vmem>>, vector<1x128xf32>
    %cst = arith.constant 0.001953125 : f32
    %5 = vector.broadcast %cst : f32 to vector<1x128xf32>
    %6 = arith.mulf %4, %5 : vector<1x128xf32>
    %c1 = arith.constant 1 : index
    %c0_5 = arith.constant 0 : index
    %7 = vector.load %arg2[%c1, %c0_5] : memref<2x128xf32, #tpu.memory_space<vmem>>, vector<1x128xf32>
    %cst_6 = arith.constant 0.001953125 : f32
    %8 = vector.broadcast %cst_6 : f32 to vector<1x128xf32>
    %9 = arith.mulf %7, %8 : vector<1x128xf32>
    %10 = arith.mulf %6, %6 : vector<1x128xf32>
    %11 = arith.subf %9, %10 : vector<1x128xf32>
    %cst_7 = arith.constant 0.000000e+00 : f32
    %12 = vector.broadcast %cst_7 : f32 to vector<1x128xf32>
    %13 = arith.maximumf %11, %12 : vector<1x128xf32>
    %c0_8 = arith.constant 0 : index
    %c0_9 = arith.constant 0 : index
    %14 = vector.load %arg3[%c0_8, %c0_9] : memref<1x128xf32, #tpu.memory_space<vmem>>, vector<1x128xf32>
    %cst_10 = arith.constant 9.99999974E-6 : f32
    %15 = vector.broadcast %cst_10 : f32 to vector<1x128xf32>
    %16 = arith.addf %13, %15 : vector<1x128xf32>
    %17 = math.rsqrt %16 : vector<1x128xf32>
    %18 = arith.mulf %14, %17 : vector<1x128xf32>
    %c0_11 = arith.constant 0 : index
    %c0_12 = arith.constant 0 : index
    %19 = vector.load %arg4[%c0_11, %c0_12] : memref<1x128xf32, #tpu.memory_space<vmem>>, vector<1x128xf32>
    %20 = arith.mulf %6, %18 : vector<1x128xf32>
    %21 = arith.subf %19, %20 : vector<1x128xf32>
    %22 = vector.broadcast %18 : vector<1x128xf32> to vector<256x128xf32>
    %23 = arith.mulf %3, %22 : vector<256x128xf32>
    %24 = vector.broadcast %21 : vector<1x128xf32> to vector<256x128xf32>
    %25 = arith.addf %23, %24 : vector<256x128xf32>
    %cst_13 = arith.constant 5.000000e-01 : f32
    %26 = vector.broadcast %cst_13 : f32 to vector<256x128xf32>
    %27 = arith.mulf %26, %25 : vector<256x128xf32>
    %cst_14 = arith.constant 0.707106769 : f32
    %28 = vector.broadcast %cst_14 : f32 to vector<256x128xf32>
    %29 = arith.mulf %25, %28 : vector<256x128xf32>
    %30 = math.erf %29 : vector<256x128xf32>
    %cst_15 = arith.constant 1.000000e+00 : f32
    %31 = vector.broadcast %cst_15 : f32 to vector<256x128xf32>
    %32 = arith.addf %31, %30 : vector<256x128xf32>
    %33 = arith.mulf %27, %32 : vector<256x128xf32>
    %34 = vector.shape_cast %33 : vector<256x128xf32> to vector<16x16x128xf32>
    %c0_i32 = arith.constant 0 : i32
    %35 = arith.cmpi eq, %arg0, %c0_i32 : i32
    %36 = arith.extui %35 : i1 to i32
    %c0_i32_16 = arith.constant 0 : i32
    %37 = arith.cmpi ne, %36, %c0_i32_16 : i32
    scf.if %37 {
      %cst_92 = arith.constant 0.000000e+00 : f32
      %122 = vector.broadcast %cst_92 : f32 to vector<18x32x128xf32>
      %c0_93 = arith.constant 0 : index
      %c0_94 = arith.constant 0 : index
      %c0_95 = arith.constant 0 : index
      %123 = vector.load %arg8[%c0_93, %c0_94, %c0_95] : memref<18x32x128xf32, #tpu.memory_space<vmem>>, vector<18x32x128xf32>
      tpu.vector_store %arg8[%c0_93, %c0_94, %c0_95], %122 {strides = array<i32>} : memref<18x32x128xf32, #tpu.memory_space<vmem>>, vector<18x32x128xf32>,
    } else {
    }
    %c1_17 = arith.constant 1 : index
    %c8 = arith.constant 8 : index
    %c0_18 = arith.constant 0 : index
    %38 = vector.load %arg8[%c1_17, %c8, %c0_18] : memref<18x32x128xf32, #tpu.memory_space<vmem>>, vector<16x16x128xf32>
    tpu.vector_store %arg8[%c1_17, %c8, %c0_18], %34 {strides = array<i32>} : memref<18x32x128xf32, #tpu.memory_space<vmem>>, vector<16x16x128xf32>,
    %cst_19 = arith.constant 0.000000e+00 : f32
    %39 = vector.broadcast %cst_19 : f32 to vector<256x128xf32>
    %c0_20 = arith.constant 0 : index
    %c7 = arith.constant 7 : index
    %c0_21 = arith.constant 0 : index
    %40 = vector.load %arg8[%c0_20, %c7, %c0_21] : memref<18x32x128xf32, #tpu.memory_space<vmem>>, vector<16x16x128xf32>
    %41 = vector.shape_cast %40 : vector<16x16x128xf32> to vector<256x128xf32>
    %42 = arith.truncf %41 : vector<256x128xf32> to vector<256x128xbf16>
    %c0_22 = arith.constant 0 : index
    %c0_23 = arith.constant 0 : index
    %c0_24 = arith.constant 0 : index
    %43 = vector.load %arg5[%c0_22, %c0_23, %c0_24] : memref<9x128x128xbf16, #tpu.memory_space<vmem>>, vector<1x128x128xbf16>
    %44 = vector.shape_cast %43 : vector<1x128x128xbf16> to vector<128x128xbf16>
    %cst_25 = arith.constant dense<0.000000e+00> : vector<256x128xf32>
    %45 = tpu.matmul %42, %44, %cst_25 {dimension_numbers = #tpu.dot_dimension_numbers<[1], [0], [0], [1], [0, 0, 1, 1], [], []>} : vector<256x128xbf16>, vector<128x128xbf16>, vector<256x128xf32> -> vector<256x128xf32>
    %46 = arith.addf %39, %45 : vector<256x128xf32>
    %c0_26 = arith.constant 0 : index
    %c8_27 = arith.constant 8 : index
    %c0_28 = arith.constant 0 : index
    %47 = vector.load %arg8[%c0_26, %c8_27, %c0_28] : memref<18x32x128xf32, #tpu.memory_space<vmem>>, vector<16x16x128xf32>
    %48 = vector.shape_cast %47 : vector<16x16x128xf32> to vector<256x128xf32>
    %49 = arith.truncf %48 : vector<256x128xf32> to vector<256x128xbf16>
    %c1_29 = arith.constant 1 : index
    %c0_30 = arith.constant 0 : index
    %c0_31 = arith.constant 0 : index
    %50 = vector.load %arg5[%c1_29, %c0_30, %c0_31] : memref<9x128x128xbf16, #tpu.memory_space<vmem>>, vector<1x128x128xbf16>
    %51 = vector.shape_cast %50 : vector<1x128x128xbf16> to vector<128x128xbf16>
    %cst_32 = arith.constant dense<0.000000e+00> : vector<256x128xf32>
    %52 = tpu.matmul %49, %51, %cst_32 {dimension_numbers = #tpu.dot_dimension_numbers<[1], [0], [0], [1], [0, 0, 1, 1], [], []>} : vector<256x128xbf16>, vector<128x128xbf16>, vector<256x128xf32> -> vector<256x128xf32>
    %53 = arith.addf %46, %52 : vector<256x128xf32>
    %c0_33 = arith.constant 0 : index
    %c9 = arith.constant 9 : index
    %c0_34 = arith.constant 0 : index
    %54 = vector.load %arg8[%c0_33, %c9, %c0_34] : memref<18x32x128xf32, #tpu.memory_space<vmem>>, vector<16x16x128xf32>
    %55 = vector.shape_cast %54 : vector<16x16x128xf32> to vector<256x128xf32>
    %56 = arith.truncf %55 : vector<256x128xf32> to vector<256x128xbf16>
    %c2 = arith.constant 2 : index
    %c0_35 = arith.constant 0 : index
    %c0_36 = arith.constant 0 : index
    %57 = vector.load %arg5[%c2, %c0_35, %c0_36] : memref<9x128x128xbf16, #tpu.memory_space<vmem>>, vector<1x128x128xbf16>
    %58 = vector.shape_cast %57 : vector<1x128x128xbf16> to vector<128x128xbf16>
    %cst_37 = arith.constant dense<0.000000e+00> : vector<256x128xf32>
    %59 = tpu.matmul %56, %58, %cst_37 {dimension_numbers = #tpu.dot_dimension_numbers<[1], [0], [0], [1], [0, 0, 1, 1], [], []>} : vector<256x128xbf16>, vector<128x128xbf16>, vector<256x128xf32> -> vector<256x128xf32>
    %60 = arith.addf %53, %59 : vector<256x128xf32>
    %c1_38 = arith.constant 1 : index
    %c7_39 = arith.constant 7 : index
    %c0_40 = arith.constant 0 : index
    %61 = vector.load %arg8[%c1_38, %c7_39, %c0_40] : memref<18x32x128xf32, #tpu.memory_space<vmem>>, vector<16x16x128xf32>
    %62 = vector.shape_cast %61 : vector<16x16x128xf32> to vector<256x128xf32>
    %63 = arith.truncf %62 : vector<256x128xf32> to vector<256x128xbf16>
    %c3 = arith.constant 3 : index
    %c0_41 = arith.constant 0 : index
    %c0_42 = arith.constant 0 : index
    %64 = vector.load %arg5[%c3, %c0_41, %c0_42] : memref<9x128x128xbf16, #tpu.memory_space<vmem>>, vector<1x128x128xbf16>
    %65 = vector.shape_cast %64 : vector<1x128x128xbf16> to vector<128x128xbf16>
    %cst_43 = arith.constant dense<0.000000e+00> : vector<256x128xf32>
    %66 = tpu.matmul %63, %65, %cst_43 {dimension_numbers = #tpu.dot_dimension_numbers<[1], [0], [0], [1], [0, 0, 1, 1], [], []>} : vector<256x128xbf16>, vector<128x128xbf16>, vector<256x128xf32> -> vector<256x128xf32>
    %67 = arith.addf %60, %66 : vector<256x128xf32>
    %c1_44 = arith.constant 1 : index
    %c8_45 = arith.constant 8 : index
    %c0_46 = arith.constant 0 : index
    %68 = vector.load %arg8[%c1_44, %c8_45, %c0_46] : memref<18x32x128xf32, #tpu.memory_space<vmem>>, vector<16x16x128xf32>
    %69 = vector.shape_cast %68 : vector<16x16x128xf32> to vector<256x128xf32>
    %70 = arith.truncf %69 : vector<256x128xf32> to vector<256x128xbf16>
    %c4 = arith.constant 4 : index
    %c0_47 = arith.constant 0 : index
    %c0_48 = arith.constant 0 : index
    %71 = vector.load %arg5[%c4, %c0_47, %c0_48] : memref<9x128x128xbf16, #tpu.memory_space<vmem>>, vector<1x128x128xbf16>
    %72 = vector.shape_cast %71 : vector<1x128x128xbf16> to vector<128x128xbf16>
    %cst_49 = arith.constant dense<0.000000e+00> : vector<256x128xf32>
    %73 = tpu.matmul %70, %72, %cst_49 {dimension_numbers = #tpu.dot_dimension_numbers<[1], [0], [0], [1], [0, 0, 1, 1], [], []>} : vector<256x128xbf16>, vector<128x128xbf16>, vector<256x128xf32> -> vector<256x128xf32>
    %74 = arith.addf %67, %73 : vector<256x128xf32>
    %c1_50 = arith.constant 1 : index
    %c9_51 = arith.constant 9 : index
    %c0_52 = arith.constant 0 : index
    %75 = vector.load %arg8[%c1_50, %c9_51, %c0_52] : memref<18x32x128xf32, #tpu.memory_space<vmem>>, vector<16x16x128xf32>
    %76 = vector.shape_cast %75 : vector<16x16x128xf32> to vector<256x128xf32>
    %77 = arith.truncf %76 : vector<256x128xf32> to vector<256x128xbf16>
    %c5 = arith.constant 5 : index
    %c0_53 = arith.constant 0 : index
    %c0_54 = arith.constant 0 : index
    %78 = vector.load %arg5[%c5, %c0_53, %c0_54] : memref<9x128x128xbf16, #tpu.memory_space<vmem>>, vector<1x128x128xbf16>
    %79 = vector.shape_cast %78 : vector<1x128x128xbf16> to vector<128x128xbf16>
    %cst_55 = arith.constant dense<0.000000e+00> : vector<256x128xf32>
    %80 = tpu.matmul %77, %79, %cst_55 {dimension_numbers = #tpu.dot_dimension_numbers<[1], [0], [0], [1], [0, 0, 1, 1], [], []>} : vector<256x128xbf16>, vector<128x128xbf16>, vector<256x128xf32> -> vector<256x128xf32>
    %81 = arith.addf %74, %80 : vector<256x128xf32>
    %c2_56 = arith.constant 2 : index
    %c7_57 = arith.constant 7 : index
    %c0_58 = arith.constant 0 : index
    %82 = vector.load %arg8[%c2_56, %c7_57, %c0_58] : memref<18x32x128xf32, #tpu.memory_space<vmem>>, vector<16x16x128xf32>
    %83 = vector.shape_cast %82 : vector<16x16x128xf32> to vector<256x128xf32>
    %84 = arith.truncf %83 : vector<256x128xf32> to vector<256x128xbf16>
    %c6 = arith.constant 6 : index
    %c0_59 = arith.constant 0 : index
    %c0_60 = arith.constant 0 : index
    %85 = vector.load %arg5[%c6, %c0_59, %c0_60] : memref<9x128x128xbf16, #tpu.memory_space<vmem>>, vector<1x128x128xbf16>
    %86 = vector.shape_cast %85 : vector<1x128x128xbf16> to vector<128x128xbf16>
    %cst_61 = arith.constant dense<0.000000e+00> : vector<256x128xf32>
    %87 = tpu.matmul %84, %86, %cst_61 {dimension_numbers = #tpu.dot_dimension_numbers<[1], [0], [0], [1], [0, 0, 1, 1], [], []>} : vector<256x128xbf16>, vector<128x128xbf16>, vector<256x128xf32> -> vector<256x128xf32>
    %88 = arith.addf %81, %87 : vector<256x128xf32>
    %c2_62 = arith.constant 2 : index
    %c8_63 = arith.constant 8 : index
    %c0_64 = arith.constant 0 : index
    %89 = vector.load %arg8[%c2_62, %c8_63, %c0_64] : memref<18x32x128xf32, #tpu.memory_space<vmem>>, vector<16x16x128xf32>
    %90 = vector.shape_cast %89 : vector<16x16x128xf32> to vector<256x128xf32>
    %91 = arith.truncf %90 : vector<256x128xf32> to vector<256x128xbf16>
    %c7_65 = arith.constant 7 : index
    %c0_66 = arith.constant 0 : index
    %c0_67 = arith.constant 0 : index
    %92 = vector.load %arg5[%c7_65, %c0_66, %c0_67] : memref<9x128x128xbf16, #tpu.memory_space<vmem>>, vector<1x128x128xbf16>
    %93 = vector.shape_cast %92 : vector<1x128x128xbf16> to vector<128x128xbf16>
    %cst_68 = arith.constant dense<0.000000e+00> : vector<256x128xf32>
    %94 = tpu.matmul %91, %93, %cst_68 {dimension_numbers = #tpu.dot_dimension_numbers<[1], [0], [0], [1], [0, 0, 1, 1], [], []>} : vector<256x128xbf16>, vector<128x128xbf16>, vector<256x128xf32> -> vector<256x128xf32>
    %95 = arith.addf %88, %94 : vector<256x128xf32>
    %c2_69 = arith.constant 2 : index
    %c9_70 = arith.constant 9 : index
    %c0_71 = arith.constant 0 : index
    %96 = vector.load %arg8[%c2_69, %c9_70, %c0_71] : memref<18x32x128xf32, #tpu.memory_space<vmem>>, vector<16x16x128xf32>
    %97 = vector.shape_cast %96 : vector<16x16x128xf32> to vector<256x128xf32>
    %98 = arith.truncf %97 : vector<256x128xf32> to vector<256x128xbf16>
    %c8_72 = arith.constant 8 : index
    %c0_73 = arith.constant 0 : index
    %c0_74 = arith.constant 0 : index
    %99 = vector.load %arg5[%c8_72, %c0_73, %c0_74] : memref<9x128x128xbf16, #tpu.memory_space<vmem>>, vector<1x128x128xbf16>
    %100 = vector.shape_cast %99 : vector<1x128x128xbf16> to vector<128x128xbf16>
    %cst_75 = arith.constant dense<0.000000e+00> : vector<256x128xf32>
    %101 = tpu.matmul %98, %100, %cst_75 {dimension_numbers = #tpu.dot_dimension_numbers<[1], [0], [0], [1], [0, 0, 1, 1], [], []>} : vector<256x128xbf16>, vector<128x128xbf16>, vector<256x128xf32> -> vector<256x128xf32>
    %102 = arith.addf %95, %101 : vector<256x128xf32>
    %103 = vector.shape_cast %102 : vector<256x128xf32> to vector<16x16x128xf32>
    %104 = arith.truncf %103 : vector<16x16x128xf32> to vector<16x16x128xbf16>
    %c0_76 = arith.constant 0 : index
    %c0_77 = arith.constant 0 : index
    %c0_78 = arith.constant 0 : index
    %c0_79 = arith.constant 0 : index
    %105 = vector.load %arg6[%c0_76, %c0_77, %c0_78, %c0_79] : memref<1x16x16x128xbf16, #tpu.memory_space<vmem>>, vector<1x16x16x128xbf16>
    %106 = vector.shape_cast %105 : vector<1x16x16x128xbf16> to vector<16x16x128xbf16>
    %107 = vector.shape_cast %104 : vector<16x16x128xbf16> to vector<1x16x16x128xbf16>
    tpu.vector_store %arg6[%c0_76, %c0_77, %c0_78, %c0_79], %107 {strides = array<i32>} : memref<1x16x16x128xbf16, #tpu.memory_space<vmem>>, vector<1x16x16x128xbf16>,
    %c0_i32_80 = arith.constant 0 : i32
    %108 = arith.cmpi eq, %arg0, %c0_i32_80 : i32
    %109 = arith.extui %108 : i1 to i32
    %c0_i32_81 = arith.constant 0 : i32
    %110 = arith.cmpi ne, %109, %c0_i32_81 : i32
    scf.if %110 {
      %cst_92 = arith.constant 0.000000e+00 : f32
      %122 = vector.broadcast %cst_92 : f32 to vector<2x128xf32>
      %c0_93 = arith.constant 0 : index
      %c0_94 = arith.constant 0 : index
      %123 = vector.load %arg7[%c0_93, %c0_94] : memref<2x128xf32, #tpu.memory_space<vmem>>, vector<2x128xf32>
      tpu.vector_store %arg7[%c0_93, %c0_94], %122 {strides = array<i32>} : memref<2x128xf32, #tpu.memory_space<vmem>>, vector<2x128xf32>,
    } else {
    }
    %c0_82 = arith.constant 0 : index
    %c0_83 = arith.constant 0 : index
    %111 = vector.load %arg7[%c0_82, %c0_83] : memref<2x128xf32, #tpu.memory_space<vmem>>, vector<1x128xf32>
    %cst_84 = arith.constant dense<0.000000e+00> : vector<128xf32>
    %112 = vector.multi_reduction <add>, %102, %cst_84 [0] : vector<256x128xf32> to vector<128xf32>
    %113 = vector.shape_cast %112 : vector<128xf32> to vector<1x128xf32>
    %114 = arith.addf %111, %113 : vector<1x128xf32>
    %c0_85 = arith.constant 0 : index
    %c0_86 = arith.constant 0 : index
    %115 = vector.load %arg7[%c0_85, %c0_86] : memref<2x128xf32, #tpu.memory_space<vmem>>, vector<1x128xf32>
    tpu.vector_store %arg7[%c0_85, %c0_86], %114 {strides = array<i32>} : memref<2x128xf32, #tpu.memory_space<vmem>>, vector<1x128xf32>,
    %c1_87 = arith.constant 1 : index
    %c0_88 = arith.constant 0 : index
    %116 = vector.load %arg7[%c1_87, %c0_88] : memref<2x128xf32, #tpu.memory_space<vmem>>, vector<1x128xf32>
    %117 = arith.mulf %102, %102 : vector<256x128xf32>
    %cst_89 = arith.constant dense<0.000000e+00> : vector<128xf32>
    %118 = vector.multi_reduction <add>, %117, %cst_89 [0] : vector<256x128xf32> to vector<128xf32>
    %119 = vector.shape_cast %118 : vector<128xf32> to vector<1x128xf32>
    %120 = arith.addf %116, %119 : vector<1x128xf32>
    %c1_90 = arith.constant 1 : index
    %c0_91 = arith.constant 0 : index
    %121 = vector.load %arg7[%c1_90, %c0_91] : memref<2x128xf32, #tpu.memory_space<vmem>>, vector<1x128xf32>
    tpu.vector_store %arg7[%c1_90, %c0_91], %120 {strides = array<i32>} : memref<2x128xf32, #tpu.memory_space<vmem>>, vector<1x128xf32>,
    return
  }
  func.func @transform_0(%arg0: i32) -> (i32, i32, i32, i32) {
    %c0_i32 = arith.constant 0 : i32
    %c0_i32_0 = arith.constant 0 : i32
    %c0_i32_1 = arith.constant 0 : i32
    %c0_i32_2 = arith.constant 0 : i32
    return %arg0, %c0_i32, %c0_i32_0, %c0_i32_1 : i32, i32, i32, i32
  }
  func.func @transform_1(%arg0: i32) -> (i32, i32) {
    %c0_i32 = arith.constant 0 : i32
    %c0_i32_0 = arith.constant 0 : i32
    %c0_i32_1 = arith.constant 0 : i32
    return %c0_i32, %c0_i32_0 : i32, i32
  }
  func.func @transform_2(%arg0: i32) -> (i32, i32) {
    %c0_i32 = arith.constant 0 : i32
    %c0_i32_0 = arith.constant 0 : i32
    %c0_i32_1 = arith.constant 0 : i32
    return %c0_i32, %c0_i32_0 : i32, i32
  }
  func.func @transform_3(%arg0: i32) -> (i32, i32) {
    %c0_i32 = arith.constant 0 : i32
    %c0_i32_0 = arith.constant 0 : i32
    %c0_i32_1 = arith.constant 0 : i32
    return %c0_i32, %c0_i32_0 : i32, i32
  }
  func.func @transform_4(%arg0: i32) -> (i32, i32, i32) {
    %c0_i32 = arith.constant 0 : i32
    %c0_i32_0 = arith.constant 0 : i32
    %c0_i32_1 = arith.constant 0 : i32
    %c0_i32_2 = arith.constant 0 : i32
    return %c0_i32, %c0_i32_0, %c0_i32_1 : i32, i32, i32
  }
  func.func @transform_5(%arg0: i32) -> (i32, i32, i32, i32) {
    %c0_i32 = arith.constant 0 : i32
    %c0_i32_0 = arith.constant 0 : i32
    %c0_i32_1 = arith.constant 0 : i32
    %c0_i32_2 = arith.constant 0 : i32
    return %arg0, %c0_i32, %c0_i32_0, %c0_i32_1 : i32, i32, i32, i32
  }
  func.func @transform_6(%arg0: i32) -> (i32, i32) {
    %c0_i32 = arith.constant 0 : i32
    %c0_i32_0 = arith.constant 0 : i32
    %c0_i32_1 = arith.constant 0 : i32
    return %c0_i32, %c0_i32_0 : i32, i32
  }
}

</mosaic_0001>

<bundles_post_ra>
// kernel: unet_down_forward.5
= control target key start
LH: loop header
LB: loop body
LE: loop exit
PB: predicated region body
PF: predicated region fallthrough
CT: control target
= control target key end

     0   :  { %s1484_s27 = smov 0   ;;  %s2080_s0 = inlined_call_operand.vmem [shape: bf16[2,16,16,128], index: 0, kind: input, shape index: {}]   ;;  %s2081_s1 = inlined_call_operand.vmem [shape: f32[2,128], index: 1, kind: input, shape index: {}]   ;;  %s2082_s2 = inlined_call_operand.vmem [shape: f32[1,128], index: 2, kind: input, shape index: {}]   ;;  %s2083_s3 = inlined_call_operand.vmem [shape: f32[1,128], index: 3, kind: input, shape index: {}]   ;;  %s2084_s4 = inlined_call_operand.vmem [shape: bf16[2,16,16,128], index: 4, kind: input, shape index: {}]   ;;  %s2085_s5 = inlined_call_operand.vmem [shape: f32[2,128], index: 5, kind: input, shape index: {}]   ;;  %s2086_s6 = inlined_call_operand.vmem [shape: f32[1,128], index: 6, kind: input, shape index: {}]   ;;  %s2087_s7 = inlined_call_operand.vmem [shape: f32[1,128], index: 7, kind: input, shape index: {}]   ;;  %s2088_s8 = inlined_call_operand.vmem [shape: f32[2,8,16,128], index: 8, kind: output, shape index: {}]  }
   0x1 LB: > { %s1117_s28 = sadd.s32 4294967295, %s1437_s27   ;;  %p1121_p0 = scmp.ge.s32.totalorder %s1437_s27, 1  ;;  %s1437_s27 = sphi %s1484_s27, %s18_s27  }
   0x2   : > { %p272_p1 = scmp.lt.s32.totalorder %s1437_s27, 3 }
   0x4   : > { %p273_p2 = pnand %p1121_p0, %p272_p1 }
   0x5   : > { %p311_p3 = scmp.lt.s32.totalorder (!%p273_p2), %s1117_s28, 1  ;;  %v390_v0 = vld [vmem:[%s2081_s1] sm:$0x1] (!%p273_p2)  ;;  %v392_v1 = vld [vmem:[%s2081_s1 + $0x1] sm:$0x1] (!%p273_p2)  ;;  %v405_v4 = vlaneseq (!%p273_p2) }
   0x6   : > { %276 = sbr.rel (%p273_p2) target bundleno = 192 (0xc0), region = 52  ;;  %v1498_v2 = vmul.f32 (!%p273_p2), 0.001953125, %v390_v0  ;;  %v393_v3 = vmul.f32 (!%p273_p2), 0.001953125, %v392_v1  ;;  %v704_v5 = vld [vmem:[%s2085_s5] sm:$0x1] (!%p273_p2) }
   0x7   : > { %v706_v6 = vld [vmem:[%s2085_s5 + $0x1] sm:$0x1] (!%p273_p2)  ;;  %v1508_v8 = vmul.f32 (!%p273_p2), 0.001953125, %v704_v5  ;;  %v406_v11 = vshrl.u32 (!%p273_p2), %v405_v4, 7 }
   0x8   : > { %v394_v7 = vmul.f32 (!%p273_p2), %v1498_v2, %v1498_v2  ;;  %v707_v9 = vmul.f32 (!%p273_p2), 0.001953125, %v706_v6 }
   0x9   : > { %v708_v12 = vmul.f32 (!%p273_p2), %v1508_v8, %v1508_v8  ;;  %v1539_v21 = vsub.s32 (!%p273_p2), 0, %v406_v11 }
   0xa   : > { %v395_v10 = vsub.f32 (!%p273_p2), %v393_v3, %v394_v7  ;;  %v711_v3 = vld [vmem:[%s2086_s6] sm:$0x1] (!%p273_p2) }
   0xb   : > { %v709_v18 = vsub.f32 (!%p273_p2), %v707_v9, %v708_v12  ;;  %v401_v7 = vld [vmem:[%s2083_s3] sm:$0x1] (!%p273_p2) }
   0xc   : > { %v396_v15 = vmax.f32 (!%p273_p2), %v395_v10, 0.0 }
   0xd   : > { %s2132_s28 = smov (!%p311_p3, %s1117_s28), 1  ;;  %v710_v27 = vmax.f32 %v709_v18, 0.0  ;;  %v397_v18 = vld [vmem:[%s2082_s2] sm:$0x1] }
   0xe   : > { %s1510_s15 = sshll.u32 %s2132_s28, 7  ;;  %v398_v20 = vadd.f32 1e-05, %v396_v15 }
   0xf   : > { %s1516_s18 = scalar_lea.vmem %s2080_s0, %s1510_s15  ;;  %s1522_s21 = scalar_lea.vmem %s2084_s4, %s1510_s15  ;;  %v712_v34 = vadd.f32 1e-05, %v710_v27 }
  0x10   : > { %v1527_v13 = vld [vmem:[%s1516_s18] sm:$0xff]   ;;  %v1530_v14 = vld [vmem:[%s1516_s18 + $0x8] sm:$0xff]   ;;  %v1542_v22 = vld [vmem:[%s1516_s18 + $0x10] sm:$0xff]   ;;  %1299 = vrsqrt.f32 %v398_v20  ;;  %s1825_s11 = scalar_lea.vmem %s2088_s8, %s1510_s15 }
  0x11   : > { %v1533_v16 = vld [vmem:[%s1522_s21] sm:$0xff]   ;;  %v1536_v17 = vld [vmem:[%s1522_s21 + $0x8] sm:$0xff]   ;;  %v1135_v19 = vunpack.c.l.bf16 %v1527_v13  ;;  %v1545_v23 = vld [vmem:[%s1516_s18 + $0x18] sm:$0xff]   ;;  %v1139_v24 = vunpack.c.l.bf16 %v1530_v14  ;;  %v1136_v30 = vunpack.c.h.bf16 %v1527_v13  ;;  %v1140_v31 = vunpack.c.h.bf16 %v1530_v14 }
  0x12   : > { %v1199_v25 = vunpack.c.l.bf16 %v1533_v16  ;;  %v1203_v26 = vunpack.c.l.bf16 %v1536_v17  ;;  %v1551_v28 = vld [vmem:[%s1522_s21 + $0x10] sm:$0xff]   ;;  %v1554_v29 = vld [vmem:[%s1522_s21 + $0x18] sm:$0xff]   ;;  %v1200_v32 = vunpack.c.h.bf16 %v1533_v16  ;;  %v1560_v33 = vld [vmem:[%s1516_s18 + $0x20] sm:$0xff]   ;;  %v1204_v35 = vunpack.c.h.bf16 %v1536_v17 }
  0x13   : > { %v1143_v36 = vunpack.c.l.bf16 %v1542_v22  ;;  %v1147_v37 = vunpack.c.l.bf16 %v1545_v23  ;;  %v1566_v38 = vld [vmem:[%s1516_s18 + $0x28] sm:$0xff]   ;;  %v1569_v39 = vld [vmem:[%s1522_s21 + $0x20] sm:$0xff]   ;;  %v1207_v41 = vunpack.c.l.bf16 %v1551_v28  ;;  %v1211_v42 = vunpack.c.l.bf16 %v1554_v29  ;;  %v1579_v45 = vld [vmem:[%s1516_s18 + $0x30] sm:$0xff]  }
  0x14   : > { %v1572_v40 = vld [vmem:[%s1522_s21 + $0x28] sm:$0xff]   ;;  %v1144_v43 = vunpack.c.h.bf16 %v1542_v22  ;;  %v1148_v44 = vunpack.c.h.bf16 %v1545_v23  ;;  %1301 = vrsqrt.f32 %v712_v34  ;;  %v1208_v46 = vunpack.c.h.bf16 %v1551_v28  ;;  %v1585_v49 = vld [vmem:[%s1516_s18 + $0x38] sm:$0xff]   ;;  %v1588_v50 = vld [vmem:[%s1522_s21 + $0x30] sm:$0xff]  }
  0x15   : > { %v1212_v47 = vunpack.c.h.bf16 %v1554_v29  ;;  %v1151_v48 = vunpack.c.l.bf16 %v1560_v33  ;;  %v1591_v51 = vld [vmem:[%s1522_s21 + $0x38] sm:$0xff]   ;;  %v1598_v56 = vld [vmem:[%s1516_s18 + $0x40] sm:$0xff]   ;;  %v1605_v61 = vld [vmem:[%s1516_s18 + $0x48] sm:$0xff]  }
  0x16   : > { %v1608_v62 = vld [vmem:[%s1522_s21 + $0x40] sm:$0xff]   ;;  %v1611_v63 = vld [vmem:[%s1522_s21 + $0x48] sm:$0xff]   ;;  %v1618_v5 = vld [vmem:[%s1516_s18 + $0x50] sm:$0xff]  }
  0x17   : > { %v1625_v11 = vld [vmem:[%s1516_s18 + $0x58] sm:$0xff]   ;;  %v1628_v12 = vld [vmem:[%s1522_s21 + $0x50] sm:$0xff]   ;;  %v1641_v10 = vld [vmem:[%s1516_s18 + $0x60] sm:$0xff]  }
  0x18   : > { %v1631_v15 = vld [vmem:[%s1522_s21 + $0x58] sm:$0xff]   ;;  %v1648_v1 = vld [vmem:[%s1516_s18 + $0x68] sm:$0xff]   ;;  %v1651_v20 = vld [vmem:[%s1522_s21 + $0x60] sm:$0xff]  }
  0x19   : > { %v1654_v27 = vld [vmem:[%s1522_s21 + $0x68] sm:$0xff]   ;;  %v1667_v57 = vld [vmem:[%s1516_s18 + $0x70] sm:$0xff]   ;;  %v1683_v54 = vld [vmem:[%s1516_s18 + $0x78] sm:$0xff]  }
  0x1a   : > { %v1300_v34 = vpop.eup %1299  ;;  %v1689_v0 = vld [vmem:[%s1522_s21 + $0x70] sm:$0xff]  }
  0x1b   : > { %v400_v60 = vmul.f32 %v1300_v34, %v397_v18 }
  0x1d   : > { %v402_v59 = vmul.f32 %v400_v60, %v1498_v2  ;;  %v1678_v58 = vrot.slane %v400_v60, %v1539_v21 }
  0x1e   : > { %v1302_v4 = vpop.eup %1301 }
  0x1f   : > { %v714_v53 = vmul.f32 %v1302_v4, %v711_v3  ;;  %v403_v52 = vsub.f32 %v401_v7, %v402_v59  ;;  %v410_v2 = vmul.f32 %v1135_v19, %v1678_v58  ;;  %v412_v60 = vmul.f32 %v1139_v24, %v1678_v58  ;;  %v715_v3 = vld [vmem:[%s2087_s7] sm:$0x1] }
  0x20   : > { %v411_v4 = vmul.f32 %v1136_v30, %v1678_v58  ;;  %v413_v19 = vmul.f32 %v1140_v31, %v1678_v58  ;;  %v414_v34 = vmul.f32 %v1143_v36, %v1678_v58 }
  0x21   : > { %v716_v6 = vmul.f32 %v714_v53, %v1508_v8  ;;  %v1705_v59 = vrot.slane %v714_v53, %v1539_v21  ;;  %v1712_v24 = vrot.slane %v403_v52, %v1539_v21  ;;  %v416_v8 = vmul.f32 %v1147_v37, %v1678_v58 }
  0x22   : > { %v415_v52 = vmul.f32 %v1144_v43, %v1678_v58 }
  0x23   : > { %v717_v30 = vsub.f32 %v715_v3, %v716_v6  ;;  %v724_v14 = vmul.f32 %v1199_v25, %v1705_v59  ;;  %v726_v31 = vmul.f32 %v1203_v26, %v1705_v59  ;;  %v448_v36 = vadd.f32 %v1712_v24, %v410_v2 }
  0x24   : > { %v450_v53 = vadd.f32 %v1712_v24, %v412_v60  ;;  %v449_v37 = vadd.f32 %v1712_v24, %v411_v4  ;;  %v725_v6 = vmul.f32 %v1200_v32, %v1705_v59  ;;  %v451_v3 = vadd.f32 %v1712_v24, %v413_v19 }
  0x25   : > { %v1737_v25 = vrot.slane %v717_v30, %v1539_v21  ;;  %v727_v22 = vmul.f32 %v1204_v35, %v1705_v59  ;;  %v417_v26 = vmul.f32 %v1148_v44, %v1678_v58  ;;  %v512_v43 = vmul.f32 0.70710677, %v448_v36 }
  0x26   : > { %v514_v2 = vmul.f32 0.70710677, %v450_v53  ;;  %v452_v60 = vadd.f32 %v1712_v24, %v414_v34  ;;  %v454_v16 = vadd.f32 %v1712_v24, %v416_v8  ;;  %v1748_v32 = vmul.f32 0.5, %v448_v36 }
  0x27   : > { %v1750_v21 = vmul.f32 0.5, %v450_v53  ;;  %v762_v4 = vadd.f32 %v1737_v25, %v724_v14  ;;  %v764_v19 = vadd.f32 %v1737_v25, %v726_v31  ;;  %1303 = verf.f32 %v512_v43 }
  0x28   : > { %v1754_v17 = vmul.f32 0.5, %v449_v37  ;;  %v513_v35 = vmul.f32 0.70710677, %v449_v37  ;;  %v763_v23 = vadd.f32 %v1737_v25, %v725_v6  ;;  %1305 = verf.f32 %v514_v2 }
  0x29   : > { %v826_v44 = vmul.f32 0.70710677, %v762_v4  ;;  %v1757_v30 = vmul.f32 0.5, %v451_v3  ;;  %v515_v34 = vmul.f32 0.70710677, %v451_v3  ;;  %v1759_v8 = vmul.f32 0.5, %v762_v4 }
  0x2a   : > { %v828_v36 = vmul.f32 0.70710677, %v764_v19  ;;  %1307 = verf.f32 %v513_v35  ;;  %v765_v53 = vadd.f32 %v1737_v25, %v727_v22  ;;  %v1762_v14 = vmul.f32 0.5, %v764_v19 }
  0x2b   : > { %1309 = verf.f32 %v826_v44  ;;  %v1764_v31 = vmul.f32 0.5, %v763_v23  ;;  %v827_v43 = vmul.f32 0.70710677, %v763_v23  ;;  %v1766_v6 = vmul.f32 0.5, %v452_v60 }
  0x2c   : > { %1311 = verf.f32 %v828_v36  ;;  %v829_v37 = vmul.f32 0.70710677, %v765_v53  ;;  %v516_v2 = vmul.f32 0.70710677, %v452_v60  ;;  %v518_v13 = vmul.f32 0.70710677, %v454_v16 }
  0x2d   : > { %1313 = verf.f32 %v515_v34  ;;  %v728_v3 = vmul.f32 %v1207_v41, %v1705_v59  ;;  %v730_v22 = vmul.f32 %v1211_v42, %v1705_v59  ;;  %v453_v4 = vadd.f32 %v1712_v24, %v415_v52 }
  0x2e   : > { %1315 = verf.f32 %v827_v43  ;;  %v455_v19 = vadd.f32 %v1712_v24, %v417_v26  ;;  %v729_v35 = vmul.f32 %v1208_v46, %v1705_v59  ;;  %v731_v41 = vmul.f32 %v1212_v47, %v1705_v59 }
  0x2f   : > { %1317 = verf.f32 %v829_v37  ;;  %v766_v60 = vadd.f32 %v1737_v25, %v728_v3  ;;  %v768_v23 = vadd.f32 %v1737_v25, %v730_v22  ;;  %v797_v44 = vmul.f32 0.5, %v765_v53 }
  0x30   : > { %v1784_v42 = vmul.f32 0.5, %v454_v16  ;;  %1319 = verf.f32 %v516_v2  ;;  %v517_v52 = vmul.f32 0.70710677, %v453_v4  ;;  %v1786_v34 = vmul.f32 0.5, %v453_v4 }
  0x31   : > { %1321 = verf.f32 %v518_v13  ;;  %v830_v26 = vmul.f32 0.70710677, %v766_v60  ;;  %v1788_v28 = vmul.f32 0.5, %v455_v19  ;;  %v1304_v46 = vpop.eup %1303  ;;  %v832_v36 = vmul.f32 0.70710677, %v768_v23 }
  0x32   : > { %v519_v43 = vmul.f32 0.70710677, %v455_v19  ;;  %1323 = verf.f32 %v517_v52  ;;  %v767_v37 = vadd.f32 %v1737_v25, %v729_v35  ;;  %v1306_v3 = vpop.eup %1305  ;;  %v576_v29 = vadd.f32 1.0, %v1304_v46 }
  0x33   : > { %1325 = verf.f32 %v830_v26  ;;  %v769_v47 = vadd.f32 %v1737_v25, %v731_v41  ;;  %v418_v13 = vmul.f32 %v1151_v48, %v1678_v58  ;;  %v578_v53 = vadd.f32 1.0, %v1306_v3 }
  0x34   : > { %v1308_v16 = vpop.eup %1307  ;;  %v798_v2 = vmul.f32 0.5, %v766_v60  ;;  %1327 = verf.f32 %v832_v36  ;;  %v831_v22 = vmul.f32 0.70710677, %v767_v37  ;;  %v800_v19 = vmul.f32 0.5, %v768_v23 }
  0x35   : > { %v1310_v4 = vpop.eup %1309  ;;  %v577_v7 = vadd.f32 1.0, %v1308_v16  ;;  %1329 = verf.f32 %v519_v43  ;;  %v1795_v52 = vmul.f32 0.5, %v767_v37  ;;  %v608_v26 = vmul.f32 %v576_v29, %v1748_v32 }
  0x36   : > { %v1312_v35 = vpop.eup %1311  ;;  %v890_v46 = vadd.f32 1.0, %v1310_v4  ;;  %v833_v41 = vmul.f32 0.70710677, %v769_v47  ;;  %1331 = verf.f32 %v831_v22  ;;  %v610_v48 = vmul.f32 %v578_v53, %v1750_v21 }
  0x37   : > { %v1314_v18 = vpop.eup %1313  ;;  %v892_v55 = vadd.f32 1.0, %v1312_v35  ;;  %v2089_v60 = vunpack.c.l.bf16 %v1566_v38  ;;  %v1803_v3 = vadd.f32 %v1712_v24, %v418_v13  ;;  %v1806_v16 = vmul.f32 0.5, %v769_v47 }
  0x38   : > { %v1316_v23 = vpop.eup %1315  ;;  %v922_v43 = vmul.f32 %v890_v46, %v1759_v8  ;;  %v579_v37 = vadd.f32 1.0, %v1314_v18  ;;  %1333 = verf.f32 %v833_v41  ;;  %v609_v21 = vmul.f32 %v577_v7, %v1754_v17 }
  0x39   : > { %v420_v36 = vmul.f32 %v2089_v60, %v1678_v58  ;;  %v1318_v32 = vpop.eup %1317  ;;  %v924_v29 = vmul.f32 %v892_v55, %v1762_v14  ;;  %v891_v53 = vadd.f32 1.0, %v1316_v23  ;;  %v520_v8 = vmul.f32 0.70710677, %v1803_v3 }
  0x3a   : > { %v1320_v4 = vpop.eup %1319  ;;  %v954_v35 = vadd.f32 %v922_v43, %v608_v26  ;;  %v611_v13 = vmul.f32 %v579_v37, %v1757_v30  ;;  %v893_v60 = vadd.f32 1.0, %v1318_v32  ;;  %v2090_v55 = vunpack.c.l.bf16 %v1569_v39 }
  0x3b   : > { %v1811_v22 = vadd.f32 %v1712_v24, %v420_v36  ;;  %v1322_v18 = vpop.eup %1321  ;;  %v956_v47 = vadd.f32 %v924_v29, %v610_v48  ;;  %v923_v46 = vmul.f32 %v891_v53, %v1764_v31  ;;  %v580_v41 = vadd.f32 1.0, %v1320_v4 }
  0x3c   : > { %v732_v7 = vmul.f32 %v2090_v55, %v1705_v59  ;;  %v1324_v17 = vpop.eup %1323  ;;  %v986_v14 = vmul.f32 0.70710677, %v954_v35  ;;  %v925_v36 = vmul.f32 %v893_v60, %v797_v44  ;;  %v582_v23 = vadd.f32 1.0, %v1322_v18 }
  0x3d   : > { %v522_v26 = vmul.f32 0.70710677, %v1811_v22  ;;  %v1326_v30 = vpop.eup %1325  ;;  %v988_v43 = vmul.f32 0.70710677, %v956_v47  ;;  %v955_v37 = vadd.f32 %v923_v46, %v609_v21  ;;  %v612_v32 = vmul.f32 %v580_v41, %v1766_v6 }
  0x3e   : > { %v581_v9 = vadd.f32 1.0, %v1324_v17  ;;  %v1328_v48 = vpop.eup %1327  ;;  %v957_v31 = vadd.f32 %v925_v36, %v611_v13  ;;  %v614_v29 = vmul.f32 %v582_v23, %v1784_v42  ;;  %v894_v44 = vadd.f32 1.0, %v1326_v30  ;;  %v1835_v17 = vld [vmem:[%s1522_s21 + $0x78] sm:$0xff]  }
  0x3f   : > { %1335 = verf.f32 %v520_v8  ;;  %v1330_v53 = vpop.eup %1329  ;;  %v1018_v4 = vmax.f32 %v986_v14, %v988_v43  ;;  %v987_v35 = vmul.f32 0.70710677, %v955_v37  ;;  %v896_v21 = vadd.f32 1.0, %v1328_v48 }
  0x40   : > { %v613_v6 = vmul.f32 %v581_v9, %v1786_v34  ;;  %v1332_v60 = vpop.eup %1331  ;;  %v989_v18 = vmul.f32 0.70710677, %v957_v31  ;;  %v926_v47 = vmul.f32 %v894_v44, %v798_v2  ;;  %v583_v46 = vadd.f32 1.0, %v1330_v53 }
  0x41   : > { %1337 = verf.f32 %v522_v26  ;;  %1034 = vst [vmem:[%s1825_s11] sm:$0xff] %v1018_v4  ;;  %v928_v41 = vmul.f32 %v896_v21, %v800_v19  ;;  %v895_v13 = vadd.f32 1.0, %v1332_v60  ;;  %v2091_v42 = vunpack.c.l.bf16 %v1572_v40 }
  0x42   : > { %v770_v55 = vadd.f32 %v1737_v25, %v732_v7  ;;  %v1334_v14 = vpop.eup %1333  ;;  %v1019_v36 = vmax.f32 %v987_v35, %v989_v18  ;;  %v958_v9 = vadd.f32 %v926_v47, %v612_v32  ;;  %v615_v34 = vmul.f32 %v583_v46, %v1788_v28 }
  0x43   : > { %v734_v8 = vmul.f32 %v2091_v42, %v1705_v59  ;;  %v2092_v2 = vunpack.c.h.bf16 %v1560_v33  ;;  %v960_v26 = vadd.f32 %v928_v41, %v614_v29  ;;  %v897_v19 = vadd.f32 1.0, %v1334_v14 }
  0x44   : > { %v927_v30 = vmul.f32 %v895_v13, %v1795_v52  ;;  %1035 = vst [vmem:[%s1825_s11 + $0x8] sm:$0xff] %v1019_v36  ;;  %v990_v37 = vmul.f32 0.70710677, %v958_v9  ;;  %v834_v7 = vmul.f32 0.70710677, %v770_v55  ;;  %v2093_v48 = vunpack.c.h.bf16 %v1566_v38 }
  0x45   : > { %v419_v23 = vmul.f32 %v2092_v2, %v1678_v58  ;;  %v772_v43 = vadd.f32 %v1737_v25, %v734_v8  ;;  %v1259_v32 = vunpack.c.l.bf16 %v1835_v17  ;;  %v992_v28 = vmul.f32 0.70710677, %v960_v26 }
  0x46   : > { %v421_v31 = vmul.f32 %v2093_v48, %v1678_v58  ;;  %v929_v44 = vmul.f32 %v897_v19, %v1806_v16  ;;  %v959_v33 = vadd.f32 %v927_v30, %v613_v6  ;;  %v1192_v29 = vunpack.c.h.bf16 %v1667_v57 }
  0x47   : > { %v836_v53 = vmul.f32 0.70710677, %v772_v43  ;;  %1339 = verf.f32 %v834_v7  ;;  %v457_v52 = vadd.f32 %v1712_v24, %v419_v23  ;;  %v1020_v35 = vmax.f32 %v990_v37, %v992_v28 }
  0x48   : > { %v459_v4 = vadd.f32 %v1712_v24, %v421_v31  ;;  %v961_v21 = vadd.f32 %v929_v44, %v615_v34  ;;  %v991_v60 = vmul.f32 0.70710677, %v959_v33  ;;  %v2094_v38 = vunpack.c.h.bf16 %v1569_v39 }
  0x49   : > { %v1336_v47 = vpop.eup %1335  ;;  %v488_v16 = vmul.f32 0.5, %v1803_v3  ;;  %v490_v6 = vmul.f32 0.5, %v1811_v22  ;;  %1341 = verf.f32 %v836_v53  ;;  %v521_v46 = vmul.f32 0.70710677, %v457_v52  ;;  %1036 = vst [vmem:[%s1825_s11 + $0x10] sm:$0xff] %v1020_v35 }
  0x4a   : > { %v733_v18 = vmul.f32 %v2094_v38, %v1705_v59  ;;  %v993_v41 = vmul.f32 0.70710677, %v961_v21  ;;  %v584_v13 = vadd.f32 1.0, %v1336_v47  ;;  %v523_v42 = vmul.f32 0.70710677, %v459_v4 }
  0x4b   : > { %v2095_v8 = vunpack.c.h.bf16 %v1572_v40  ;;  %v1338_v36 = vpop.eup %1337  ;;  %1343 = verf.f32 %v521_v46  ;;  %v2096_v3 = vunpack.c.l.bf16 %v1579_v45  ;;  %v2097_v22 = vunpack.c.l.bf16 %v1585_v49 }
  0x4c   : > { %v771_v39 = vadd.f32 %v1737_v25, %v733_v18  ;;  %v1021_v2 = vmax.f32 %v991_v60, %v993_v41  ;;  %v802_v23 = vmul.f32 0.5, %v770_v55  ;;  %v804_v26 = vmul.f32 0.5, %v772_v43 }
  0x4d   : > { %v735_v14 = vmul.f32 %v2095_v8, %v1705_v59  ;;  %v422_v9 = vmul.f32 %v2096_v3, %v1678_v58  ;;  %v424_v34 = vmul.f32 %v2097_v22, %v1678_v58  ;;  %1345 = verf.f32 %v523_v42 }
  0x4e   : > { %v489_v19 = vmul.f32 0.5, %v457_v52  ;;  %v835_v30 = vmul.f32 0.70710677, %v771_v39  ;;  %1037 = vst [vmem:[%s1825_s11 + $0x18] sm:$0xff] %v1021_v2  ;;  %v586_v7 = vadd.f32 1.0, %v1338_v36  ;;  %v2098_v31 = vunpack.c.l.bf16 %v1588_v50 }
  0x4f   : > { %v773_v40 = vadd.f32 %v1737_v25, %v735_v14  ;;  %v460_v37 = vadd.f32 %v1712_v24, %v422_v9  ;;  %v462_v48 = vadd.f32 %v1712_v24, %v424_v34  ;;  %v2099_v44 = vunpack.c.l.bf16 %v1591_v51 }
  0x50   : > { %v736_v28 = vmul.f32 %v2098_v31, %v1705_v59  ;;  %v616_v43 = vmul.f32 %v584_v13, %v488_v16  ;;  %v491_v33 = vmul.f32 0.5, %v459_v4  ;;  %1347 = verf.f32 %v835_v30 }
  0x51   : > { %v738_v55 = vmul.f32 %v2099_v44, %v1705_v59  ;;  %v837_v53 = vmul.f32 0.70710677, %v773_v40  ;;  %v803_v52 = vmul.f32 0.5, %v771_v39  ;;  %v524_v35 = vmul.f32 0.70710677, %v460_v37  ;;  %v1340_v38 = vpop.eup %1339 }
  0x52   : > { %v526_v21 = vmul.f32 0.70710677, %v462_v48  ;;  %v774_v60 = vadd.f32 %v1737_v25, %v736_v28  ;;  %v2100_v47 = vunpack.c.h.bf16 %v1579_v45  ;;  %v2101_v41 = vunpack.c.h.bf16 %v1585_v49 }
  0x53   : > { %1349 = verf.f32 %v837_v53  ;;  %v776_v18 = vadd.f32 %v1737_v25, %v738_v55  ;;  %v618_v4 = vmul.f32 %v586_v7, %v490_v6  ;;  %v898_v13 = vadd.f32 1.0, %v1340_v38  ;;  %v1342_v8 = vpop.eup %1341 }
  0x54   : > { %v423_v46 = vmul.f32 %v2100_v47, %v1678_v58  ;;  %v425_v16 = vmul.f32 %v2101_v41, %v1678_v58  ;;  %1351 = verf.f32 %v524_v35  ;;  %v838_v42 = vmul.f32 0.70710677, %v774_v60 }
  0x55   : > { %v805_v14 = vmul.f32 0.5, %v773_v40  ;;  %1353 = verf.f32 %v526_v21  ;;  %v840_v36 = vmul.f32 0.70710677, %v776_v18  ;;  %v900_v3 = vadd.f32 1.0, %v1342_v8  ;;  %v1344_v22 = vpop.eup %1343 }
  0x56   : > { %v461_v39 = vadd.f32 %v1712_v24, %v423_v46  ;;  %v930_v9 = vmul.f32 %v898_v13, %v802_v23  ;;  %1355 = verf.f32 %v838_v42  ;;  %v463_v45 = vadd.f32 %v1712_v24, %v425_v16 }
  0x57   : > { %v492_v34 = vmul.f32 0.5, %v460_v37  ;;  %1357 = verf.f32 %v840_v36  ;;  %v2102_v6 = vunpack.c.h.bf16 %v1588_v50  ;;  %v1346_v30 = vpop.eup %1345  ;;  %v932_v7 = vmul.f32 %v900_v3, %v804_v26 }
  0x58   : > { %v525_v49 = vmul.f32 0.70710677, %v461_v39  ;;  %v962_v40 = vadd.f32 %v930_v9, %v616_v43  ;;  %v585_v31 = vadd.f32 1.0, %v1344_v22  ;;  %v494_v28 = vmul.f32 0.5, %v462_v48 }
  0x59   : > { %v737_v2 = vmul.f32 %v2102_v6, %v1705_v59  ;;  %v587_v44 = vadd.f32 1.0, %v1346_v30  ;;  %v527_v55 = vmul.f32 0.70710677, %v463_v45  ;;  %v2103_v23 = vunpack.c.h.bf16 %v1591_v51 }
  0x5a   : > { %1359 = verf.f32 %v525_v49  ;;  %v964_v35 = vadd.f32 %v932_v7, %v618_v4  ;;  %v994_v37 = vmul.f32 0.70710677, %v962_v40  ;;  %v806_v21 = vmul.f32 0.5, %v774_v60  ;;  %v1348_v47 = vpop.eup %1347 }
  0x5b   : > { %v739_v53 = vmul.f32 %v2103_v23, %v1705_v59  ;;  %v775_v38 = vadd.f32 %v1737_v25, %v737_v2  ;;  %v808_v50 = vmul.f32 0.5, %v776_v18  ;;  %1361 = verf.f32 %v527_v55 }
  0x5c   : > { %v2104_v48 = vunpack.c.l.bf16 %v1598_v56  ;;  %v996_v46 = vmul.f32 0.70710677, %v964_v35  ;;  %v617_v41 = vmul.f32 %v585_v31, %v489_v19  ;;  %v899_v16 = vadd.f32 1.0, %v1348_v47 }
  0x5d   : > { %v777_v26 = vadd.f32 %v1737_v25, %v739_v53  ;;  %v839_v13 = vmul.f32 0.70710677, %v775_v38  ;;  %v1350_v51 = vpop.eup %1349  ;;  %v619_v4 = vmul.f32 %v587_v44, %v491_v33  ;;  %v2105_v60 = vunpack.c.l.bf16 %v1605_v61 }
  0x5e   : > { %v426_v43 = vmul.f32 %v2104_v48, %v1678_v58  ;;  %v1352_v36 = vpop.eup %1351  ;;  %v1022_v3 = vmax.f32 %v994_v37, %v996_v46  ;;  %v901_v9 = vadd.f32 1.0, %v1350_v51  ;;  %v931_v22 = vmul.f32 %v899_v16, %v803_v52 }
  0x5f   : > { %v841_v42 = vmul.f32 0.70710677, %v777_v26  ;;  %v428_v8 = vmul.f32 %v2105_v60, %v1678_v58  ;;  %1363 = verf.f32 %v839_v13  ;;  %v1354_v49 = vpop.eup %1353  ;;  %v588_v19 = vadd.f32 1.0, %v1352_v36 }
  0x60   : > { %v1903_v18 = vadd.f32 %v1712_v24, %v426_v43  ;;  %v493_v6 = vmul.f32 0.5, %v461_v39  ;;  %v1356_v33 = vpop.eup %1355  ;;  %1038 = vst [vmem:[%s1825_s11 + $0x20] sm:$0xff] %v1022_v3  ;;  %v933_v30 = vmul.f32 %v901_v9, %v805_v14  ;;  %v963_v7 = vadd.f32 %v931_v22, %v617_v41 }
  0x61   : > { %1365 = verf.f32 %v841_v42  ;;  %v466_v2 = vadd.f32 %v1712_v24, %v428_v8  ;;  %v590_v40 = vadd.f32 1.0, %v1354_v49  ;;  %v1358_v44 = vpop.eup %1357  ;;  %v620_v55 = vmul.f32 %v588_v19, %v492_v34 }
  0x62   : > { %v528_v31 = vmul.f32 0.70710677, %v1903_v18  ;;  %v902_v23 = vadd.f32 1.0, %v1356_v33  ;;  %v495_v53 = vmul.f32 0.5, %v463_v45  ;;  %v965_v52 = vadd.f32 %v933_v30, %v619_v4 }
  0x63   : > { %v530_v35 = vmul.f32 0.70710677, %v466_v2  ;;  %v995_v37 = vmul.f32 0.70710677, %v963_v7  ;;  %v622_v47 = vmul.f32 %v590_v40, %v494_v28  ;;  %v904_v48 = vadd.f32 1.0, %v1358_v44 }
  0x64   : > { %v1360_v39 = vpop.eup %1359  ;;  %v934_v43 = vmul.f32 %v902_v23, %v806_v21  ;;  %1367 = verf.f32 %v528_v31  ;;  %v2106_v46 = vunpack.c.l.bf16 %v1608_v62  ;;  %v2107_v41 = vunpack.c.l.bf16 %v1611_v63 }
  0x65   : > { %v997_v13 = vmul.f32 0.70710677, %v965_v52  ;;  %v936_v34 = vmul.f32 %v904_v48, %v808_v50  ;;  %v589_v51 = vadd.f32 1.0, %v1360_v39  ;;  %1369 = verf.f32 %v530_v35  ;;  %v1362_v45 = vpop.eup %1361 }
  0x66   : > { %v740_v14 = vmul.f32 %v2106_v46, %v1705_v59  ;;  %v742_v16 = vmul.f32 %v2107_v41, %v1705_v59  ;;  %v966_v4 = vadd.f32 %v934_v43, %v620_v55  ;;  %v2108_v42 = vunpack.c.h.bf16 %v1598_v56 }
  0x67   : > { %v1023_v8 = vmax.f32 %v995_v37, %v997_v13  ;;  %v968_v36 = vadd.f32 %v936_v34, %v622_v47  ;;  %v591_v3 = vadd.f32 1.0, %v1362_v45  ;;  %v807_v9 = vmul.f32 0.5, %v775_v38 }
  0x68   : > { %v778_v28 = vadd.f32 %v1737_v25, %v740_v14  ;;  %v780_v21 = vadd.f32 %v1737_v25, %v742_v16  ;;  %v427_v60 = vmul.f32 %v2108_v42, %v1678_v58  ;;  %v998_v22 = vmul.f32 0.70710677, %v966_v4 }
  0x69   : > { %v621_v49 = vmul.f32 %v589_v51, %v493_v6  ;;  %v809_v50 = vmul.f32 0.5, %v777_v26  ;;  %v1364_v33 = vpop.eup %1363  ;;  %1039 = vst [vmem:[%s1825_s11 + $0x28] sm:$0xff] %v1023_v8  ;;  %v1000_v30 = vmul.f32 0.70710677, %v968_v36  ;;  %v623_v7 = vmul.f32 %v591_v3, %v495_v53 }
  0x6a   : > { %v842_v19 = vmul.f32 0.70710677, %v778_v28  ;;  %v844_v40 = vmul.f32 0.70710677, %v780_v21  ;;  %v2109_v31 = vunpack.c.h.bf16 %v1605_v61  ;;  %v903_v55 = vadd.f32 1.0, %v1364_v33 }
  0x6b   : > { %v1366_v56 = vpop.eup %1365  ;;  %v465_v23 = vadd.f32 %v1712_v24, %v427_v60  ;;  %v2110_v38 = vunpack.c.h.bf16 %v1608_v62  ;;  %v1024_v6 = vmax.f32 %v998_v22, %v1000_v30  ;;  %v496_v37 = vmul.f32 0.5, %v1903_v18 }
  0x6c   : > { %v429_v44 = vmul.f32 %v2109_v31, %v1678_v58  ;;  %1371 = verf.f32 %v842_v19  ;;  %v905_v35 = vadd.f32 1.0, %v1366_v56  ;;  %v935_v52 = vmul.f32 %v903_v55, %v807_v9 }
  0x6d   : > { %v741_v26 = vmul.f32 %v2110_v38, %v1705_v59  ;;  %1373 = verf.f32 %v844_v40  ;;  %v529_v47 = vmul.f32 0.70710677, %v465_v23  ;;  %v2111_v61 = vunpack.c.h.bf16 %v1611_v63  ;;  %1040 = vst [vmem:[%s1825_s11 + $0x30] sm:$0xff] %v1024_v6 }
  0x6e   : > { %v467_v53 = vadd.f32 %v1712_v24, %v429_v44  ;;  %v937_v39 = vmul.f32 %v905_v35, %v809_v50  ;;  %v498_v43 = vmul.f32 0.5, %v466_v2  ;;  %v1368_v14 = vpop.eup %1367  ;;  %v967_v41 = vadd.f32 %v935_v52, %v621_v49 }
  0x6f   : > { %v743_v48 = vmul.f32 %v2111_v61, %v1705_v59  ;;  %v779_v62 = vadd.f32 %v1737_v25, %v741_v26  ;;  %1375 = verf.f32 %v529_v47  ;;  %v2112_v13 = vunpack.c.l.bf16 %v1618_v5  ;;  %v1370_v34 = vpop.eup %1369 }
  0x70   : > { %v531_v46 = vmul.f32 0.70710677, %v467_v53  ;;  %v969_v51 = vadd.f32 %v937_v39, %v623_v7  ;;  %v810_v45 = vmul.f32 0.5, %v778_v28  ;;  %v812_v63 = vmul.f32 0.5, %v780_v21 }
  0x71   : > { %v781_v16 = vadd.f32 %v1737_v25, %v743_v48  ;;  %v430_v18 = vmul.f32 %v2112_v13, %v1678_v58  ;;  %v999_v4 = vmul.f32 0.70710677, %v967_v41  ;;  %v497_v42 = vmul.f32 0.5, %v465_v23 }
  0x72   : > { %1377 = verf.f32 %v531_v46  ;;  %v499_v2 = vmul.f32 0.5, %v467_v53  ;;  %v843_v60 = vmul.f32 0.70710677, %v779_v62  ;;  %v1001_v8 = vmul.f32 0.70710677, %v969_v51 }
  0x73   : > { %v592_v36 = vadd.f32 1.0, %v1368_v14  ;;  %v845_v3 = vmul.f32 0.70710677, %v781_v16  ;;  %v2113_v9 = vunpack.c.l.bf16 %v1625_v11  ;;  %v594_v49 = vadd.f32 1.0, %v1370_v34 }
  0x74   : > { %1379 = verf.f32 %v843_v60  ;;  %v468_v50 = vadd.f32 %v1712_v24, %v430_v18  ;;  %v2114_v28 = vunpack.c.l.bf16 %v1628_v12  ;;  %v1025_v19 = vmax.f32 %v999_v4, %v1001_v8 }
  0x75   : > { %v432_v22 = vmul.f32 %v2113_v9, %v1678_v58  ;;  %1381 = verf.f32 %v845_v3  ;;  %v2115_v30 = vunpack.c.l.bf16 %v1631_v15  ;;  %v811_v31 = vmul.f32 0.5, %v779_v62 }
  0x76   : > { %v744_v21 = vmul.f32 %v2114_v28, %v1705_v59  ;;  %v1372_v40 = vpop.eup %1371  ;;  %v532_v44 = vmul.f32 0.70710677, %v468_v50  ;;  %v2116_v55 = vunpack.c.h.bf16 %v1618_v5  ;;  %1041 = vst [vmem:[%s1825_s11 + $0x38] sm:$0xff] %v1025_v19  ;;  %v624_v26 = vmul.f32 %v592_v36, %v496_v37 }
  0x77   : > { %v470_v33 = vadd.f32 %v1712_v24, %v432_v22  ;;  %v746_v7 = vmul.f32 %v2115_v30, %v1705_v59  ;;  %v1374_v38 = vpop.eup %1373  ;;  %v906_v6 = vadd.f32 1.0, %v1372_v40  ;;  %v626_v52 = vmul.f32 %v594_v49, %v498_v43 }
  0x78   : > { %v782_v56 = vadd.f32 %v1737_v25, %v744_v21  ;;  %v431_v23 = vmul.f32 %v2116_v55, %v1678_v58  ;;  %v908_v47 = vadd.f32 1.0, %v1374_v38  ;;  %1383 = verf.f32 %v532_v44 }
  0x79   : > { %v534_v35 = vmul.f32 0.70710677, %v470_v33  ;;  %v784_v53 = vadd.f32 %v1737_v25, %v746_v7  ;;  %v938_v48 = vmul.f32 %v906_v6, %v810_v45  ;;  %v813_v39 = vmul.f32 0.5, %v781_v16  ;;  %v1376_v62 = vpop.eup %1375 }
  0x7a   : > { %v846_v61 = vmul.f32 0.70710677, %v782_v56  ;;  %v940_v14 = vmul.f32 %v908_v47, %v812_v63  ;;  %v2117_v5 = vunpack.c.h.bf16 %v1625_v11  ;;  %v1959_v37 = vadd.f32 %v1712_v24, %v431_v23 }
  0x7b   : > { %1385 = verf.f32 %v534_v35  ;;  %v848_v46 = vmul.f32 0.70710677, %v784_v53  ;;  %v970_v18 = vadd.f32 %v938_v48, %v624_v26  ;;  %v593_v43 = vadd.f32 1.0, %v1376_v62 }
  0x7c   : > { %1387 = verf.f32 %v846_v61  ;;  %v433_v41 = vmul.f32 %v2117_v5, %v1678_v58  ;;  %v1378_v13 = vpop.eup %1377  ;;  %v2118_v34 = vunpack.c.h.bf16 %v1628_v12  ;;  %v972_v51 = vadd.f32 %v940_v14, %v626_v52 }
  0x7d   : > { %1389 = verf.f32 %v848_v46  ;;  %v595_v45 = vadd.f32 1.0, %v1378_v13  ;;  %v500_v4 = vmul.f32 0.5, %v468_v50  ;;  %v1002_v60 = vmul.f32 0.70710677, %v970_v18 }
  0x7e   : > { %v745_v16 = vmul.f32 %v2118_v34, %v1705_v59  ;;  %v1965_v63 = vadd.f32 %v1712_v24, %v433_v41  ;;  %v502_v11 = vmul.f32 0.5, %v470_v33  ;;  %v533_v8 = vmul.f32 0.70710677, %v1959_v37  ;;  %v1380_v9 = vpop.eup %1379 }
  0x7f   : > { %v2119_v36 = vunpack.c.h.bf16 %v1631_v15  ;;  %v1004_v22 = vmul.f32 0.70710677, %v972_v51  ;;  %v625_v49 = vmul.f32 %v593_v43, %v497_v42  ;;  %v627_v28 = vmul.f32 %v595_v45, %v499_v2  ;;  %v1382_v21 = vpop.eup %1381 }
  0x80   : > { %v535_v12 = vmul.f32 0.70710677, %v1965_v63  ;;  %v907_v50 = vadd.f32 1.0, %v1380_v9  ;;  %1391 = verf.f32 %v533_v8  ;;  %v783_v19 = vadd.f32 %v1737_v25, %v745_v16 }
  0x81   : > { %v747_v3 = vmul.f32 %v2119_v36, %v1705_v59  ;;  %v1026_v30 = vmax.f32 %v1002_v60, %v1004_v22  ;;  %v909_v7 = vadd.f32 1.0, %v1382_v21  ;;  %v2120_v15 = vunpack.c.l.bf16 %v1641_v10 }
  0x82   : > { %1393 = verf.f32 %v535_v12  ;;  %v939_v44 = vmul.f32 %v907_v50, %v811_v31  ;;  %v814_v42 = vmul.f32 0.5, %v782_v56  ;;  %v816_v2 = vmul.f32 0.5, %v784_v53  ;;  %v1384_v23 = vpop.eup %1383 }
  0x83   : > { %v785_v33 = vadd.f32 %v1737_v25, %v747_v3  ;;  %v434_v40 = vmul.f32 %v2120_v15, %v1678_v58  ;;  %v847_v55 = vmul.f32 0.70710677, %v783_v19  ;;  %1042 = vst [vmem:[%s1825_s11 + $0x40] sm:$0xff] %v1026_v30  ;;  %v941_v38 = vmul.f32 %v909_v7, %v813_v39 }
  0x84   : > { %v2121_v6 = vunpack.c.l.bf16 %v1648_v1  ;;  %v971_v61 = vadd.f32 %v939_v44, %v625_v49  ;;  %v596_v48 = vadd.f32 1.0, %v1384_v23  ;;  %v2122_v31 = vunpack.c.l.bf16 %v1651_v20 }
  0x85   : > { %v849_v26 = vmul.f32 0.70710677, %v785_v33  ;;  %v1982_v52 = vadd.f32 %v1712_v24, %v434_v40  ;;  %v1386_v47 = vpop.eup %1385  ;;  %1395 = verf.f32 %v847_v55  ;;  %v973_v46 = vadd.f32 %v941_v38, %v627_v28 }
  0x86   : > { %v436_v35 = vmul.f32 %v2121_v6, %v1678_v58  ;;  %v748_v56 = vmul.f32 %v2122_v31, %v1705_v59  ;;  %v1388_v53 = vpop.eup %1387  ;;  %v598_v62 = vadd.f32 1.0, %v1386_v47  ;;  %v1003_v5 = vmul.f32 0.70710677, %v971_v61 }
  0x87   : > { %1397 = verf.f32 %v849_v26  ;;  %v1390_v14 = vpop.eup %1389  ;;  %v628_v41 = vmul.f32 %v596_v48, %v500_v4  ;;  %v910_v13 = vadd.f32 1.0, %v1388_v53  ;;  %v1196_v18 = vunpack.c.h.bf16 %v1683_v54 }
  0x88   : > { %v474_v39 = vadd.f32 %v1712_v24, %v436_v35  ;;  %v1005_v43 = vmul.f32 0.70710677, %v973_v46  ;;  %v630_v34 = vmul.f32 %v598_v62, %v502_v11  ;;  %v912_v16 = vadd.f32 1.0, %v1390_v14 }
  0x89   : > { %v1256_v51 = vunpack.c.h.bf16 %v1689_v0  ;;  %v942_v45 = vmul.f32 %v910_v13, %v814_v42  ;;  %v536_v60 = vmul.f32 0.70710677, %v1982_v52  ;;  %v2123_v36 = vunpack.c.l.bf16 %v1654_v27 }
  0x8a   : > { %v538_v8 = vmul.f32 0.70710677, %v474_v39  ;;  %v1027_v9 = vmax.f32 %v1003_v5, %v1005_v43  ;;  %v944_v22 = vmul.f32 %v912_v16, %v816_v2  ;;  %v786_v4 = vadd.f32 %v1737_v25, %v748_v56  ;;  %v1392_v28 = vpop.eup %1391 }
  0x8b   : > { %v750_v3 = vmul.f32 %v2123_v36, %v1705_v59  ;;  %v2124_v49 = vunpack.c.h.bf16 %v1641_v10  ;;  %v974_v12 = vadd.f32 %v942_v45, %v628_v41  ;;  %1399 = verf.f32 %v536_v60 }
  0x8c   : > { %v2125_v50 = vunpack.c.h.bf16 %v1648_v1  ;;  %v1394_v7 = vpop.eup %1393  ;;  %1043 = vst [vmem:[%s1825_s11 + $0x48] sm:$0xff] %v1027_v9  ;;  %v976_v15 = vadd.f32 %v944_v22, %v630_v34  ;;  %v501_v40 = vmul.f32 0.5, %v1959_v37  ;;  %v597_v44 = vadd.f32 1.0, %v1392_v28 }
  0x8d   : > { %v435_v11 = vmul.f32 %v2124_v49, %v1678_v58  ;;  %v788_v21 = vadd.f32 %v1737_v25, %v750_v3  ;;  %1401 = verf.f32 %v538_v8  ;;  %v1006_v42 = vmul.f32 0.70710677, %v974_v12 }
  0x8e   : > { %v437_v30 = vmul.f32 %v2125_v50, %v1678_v58  ;;  %v503_v10 = vmul.f32 0.5, %v1965_v63  ;;  %v599_v2 = vadd.f32 1.0, %v1394_v7  ;;  %v850_v55 = vmul.f32 0.70710677, %v786_v4 }
  0x8f   : > { %v1008_v23 = vmul.f32 0.70710677, %v976_v15  ;;  %v815_v38 = vmul.f32 0.5, %v783_v19  ;;  %v852_v26 = vmul.f32 0.70710677, %v788_v21  ;;  %v2006_v6 = vadd.f32 %v1712_v24, %v435_v11  ;;  %v1396_v1 = vpop.eup %1395 }
  0x90   : > { %v817_v35 = vmul.f32 0.5, %v785_v33  ;;  %1403 = verf.f32 %v850_v55  ;;  %v2009_v47 = vadd.f32 %v1712_v24, %v437_v30  ;;  %v2126_v37 = vunpack.c.h.bf16 %v1651_v20 }
  0x91   : > { %v1398_v63 = vpop.eup %1397  ;;  %v1028_v48 = vmax.f32 %v1006_v42, %v1008_v23  ;;  %v629_v31 = vmul.f32 %v597_v44, %v501_v40  ;;  %v911_v56 = vadd.f32 1.0, %v1396_v1  ;;  %1405 = verf.f32 %v852_v26 }
  0x92   : > { %v749_v61 = vmul.f32 %v2126_v37, %v1705_v59  ;;  %v631_v19 = vmul.f32 %v599_v2, %v503_v10  ;;  %v913_v53 = vadd.f32 1.0, %v1398_v63  ;;  %v537_v46 = vmul.f32 0.70710677, %v2006_v6 }
  0x93   : > { %v539_v62 = vmul.f32 0.70710677, %v2009_v47  ;;  %1044 = vst [vmem:[%s1825_s11 + $0x50] sm:$0xff] %v1028_v48  ;;  %v943_v33 = vmul.f32 %v911_v56, %v815_v38  ;;  %v2127_v14 = vunpack.c.h.bf16 %v1654_v27  ;;  %v2128_v41 = vunpack.c.l.bf16 %v1667_v57 }
  0x94   : > { %v787_v20 = vadd.f32 %v1737_v25, %v749_v61  ;;  %v945_v43 = vmul.f32 %v913_v53, %v817_v35  ;;  %v504_v34 = vmul.f32 0.5, %v1982_v52  ;;  %1407 = verf.f32 %v537_v46 }
  0x95   : > { %v751_v5 = vmul.f32 %v2127_v14, %v1705_v59  ;;  %v438_v13 = vmul.f32 %v2128_v41, %v1678_v58  ;;  %v2129_v16 = vunpack.c.l.bf16 %v1683_v54  ;;  %v975_v60 = vadd.f32 %v943_v33, %v629_v31  ;;  %v1400_v36 = vpop.eup %1399 }
  0x96   : > { %v506_v8 = vmul.f32 0.5, %v474_v39  ;;  %1409 = verf.f32 %v539_v62  ;;  %v977_v3 = vadd.f32 %v945_v43, %v631_v19  ;;  %v851_v9 = vmul.f32 0.70710677, %v787_v20 }
  0x97   : > { %v440_v45 = vmul.f32 %v2129_v16, %v1678_v58  ;;  %v789_v27 = vadd.f32 %v1737_v25, %v751_v5  ;;  %v2030_v22 = vadd.f32 %v1712_v24, %v438_v13  ;;  %v1402_v52 = vpop.eup %1401  ;;  %v1007_v11 = vmul.f32 0.70710677, %v975_v60 }
  0x98   : > { %v600_v28 = vadd.f32 1.0, %v1400_v36  ;;  %v2130_v50 = vunpack.c.l.bf16 %v1689_v0  ;;  %v1009_v30 = vmul.f32 0.70710677, %v977_v3  ;;  %v602_v7 = vadd.f32 1.0, %v1402_v52 }
  0x99   : > { %v2033_v49 = vadd.f32 %v1712_v24, %v440_v45  ;;  %v853_v12 = vmul.f32 0.70710677, %v789_v27  ;;  %v818_v15 = vmul.f32 0.5, %v786_v4  ;;  %1411 = verf.f32 %v851_v9 }
  0x9a   : > { %v752_v39 = vmul.f32 %v2130_v50, %v1705_v59  ;;  %v632_v40 = vmul.f32 %v600_v28, %v504_v34  ;;  %v820_v44 = vmul.f32 0.5, %v788_v21  ;;  %v540_v42 = vmul.f32 0.70710677, %v2030_v22  ;;  %v1404_v10 = vpop.eup %1403 }
  0x9b   : > { %1413 = verf.f32 %v853_v12  ;;  %v1029_v2 = vmax.f32 %v1007_v11, %v1009_v30  ;;  %v634_v55 = vmul.f32 %v602_v7, %v506_v8  ;;  %v542_v23 = vmul.f32 0.70710677, %v2033_v49  ;;  %v1406_v26 = vpop.eup %1405 }
  0x9c   : > { %v754_v38 = vmul.f32 %v1259_v32, %v1705_v59  ;;  %v914_v1 = vadd.f32 1.0, %v1404_v10  ;;  %1415 = verf.f32 %v540_v42  ;;  %v790_v4 = vadd.f32 %v1737_v25, %v752_v39 }
  0x9d   : > { %v439_v21 = vmul.f32 %v1192_v29, %v1678_v58  ;;  %1045 = vst [vmem:[%s1825_s11 + $0x58] sm:$0xff] %v1029_v2  ;;  %v916_v35 = vadd.f32 1.0, %v1406_v26  ;;  %1417 = verf.f32 %v542_v23  ;;  %v441_v61 = vmul.f32 %v1196_v18, %v1678_v58 }
  0x9e   : > { %v792_v37 = vadd.f32 %v1737_v25, %v754_v38  ;;  %v946_v63 = vmul.f32 %v914_v1, %v818_v15  ;;  %v854_v32 = vmul.f32 0.70710677, %v790_v4  ;;  %v1260_v31 = vunpack.c.h.bf16 %v1835_v17  ;;  %v1408_v56 = vpop.eup %1407 }
  0x9f   : > { %v2053_v48 = vadd.f32 %v1712_v24, %v439_v21  ;;  %v948_v19 = vmul.f32 %v916_v35, %v820_v44  ;;  %v505_v57 = vmul.f32 0.5, %v2006_v6  ;;  %v2058_v53 = vadd.f32 %v1712_v24, %v441_v61 }
  0xa0   : > { %v856_v29 = vmul.f32 0.70710677, %v792_v37  ;;  %v1410_v46 = vpop.eup %1409  ;;  %v978_v62 = vadd.f32 %v946_v63, %v632_v40  ;;  %v507_v54 = vmul.f32 0.5, %v2009_v47  ;;  %v601_v58 = vadd.f32 1.0, %v1408_v56 }
  0xa1   : > { %1419 = verf.f32 %v854_v32  ;;  %v980_v18 = vadd.f32 %v948_v19, %v634_v55  ;;  %v603_v33 = vadd.f32 1.0, %v1410_v46  ;;  %v819_v14 = vmul.f32 0.5, %v787_v20 }
  0xa2   : > { %1421 = verf.f32 %v856_v29  ;;  %v1010_v5 = vmul.f32 0.70710677, %v978_v62  ;;  %v541_v17 = vmul.f32 0.70710677, %v2053_v48  ;;  %v543_v41 = vmul.f32 0.70710677, %v2058_v53 }
  0xa3   : > { %v1412_v6 = vpop.eup %1411  ;;  %v1012_v13 = vmul.f32 0.70710677, %v980_v18  ;;  %v821_v43 = vmul.f32 0.5, %v789_v27  ;;  %v753_v24 = vmul.f32 %v1256_v51, %v1705_v59  ;;  %v755_v47 = vmul.f32 %v1260_v31, %v1705_v59 }
  0xa4   : > { %v633_v16 = vmul.f32 %v601_v58, %v505_v57  ;;  %v635_v45 = vmul.f32 %v603_v33, %v507_v54  ;;  %v915_v20 = vadd.f32 1.0, %v1412_v6  ;;  %1423 = verf.f32 %v541_v17 }
  0xa5   : > { %v1414_v34 = vpop.eup %1413  ;;  %v1030_v60 = vmax.f32 %v1010_v5, %v1012_v13  ;;  %1425 = verf.f32 %v543_v41  ;;  %v791_v36 = vadd.f32 %v1737_v25, %v753_v24  ;;  %v793_v27 = vadd.f32 %v1737_v25, %v755_v47 }
  0xa6   : > { %v917_v8 = vadd.f32 1.0, %v1414_v34  ;;  %v1416_v3 = vpop.eup %1415  ;;  %v947_v9 = vmul.f32 %v915_v20, %v819_v14  ;;  %v508_v51 = vmul.f32 0.5, %v2030_v22  ;;  %v510_v12 = vmul.f32 0.5, %v2033_v49 }
  0xa7   : > { %v1418_v52 = vpop.eup %1417  ;;  %1046 = vst [vmem:[%s1825_s11 + $0x60] sm:$0xff] %v1030_v60  ;;  %v604_v59 = vadd.f32 1.0, %v1416_v3  ;;  %v855_v11 = vmul.f32 0.70710677, %v791_v36  ;;  %v857_v39 = vmul.f32 0.70710677, %v793_v27 }
  0xa8   : > { %v949_v0 = vmul.f32 %v917_v8, %v821_v43  ;;  %v979_v28 = vadd.f32 %v947_v9, %v633_v16  ;;  %v606_v50 = vadd.f32 1.0, %v1418_v52  ;;  %v822_v7 = vmul.f32 0.5, %v790_v4 }
  0xa9   : > { %1427 = verf.f32 %v855_v11  ;;  %v824_v44 = vmul.f32 0.5, %v792_v37  ;;  %v636_v10 = vmul.f32 %v604_v59, %v508_v51  ;;  %v509_v35 = vmul.f32 0.5, %v2053_v48 }
  0xaa   : > { %v981_v30 = vadd.f32 %v949_v0, %v635_v45  ;;  %v1011_v40 = vmul.f32 0.70710677, %v979_v28  ;;  %1429 = verf.f32 %v857_v39  ;;  %v638_v22 = vmul.f32 %v606_v50, %v510_v12 }
  0xab   : > { %v1420_v15 = vpop.eup %1419  ;;  %v511_v63 = vmul.f32 0.5, %v2058_v53  ;;  %v823_v56 = vmul.f32 0.5, %v791_v36  ;;  %v825_v57 = vmul.f32 0.5, %v793_v27 }
  0xac   : > { %v1422_v25 = vpop.eup %1421  ;;  %v1013_v42 = vmul.f32 0.70710677, %v981_v30  ;;  %v918_v2 = vadd.f32 1.0, %v1420_v15 }
  0xad   : > { %v920_v55 = vadd.f32 1.0, %v1422_v25 }
  0xae   : > { %v1031_v23 = vmax.f32 %v1011_v40, %v1013_v42  ;;  %v950_v38 = vmul.f32 %v918_v2, %v822_v7  ;;  %v1424_v26 = vpop.eup %1423 }
  0xaf   : > { %v952_v49 = vmul.f32 %v920_v55, %v824_v44  ;;  %v1426_v1 = vpop.eup %1425  ;;  %v605_v61 = vadd.f32 1.0, %v1424_v26 }
  0xb0   : > { %1047 = vst [vmem:[%s1825_s11 + $0x68] sm:$0xff] %v1031_v23  ;;  %v982_v21 = vadd.f32 %v950_v38, %v636_v10  ;;  %v607_v32 = vadd.f32 1.0, %v1426_v1 }
  0xb1   : > { %v984_v4 = vadd.f32 %v952_v49, %v638_v22  ;;  %v637_v62 = vmul.f32 %v605_v61, %v509_v35 }
  0xb2   : > { %v1014_v37 = vmul.f32 0.70710677, %v982_v21  ;;  %v639_v58 = vmul.f32 %v607_v32, %v511_v63 }
  0xb3   : > { %v1016_v31 = vmul.f32 0.70710677, %v984_v4  ;;  %v1428_v19 = vpop.eup %1427 }
  0xb4   : > { %v1430_v29 = vpop.eup %1429  ;;  %v919_v54 = vadd.f32 1.0, %v1428_v19 }
  0xb5   : > { %v1032_v46 = vmax.f32 %v1014_v37, %v1016_v31  ;;  %v921_v18 = vadd.f32 1.0, %v1430_v29 }
  0xb6   : > { %v951_v33 = vmul.f32 %v919_v54, %v823_v56 }
  0xb7   : > { %1048 = vst [vmem:[%s1825_s11 + $0x70] sm:$0xff] %v1032_v46  ;;  %v953_v14 = vmul.f32 %v921_v18, %v825_v57 }
  0xb8   : > { %v983_v48 = vadd.f32 %v951_v33, %v637_v62 }
  0xb9   : > { %v985_v5 = vadd.f32 %v953_v14, %v639_v58 }
  0xba   : > { %v1015_v17 = vmul.f32 0.70710677, %v983_v48 }
  0xbb   : > { %v1017_v41 = vmul.f32 0.70710677, %v985_v5 }
  0xbd   : > { %v1033_v53 = vmax.f32 %v1015_v17, %v1017_v41 }
  0xbf   : > { %1049 = vst [vmem:[%s1825_s11 + $0x78] sm:$0xff] %v1033_v53 }
  0xc0 PF: > { %s18_s27 = sadd.s32 1, %s1437_s27  }
  0xc1   : > { %p15_p4 = scmp.ge.s32.totalorder %s18_s27, 4  }
  0xc3   :  { %17 = sbr.rel (!%p15_p4) target bundleno = 1 (0x1), region = 85 }

// kernel: unet_down_forward.3
= control target key start
LH: loop header
LB: loop body
LE: loop exit
PB: predicated region body
PF: predicated region fallthrough
CT: control target
= control target key end

     0   :  { %s4877_s12 = smov 0   ;;  %s5767_s0 = inlined_call_operand.vmem [shape: bf16[2,16,16,128], index: 0, kind: input, shape index: {}]   ;;  %s5768_s1 = inlined_call_operand.vmem [shape: bf16[9,128,128], index: 1, kind: input, shape index: {}]   ;;  %s5769_s2 = inlined_call_operand.vmem [shape: bf16[2,16,16,128], index: 2, kind: output, shape index: {0}]   ;;  %s5770_s3 = inlined_call_operand.vmem [shape: f32[2,128], index: 3, kind: output, shape index: {1}]  }
   0x1 LB: > { %s4883_s13 = sadd.s32 4294967295, %s4853_s12   ;;  %p3374_p0 = scmp.ge.s32.totalorder %s4853_s12, 1  ;;  %s4853_s12 = sphi %s4877_s12, %s14_s12  }
   0x2   : > { %p135_p1 = scmp.lt.s32.totalorder %s4853_s12, 3 }
   0x4   : > { %p136_p2 = pnand %p3374_p0, %p135_p1 }
   0x5   : > { %p159_p3 = scmp.lt.s32.totalorder (!%p136_p2), %s4883_s13, 1  ;;  %p3379_p4 = scmp.ne.s32.totalorder (!%p136_p2), %s4883_s13, 0 }
   0x6   : > { %139 = sbr.rel (%p136_p2) target bundleno = 667 (0x29b), region = 28 }
   0xd   : > { %s160_s14 = scalar_select %p159_p3, %s4883_s13, 1 }
   0xe   : > { %v4855_v48 = vmov (!%p3379_p4), 0.0  }
   0xf   : > { %s3615_s15 = sshll.u32 %s160_s14, 7  ;;  %238 = vst [vmem:[#allocation2] sm:$0xff] (!%p3379_p4), %v4855_v48  ;;  %239 = vst [vmem:[#allocation2 + $0x8] sm:$0xff] (!%p3379_p4), %v4855_v48 }
  0x10   : > { %s4892_s18 = scalar_lea.vmem %s5767_s0, %s3615_s15  ;;  %s4897_s21 = scalar_lea.vmem %s5769_s2, %s3615_s15  ;;  %240 = vst [vmem:[#allocation2 + $0x10] sm:$0xff] (!%p3379_p4), %v4855_v48  ;;  %241 = vst [vmem:[#allocation2 + $0x18] sm:$0xff] (!%p3379_p4), %v4855_v48 }
  0x11   : > { %v4900_v0 = vld [vmem:[%s4892_s18] sm:$0xff]   ;;  %v4903_v1 = vld [vmem:[%s4892_s18 + $0x8] sm:$0xff]   ;;  %v4906_v2 = vld [vmem:[%s4892_s18 + $0x10] sm:$0xff]   ;;  %242 = vst [vmem:[#allocation2 + $0x20] sm:$0xff] (!%p3379_p4), %v4855_v48 }
  0x12   : > { %v3651_v3 = vunpack.c.l.bf16 %v4900_v0  ;;  %v3652_v4 = vunpack.c.h.bf16 %v4900_v0  ;;  %v3655_v5 = vunpack.c.l.bf16 %v4903_v1  ;;  %v3656_v6 = vunpack.c.h.bf16 %v4903_v1  ;;  %v4913_v7 = vld [vmem:[%s4892_s18 + $0x18] sm:$0xff]   ;;  %v4916_v8 = vld [vmem:[%s4892_s18 + $0x20] sm:$0xff]   ;;  %v4919_v9 = vld [vmem:[%s4892_s18 + $0x28] sm:$0xff]   ;;  %243 = vst [vmem:[#allocation2 + $0x28] sm:$0xff] (!%p3379_p4), %v4855_v48 }
  0x13   : > { %v3659_v10 = vunpack.c.l.bf16 %v4906_v2  ;;  %v3660_v11 = vunpack.c.h.bf16 %v4906_v2  ;;  %v3663_v12 = vunpack.c.l.bf16 %v4913_v7  ;;  %v3664_v13 = vunpack.c.h.bf16 %v4913_v7  ;;  %v4926_v14 = vld [vmem:[%s4892_s18 + $0x30] sm:$0xff]   ;;  %v4929_v15 = vld [vmem:[%s4892_s18 + $0x38] sm:$0xff]   ;;  %v4932_v16 = vld [vmem:[%s4892_s18 + $0x40] sm:$0xff]   ;;  %237 = sbr.rel (%p3379_p4) target bundleno = 54 (0x36), region = 32  ;;  %244 = vst [vmem:[#allocation2 + $0x30] sm:$0xff] (!%p3379_p4), %v4855_v48 }
  0x14   : > { %v3667_v17 = vunpack.c.l.bf16 %v4916_v8  ;;  %v3668_v18 = vunpack.c.h.bf16 %v4916_v8  ;;  %v3671_v19 = vunpack.c.l.bf16 %v4919_v9  ;;  %v3672_v20 = vunpack.c.h.bf16 %v4919_v9  ;;  %v4939_v21 = vld [vmem:[%s4892_s18 + $0x48] sm:$0xff]   ;;  %v4942_v22 = vld [vmem:[%s4892_s18 + $0x50] sm:$0xff]   ;;  %v4945_v23 = vld [vmem:[%s4892_s18 + $0x58] sm:$0xff]   ;;  %245 = vst [vmem:[#allocation2 + $0x38] sm:$0xff] (!%p3379_p4), %v4855_v48 }
  0x15   : > { %v3675_v24 = vunpack.c.l.bf16 %v4926_v14  ;;  %v3676_v25 = vunpack.c.h.bf16 %v4926_v14  ;;  %v3679_v26 = vunpack.c.l.bf16 %v4929_v15  ;;  %v3680_v27 = vunpack.c.h.bf16 %v4929_v15  ;;  %v4952_v28 = vld [vmem:[%s4892_s18 + $0x60] sm:$0xff]   ;;  %v4955_v29 = vld [vmem:[%s4892_s18 + $0x68] sm:$0xff]   ;;  %v4962_v34 = vld [vmem:[%s4892_s18 + $0x70] sm:$0xff]   ;;  %246 = vst [vmem:[#allocation2 + $0x40] sm:$0xff] (!%p3379_p4), %v4855_v48 }
  0x16   : > { %v3683_v30 = vunpack.c.l.bf16 %v4932_v16  ;;  %v3684_v31 = vunpack.c.h.bf16 %v4932_v16  ;;  %v3687_v32 = vunpack.c.l.bf16 %v4939_v21  ;;  %v3688_v33 = vunpack.c.h.bf16 %v4939_v21  ;;  %v4965_v35 = vld [vmem:[%s4892_s18 + $0x78] sm:$0xff]   ;;  %247 = vst [vmem:[#allocation2 + $0x48] sm:$0xff] (!%p3379_p4), %v4855_v48  ;;  %248 = vst [vmem:[#allocation2 + $0x50] sm:$0xff] (!%p3379_p4), %v4855_v48 }
  0x17   : > { %v3691_v36 = vunpack.c.l.bf16 %v4942_v22  ;;  %v3692_v37 = vunpack.c.h.bf16 %v4942_v22  ;;  %v3695_v38 = vunpack.c.l.bf16 %v4945_v23  ;;  %v3696_v39 = vunpack.c.h.bf16 %v4945_v23  ;;  %249 = vst [vmem:[#allocation2 + $0x58] sm:$0xff] (!%p3379_p4), %v4855_v48  ;;  %250 = vst [vmem:[#allocation2 + $0x60] sm:$0xff] (!%p3379_p4), %v4855_v48 }
  0x18   : > { %v3699_v40 = vunpack.c.l.bf16 %v4952_v28  ;;  %v3700_v41 = vunpack.c.h.bf16 %v4952_v28  ;;  %v3703_v42 = vunpack.c.l.bf16 %v4955_v29  ;;  %v3704_v43 = vunpack.c.h.bf16 %v4955_v29  ;;  %251 = vst [vmem:[#allocation2 + $0x68] sm:$0xff] (!%p3379_p4), %v4855_v48  ;;  %252 = vst [vmem:[#allocation2 + $0x70] sm:$0xff] (!%p3379_p4), %v4855_v48 }
  0x19   : > { %v3707_v44 = vunpack.c.l.bf16 %v4962_v34  ;;  %v3708_v45 = vunpack.c.h.bf16 %v4962_v34  ;;  %v3711_v46 = vunpack.c.l.bf16 %v4965_v35  ;;  %v3712_v47 = vunpack.c.h.bf16 %v4965_v35  ;;  %253 = vst [vmem:[#allocation2 + $0x78] sm:$0xff] (!%p3379_p4), %v4855_v48  ;;  %254 = vst [vmem:[#allocation2 + $0x80] sm:$0xff] (!%p3379_p4), %v4855_v48 }
  0x1a   : > { %255 = vst [vmem:[#allocation2 + $0x88] sm:$0xff] %v4855_v48  ;;  %256 = vst [vmem:[#allocation2 + $0x90] sm:$0xff] %v4855_v48 }
  0x1b   : > { %257 = vst [vmem:[#allocation2 + $0x98] sm:$0xff] %v4855_v48  ;;  %258 = vst [vmem:[#allocation2 + $0xa0] sm:$0xff] %v4855_v48 }
  0x1c   : > { %259 = vst [vmem:[#allocation2 + $0xa8] sm:$0xff] %v4855_v48  ;;  %260 = vst [vmem:[#allocation2 + $0xb0] sm:$0xff] %v4855_v48 }
  0x1d   : > { %261 = vst [vmem:[#allocation2 + $0xb8] sm:$0xff] %v4855_v48  ;;  %262 = vst [vmem:[#allocation2 + $0xc0] sm:$0xff] %v4855_v48 }
  0x1e   : > { %263 = vst [vmem:[#allocation2 + $0xc8] sm:$0xff] %v4855_v48  ;;  %264 = vst [vmem:[#allocation2 + $0xd0] sm:$0xff] %v4855_v48 }
  0x1f   : > { %265 = vst [vmem:[#allocation2 + $0xd8] sm:$0xff] %v4855_v48  ;;  %266 = vst [vmem:[#allocation2 + $0xe0] sm:$0xff] %v4855_v48 }
  0x20   : > { %267 = vst [vmem:[#allocation2 + $0xe8] sm:$0xff] %v4855_v48  ;;  %268 = vst [vmem:[#allocation2 + $0xf0] sm:$0xff] %v4855_v48 }
  0x21   : > { %269 = vst [vmem:[#allocation2 + $0xf8] sm:$0xff] %v4855_v48  ;;  %270 = vst [vmem:[#allocation2 + $0x100] sm:$0xff] %v4855_v48 }
  0x22   : > { %271 = vst [vmem:[#allocation2 + $0x108] sm:$0xff] %v4855_v48  ;;  %272 = vst [vmem:[#allocation2 + $0x110] sm:$0xff] %v4855_v48 }
  0x23   : > { %273 = vst [vmem:[#allocation2 + $0x118] sm:$0xff] %v4855_v48  ;;  %274 = vst [vmem:[#allocation2 + $0x120] sm:$0xff] %v4855_v48 }
  0x24   : > { %275 = vst [vmem:[#allocation2 + $0x128] sm:$0xff] %v4855_v48  ;;  %276 = vst [vmem:[#allocation2 + $0x130] sm:$0xff] %v4855_v48 }
  0x25   : > { %277 = vst [vmem:[#allocation2 + $0x138] sm:$0xff] %v4855_v48  ;;  %278 = vst [vmem:[#allocation2 + $0x140] sm:$0xff] %v4855_v48 }
  0x26   : > { %279 = vst [vmem:[#allocation2 + $0x148] sm:$0xff] %v4855_v48  ;;  %280 = vst [vmem:[#allocation2 + $0x150] sm:$0xff] %v4855_v48 }
  0x27   : > { %281 = vst [vmem:[#allocation2 + $0x158] sm:$0xff] %v4855_v48  ;;  %282 = vst [vmem:[#allocation2 + $0x160] sm:$0xff] %v4855_v48 }
  0x28   : > { %283 = vst [vmem:[#allocation2 + $0x168] sm:$0xff] %v4855_v48  ;;  %284 = vst [vmem:[#allocation2 + $0x170] sm:$0xff] %v4855_v48 }
  0x29   : > { %285 = vst [vmem:[#allocation2 + $0x178] sm:$0xff] %v4855_v48  ;;  %286 = vst [vmem:[#allocation2 + $0x180] sm:$0xff] %v4855_v48 }
  0x2a   : > { %287 = vst [vmem:[#allocation2 + $0x188] sm:$0xff] %v4855_v48  ;;  %288 = vst [vmem:[#allocation2 + $0x190] sm:$0xff] %v4855_v48 }
  0x2b   : > { %289 = vst [vmem:[#allocation2 + $0x198] sm:$0xff] %v4855_v48  ;;  %290 = vst [vmem:[#allocation2 + $0x1a0] sm:$0xff] %v4855_v48 }
  0x2c   : > { %291 = vst [vmem:[#allocation2 + $0x1a8] sm:$0xff] %v4855_v48  ;;  %292 = vst [vmem:[#allocation2 + $0x1b0] sm:$0xff] %v4855_v48 }
  0x2d   : > { %293 = vst [vmem:[#allocation2 + $0x1b8] sm:$0xff] %v4855_v48  ;;  %294 = vst [vmem:[#allocation2 + $0x1c0] sm:$0xff] %v4855_v48 }
  0x2e   : > { %295 = vst [vmem:[#allocation2 + $0x1c8] sm:$0xff] %v4855_v48  ;;  %296 = vst [vmem:[#allocation2 + $0x1d0] sm:$0xff] %v4855_v48 }
  0x2f   : > { %297 = vst [vmem:[#allocation2 + $0x1d8] sm:$0xff] %v4855_v48  ;;  %298 = vst [vmem:[#allocation2 + $0x1e0] sm:$0xff] %v4855_v48 }
  0x30   : > { %299 = vst [vmem:[#allocation2 + $0x1e8] sm:$0xff] %v4855_v48  ;;  %300 = vst [vmem:[#allocation2 + $0x1f0] sm:$0xff] %v4855_v48 }
  0x31   : > { %301 = vst [vmem:[#allocation2 + $0x1f8] sm:$0xff] %v4855_v48  ;;  %302 = vst [vmem:[#allocation2 + $0x200] sm:$0xff] %v4855_v48 }
  0x32   : > { %303 = vst [vmem:[#allocation2 + $0x208] sm:$0xff] %v4855_v48  ;;  %304 = vst [vmem:[#allocation2 + $0x210] sm:$0xff] %v4855_v48 }
  0x33   : > { %305 = vst [vmem:[#allocation2 + $0x218] sm:$0xff] %v4855_v48  ;;  %306 = vst [vmem:[#allocation2 + $0x220] sm:$0xff] %v4855_v48 }
  0x34   : > { %307 = vst [vmem:[#allocation2 + $0x228] sm:$0xff] %v4855_v48  ;;  %308 = vst [vmem:[#allocation2 + $0x230] sm:$0xff] %v4855_v48 }
  0x35   : > { %309 = vst [vmem:[#allocation2 + $0x238] sm:$0xff] %v4855_v48 }
  0x36 PF: > { %v4753_v49 = vld [vmem:[%s5768_s1 + $0x40] sm:$0xff]   ;;  %311 = vst [vmem:[#allocation2 + $0x28] sm:$0xff] %v3651_v3  ;;  %312 = vst [vmem:[#allocation2 + $0x30] sm:$0xff] %v3652_v4  ;;  %v4755_v51 = vld [vmem:[%s5768_s1 + $0x48] sm:$0xff]   ;;  %4247 = vmatprep.mubr.bf16.mxu0 %v4900_v0 }
  0x37   : > { %313 = vst [vmem:[#allocation2 + $0x48] sm:$0xff] %v3655_v5  ;;  %314 = vst [vmem:[#allocation2 + $0x50] sm:$0xff] %v3656_v6  ;;  %v4754_v50 = vld [vmem:[%s5768_s1 + $0x100] sm:$0xff]   ;;  %4039 = vmatprep.subr.bf16.mxu1 %v4753_v49  ;;  %v4756_v52 = vld [vmem:[%s5768_s1 + $0x108] sm:$0xff]  }
  0x38   : > { %315 = vst [vmem:[#allocation2 + $0x68] sm:$0xff] %v3659_v10  ;;  %316 = vst [vmem:[#allocation2 + $0x70] sm:$0xff] %v3660_v11  ;;  %4231 = vmatprep.subr.bf16.mxu0 %v4754_v50  ;;  %4040 = vmatpush3.bf16.msra.mxu1 %v4753_v49  ;;  %v4757_v53 = vld [vmem:[%s5768_s1 + $0x50] sm:$0xff]   ;;  %v4759_v55 = vld [vmem:[%s5768_s1 + $0x58] sm:$0xff]  }
  0x39   : > { %317 = vst [vmem:[#allocation2 + $0x88] sm:$0xff] %v3663_v12  ;;  %318 = vst [vmem:[#allocation2 + $0x90] sm:$0xff] %v3664_v13  ;;  %4232 = vmatpush3.bf16.msra.mxu0 %v4754_v50  ;;  %4041 = vmatprep.subr.bf16.mxu1 %v4755_v51  ;;  %v4758_v54 = vld [vmem:[%s5768_s1 + $0x110] sm:$0xff]   ;;  %v4760_v56 = vld [vmem:[%s5768_s1 + $0x118] sm:$0xff]  }
  0x3a   : > { %319 = vst [vmem:[#allocation2 + $0xa8] sm:$0xff] %v3667_v17  ;;  %320 = vst [vmem:[#allocation2 + $0xb0] sm:$0xff] %v3668_v18  ;;  %4233 = vmatprep.subr.bf16.mxu0 %v4756_v52  ;;  %v4761_v57 = vld [vmem:[%s5768_s1 + $0x60] sm:$0xff]   ;;  %v4763_v59 = vld [vmem:[%s5768_s1 + $0x68] sm:$0xff]  }
  0x3b   : > { %321 = vst [vmem:[#allocation2 + $0xc8] sm:$0xff] %v3671_v19  ;;  %322 = vst [vmem:[#allocation2 + $0xd0] sm:$0xff] %v3672_v20  ;;  %v4762_v58 = vld [vmem:[%s5768_s1 + $0x120] sm:$0xff]   ;;  %v407_v60 = vld [vmem:[#allocation2 + $0x8] sm:$0xff] }
  0x3c   : > { %323 = vst [vmem:[#allocation2 + $0xe8] sm:$0xff] %v3675_v24  ;;  %324 = vst [vmem:[#allocation2 + $0xf0] sm:$0xff] %v3676_v25  ;;  %4042 = vmatpush3.bf16.msra.mxu1 %v4755_v51  ;;  %v408_v61 = vld [vmem:[#allocation2 + $0x10] sm:$0xff]  ;;  %v4764_v62 = vld [vmem:[%s5768_s1 + $0x128] sm:$0xff]  }
  0x3d   : > { %325 = vst [vmem:[#allocation2 + $0x108] sm:$0xff] %v3679_v26  ;;  %326 = vst [vmem:[#allocation2 + $0x110] sm:$0xff] %v3680_v27  ;;  %4234 = vmatpush3.bf16.msra.mxu0 %v4756_v52  ;;  %4043 = vmatprep.subr.bf16.mxu1 %v4757_v53  ;;  %v439_v63 = vpack.c.bf16 %v408_v61, %v407_v60  ;;  %v4765_v3 = vld [vmem:[%s5768_s1 + $0x70] sm:$0xff]   ;;  %v4767_v5 = vld [vmem:[%s5768_s1 + $0x78] sm:$0xff]  }
  0x3e   : > { %327 = vst [vmem:[#allocation2 + $0x128] sm:$0xff] %v3683_v30  ;;  %328 = vst [vmem:[#allocation2 + $0x130] sm:$0xff] %v3684_v31  ;;  %4235 = vmatprep.subr.bf16.mxu0 %v4758_v54  ;;  %v4766_v4 = vld [vmem:[%s5768_s1 + $0x130] sm:$0xff]   ;;  %v4768_v6 = vld [vmem:[%s5768_s1 + $0x138] sm:$0xff]  }
  0x3f   : > { %329 = vst [vmem:[#allocation2 + $0x148] sm:$0xff] %v3687_v32  ;;  %330 = vst [vmem:[#allocation2 + $0x150] sm:$0xff] %v3688_v33  ;;  %4055 = vmatprep.mubr.bf16.mxu1 %v439_v63  ;;  %v4769_v10 = vld [vmem:[%s5768_s1] sm:$0xff]   ;;  %v4771_v12 = vld [vmem:[%s5768_s1 + $0x148] sm:$0xff]  }
  0x40   : > { %331 = vst [vmem:[#allocation2 + $0x168] sm:$0xff] %v3691_v36  ;;  %332 = vst [vmem:[#allocation2 + $0x170] sm:$0xff] %v3692_v37  ;;  %4044 = vmatpush3.bf16.msra.mxu1 %v4757_v53  ;;  %v4770_v11 = vld [vmem:[%s5768_s1 + $0x140] sm:$0xff]   ;;  %v4772_v13 = vld [vmem:[%s5768_s1 + $0x8] sm:$0xff]  }
  0x41   : > { %333 = vst [vmem:[#allocation2 + $0x188] sm:$0xff] %v3695_v38  ;;  %334 = vst [vmem:[#allocation2 + $0x190] sm:$0xff] %v3696_v39  ;;  %4236 = vmatpush3.bf16.msra.mxu0 %v4758_v54  ;;  %4045 = vmatprep.subr.bf16.mxu1 %v4759_v55  ;;  %v4775_v17 = vld [vmem:[%s5768_s1 + $0x10] sm:$0xff]   ;;  %v4778_v18 = vld [vmem:[%s5768_s1 + $0x18] sm:$0xff]  }
  0x42   : > { %335 = vst [vmem:[#allocation2 + $0x1a8] sm:$0xff] %v3699_v40  ;;  %336 = vst [vmem:[#allocation2 + $0x1b0] sm:$0xff] %v3700_v41  ;;  %4237 = vmatprep.subr.bf16.mxu0 %v4760_v56  ;;  %v4776_v19 = vld [vmem:[%s5768_s1 + $0x160] sm:$0xff]   ;;  %v4783_v20 = vld [vmem:[%s5768_s1 + $0x28] sm:$0xff]  }
  0x43   : > { %337 = vst [vmem:[#allocation2 + $0x1c8] sm:$0xff] %v3703_v42  ;;  %338 = vst [vmem:[#allocation2 + $0x1d0] sm:$0xff] %v3704_v43  ;;  %v4779_v24 = vld [vmem:[%s5768_s1 + $0x170] sm:$0xff]   ;;  %v4787_v30 = vld [vmem:[%s5768_s1 + $0x38] sm:$0xff]  }
  0x44   : > { %339 = vst [vmem:[#allocation2 + $0x1e8] sm:$0xff] %v3707_v44  ;;  %340 = vst [vmem:[#allocation2 + $0x1f0] sm:$0xff] %v3708_v45  ;;  %4046 = vmatpush3.bf16.msra.mxu1 %v4759_v55  ;;  %v1808_v25 = vld [vmem:[#allocation2 + $0x29] sm:$0xff]  ;;  %v1809_v26 = vld [vmem:[#allocation2 + $0x31] sm:$0xff] }
  0x45   : > { %341 = vst [vmem:[#allocation2 + $0x208] sm:$0xff] %v3711_v46  ;;  %342 = vst [vmem:[#allocation2 + $0x210] sm:$0xff] %v3712_v47  ;;  %4238 = vmatpush3.bf16.msra.mxu0 %v4760_v56  ;;  %4047 = vmatprep.subr.bf16.mxu1 %v4761_v57  ;;  %v5221_v27 = vpack.c.bf16 %v1809_v26, %v1808_v25  ;;  %v1810_v31 = vld [vmem:[#allocation2 + $0x49] sm:$0xff]  ;;  %v1811_v32 = vld [vmem:[#allocation2 + $0x51] sm:$0xff] }
  0x46   : > { %4239 = vmatprep.subr.bf16.mxu0 %v4762_v58  ;;  %v4782_v33 = vld [vmem:[%s5768_s1 + $0x180] sm:$0xff]   ;;  %v1813_v35 = vld [vmem:[#allocation2 + $0x71] sm:$0xff]  ;;  %v4784_v38 = vld [vmem:[%s5768_s1 + $0x188] sm:$0xff]  }
  0x47   : > { %v5239_v36 = vld [vmem:[%s5768_s1 + $0x80] sm:$0xff]   ;;  %v1814_v39 = vld [vmem:[#allocation2 + $0x89] sm:$0xff]  ;;  %v1815_v40 = vld [vmem:[#allocation2 + $0x91] sm:$0xff] }
  0x48   : > { %4048 = vmatpush3.bf16.msra.mxu1 %v4761_v57  ;;  %v1816_v41 = vld [vmem:[#allocation2 + $0xa9] sm:$0xff]  ;;  %v1817_v42 = vld [vmem:[#allocation2 + $0xb1] sm:$0xff]  ;;  %v5256_v44 = vpack.c.bf16 %v1815_v40, %v1814_v39  ;;  %v4790_v49 = vld [vmem:[%s5768_s1 + $0x1a0] sm:$0xff]  }
  0x49   : > { %4240 = vmatpush3.bf16.msra.mxu0 %v4762_v58  ;;  %4049 = vmatprep.subr.bf16.mxu1 %v4763_v59  ;;  %v4786_v43 = vld [vmem:[%s5768_s1 + $0x190] sm:$0xff]   ;;  %v343_v53 = vld [vmem:[#allocation2 + $0x7] sm:$0xff]  ;;  %v4796_v61 = vld [vmem:[%s5768_s1 + $0x1b8] sm:$0xff]  }
  0x4a   : > { %4241 = vmatprep.subr.bf16.mxu0 %v4764_v62  ;;  %v1818_v45 = vld [vmem:[#allocation2 + $0xc9] sm:$0xff]  ;;  %v1819_v46 = vld [vmem:[#allocation2 + $0xd1] sm:$0xff] }
  0x4b   : > { %v1820_v47 = vld [vmem:[#allocation2 + $0xe9] sm:$0xff]  ;;  %v1821_v48 = vld [vmem:[#allocation2 + $0xf1] sm:$0xff]  ;;  %v5270_v50 = vpack.c.bf16 %v1819_v46, %v1818_v45 }
  0x4c   : > { %4050 = vmatpush3.bf16.msra.mxu1 %v4763_v59  ;;  %v5272_v51 = vpack.c.bf16 %v1821_v48, %v1820_v47  ;;  %v1823_v52 = vld [vmem:[#allocation2 + $0x111] sm:$0xff]  ;;  %v1824_v55 = vld [vmem:[#allocation2 + $0x129] sm:$0xff] }
  0x4d   : > { %4242 = vmatpush3.bf16.msra.mxu0 %v4764_v62  ;;  %4051 = vmatprep.subr.bf16.mxu1 %v4765_v3  ;;  %v344_v54 = vld [vmem:[#allocation2 + $0xf] sm:$0xff]  ;;  %v345_v60 = vld [vmem:[#allocation2 + $0x27] sm:$0xff] }
  0x4e   : > { %4243 = vmatprep.subr.bf16.mxu0 %v4766_v4  ;;  %v1825_v56 = vld [vmem:[#allocation2 + $0x131] sm:$0xff]  ;;  %v1826_v62 = vld [vmem:[#allocation2 + $0x149] sm:$0xff] }
  0x4f   : > { %v4794_v57 = vld [vmem:[%s5768_s1 + $0x1b0] sm:$0xff]   ;;  %v5286_v59 = vpack.c.bf16 %v1825_v56, %v1824_v55  ;;  %v4799_v46 = vld [vmem:[%s5768_s1 + $0xa8] sm:$0xff]  }
  0x50   : > { %4052 = vmatpush3.bf16.msra.mxu1 %v4765_v3  ;;  %v1827_v63 = vld [vmem:[#allocation2 + $0x151] sm:$0xff]  ;;  %v347_v3 = vld [vmem:[#allocation2 + $0x47] sm:$0xff] }
  0x51   : > { %4244 = vmatpush3.bf16.msra.mxu0 %v4766_v4  ;;  %4053 = vmatprep.subr.bf16.mxu1 %v4767_v5  ;;  %v348_v4 = vld [vmem:[#allocation2 + $0x4f] sm:$0xff]  ;;  %v357_v47 = vld [vmem:[#allocation2 + $0xe7] sm:$0xff] }
  0x52   : > { %4245 = vmatprep.subr.bf16.mxu0 %v4768_v6  ;;  %v1833_v25 = vld [vmem:[#allocation2 + $0x1b1] sm:$0xff]  ;;  %v1836_v39 = vld [vmem:[#allocation2 + $0x1e9] sm:$0xff] }
  0x53   : > { %v1837_v40 = vld [vmem:[#allocation2 + $0x1f1] sm:$0xff] }
  0x54   : > { %4054 = vmatpush3.bf16.msra.mxu1 %v4767_v5  ;;  %v1828_v5 = vld [vmem:[#allocation2 + $0x169] sm:$0xff]  ;;  %v5343_v45 = vpack.c.bf16 %v1837_v40, %v1836_v39 }
  0x55   : > { %4246 = vmatpush3.bf16.msra.mxu0 %v4768_v6  ;;  %4087 = vmatprep.subr.bf16.mxu1 %v4769_v10  ;;  %v1829_v6 = vld [vmem:[#allocation2 + $0x171] sm:$0xff] }
  0x56   : > { %4279 = vmatprep.subr.bf16.mxu0 %v4770_v11  ;;  %v358_v48 = vld [vmem:[#allocation2 + $0xef] sm:$0xff] }
  0x57   : > { %4056 = vmatmul.mubr.bf16.vlgmr.msra.gmra.mrb[0].mxu1 %v4900_v0  ;;  %v4773_v0 = vld [vmem:[%s5768_s1 + $0x150] sm:$0xff]  }
  0x58   : > { %4248 = vmatmul.mubr.bf16.vlgmr.msra.gmra.mrb[0].mxu0 %v4903_v1  ;;  %4088 = vmatpush3.bf16.msra.mxu1 %v4769_v10  ;;  %v5297_v10 = vld [vmem:[%s5768_s1 + $0x1c0] sm:$0xff]   ;;  %v4810_v39 = vld [vmem:[%s5768_s1 + $0x1f0] sm:$0xff]  }
  0x59   : > { %4280 = vmatpush3.bf16.msra.mxu0 %v4770_v11  ;;  %4059 = vmatprep.mubr.bf16.mxu1 %v4903_v1  ;;  %v4774_v1 = vld [vmem:[%s5768_s1 + $0x158] sm:$0xff]  }
  0x5a   : > { %4281 = vmatprep.subr.bf16.mxu0 %v4771_v12  ;;  %4251 = vmatprep.mubr.bf16.mxu0 %v4906_v2 }
  0x5b   : > { %4089 = vmatprep.subr.bf16.mxu1 %v4772_v13 }
  0x5c   : > { %4090 = vmatpush3.bf16.msra.mxu1 %v4772_v13  ;;  %v5305_v13 = vpack.c.bf16 %v1829_v6, %v1828_v5  ;;  %v365_v5 = vld [vmem:[#allocation2 + $0x167] sm:$0xff]  ;;  %v366_v6 = vld [vmem:[#allocation2 + $0x16f] sm:$0xff] }
  0x5d   : > { %4282 = vmatpush3.bf16.msra.mxu0 %v4771_v12  ;;  %4091 = vmatprep.subr.bf16.mxu1 %v4775_v17  ;;  %v5303_v12 = vpack.c.bf16 %v348_v4, %v347_v3  ;;  %v4800_v4 = vld [vmem:[%s5768_s1 + $0x1c8] sm:$0xff]  }
  0x5e   : > { %4283 = vmatprep.subr.bf16.mxu0 %v4773_v0 }
  0x5f   : > { %4060 = vmatmul.mubr.bf16.gmra.mrb[4].mxu1 %v4906_v2  ;;  %v4781_v2 = vld [vmem:[%s5768_s1 + $0x20] sm:$0xff]  }
  0x60   : > { %4252 = vmatmul.mubr.bf16.gmra.mrb[4].mxu0 %v4913_v7  ;;  %4063 = vmatprep.mubr.bf16.mxu1 %v4913_v7  ;;  %v4777_v7 = vld [vmem:[%s5768_s1 + $0x168] sm:$0xff]  }
  0x61   : > { %4284 = vmatpush3.bf16.msra.mxu0 %v4773_v0  ;;  %4255 = vmatprep.mubr.bf16.mxu0 %v4916_v8  ;;  %v350_v0 = vld [vmem:[#allocation2 + $0x6f] sm:$0xff] }
  0x62   : > { %4285 = vmatprep.subr.bf16.mxu0 %v4774_v1  ;;  %4092 = vmatpush3.bf16.msra.mxu1 %v4775_v17  ;;  %v349_v17 = vld [vmem:[#allocation2 + $0x67] sm:$0xff] }
  0x63   : > { %4093 = vmatprep.subr.bf16.mxu1 %v4778_v18  ;;  %v5319_v26 = vpack.c.bf16 %v350_v0, %v349_v17  ;;  %v367_v17 = vld [vmem:[#allocation2 + $0x187] sm:$0xff]  ;;  %v368_v0 = vld [vmem:[#allocation2 + $0x18f] sm:$0xff] }
  0x65   : > { %4286 = vmatpush3.bf16.msra.mxu0 %v4774_v1  ;;  %v4791_v1 = vld [vmem:[%s5768_s1 + $0x88] sm:$0xff]  }
  0x66   : > { %4287 = vmatprep.subr.bf16.mxu0 %v4776_v19  ;;  %4094 = vmatpush3.bf16.msra.mxu1 %v4778_v18  ;;  %v1830_v18 = vld [vmem:[#allocation2 + $0x189] sm:$0xff] }
  0x67   : > { %4064 = vmatmul.mubr.bf16.gmra.mrb[8].mxu1 %v4916_v8  ;;  %4095 = vmatprep.subr.bf16.mxu1 %v4781_v2  ;;  %v4785_v8 = vld [vmem:[%s5768_s1 + $0x30] sm:$0xff]  }
  0x68   : > { %4256 = vmatmul.mubr.bf16.gmra.mrb[8].mxu0 %v4919_v9  ;;  %4067 = vmatprep.mubr.bf16.mxu1 %v4919_v9  ;;  %v4780_v9 = vld [vmem:[%s5768_s1 + $0x178] sm:$0xff]  }
  0x69   : > { %4288 = vmatpush3.bf16.msra.mxu0 %v4776_v19  ;;  %4259 = vmatprep.mubr.bf16.mxu0 %v4926_v14  ;;  %v1831_v19 = vld [vmem:[#allocation2 + $0x191] sm:$0xff] }
  0x6a   : > { %4289 = vmatprep.subr.bf16.mxu0 %v4777_v7  ;;  %4096 = vmatpush3.bf16.msra.mxu1 %v4781_v2  ;;  %v351_v2 = vld [vmem:[#allocation2 + $0x87] sm:$0xff] }
  0x6b   : > { %4097 = vmatprep.subr.bf16.mxu1 %v4783_v20 }
  0x6d   : > { %4290 = vmatpush3.bf16.msra.mxu0 %v4777_v7  ;;  %v352_v7 = vld [vmem:[#allocation2 + $0x8f] sm:$0xff] }
  0x6e   : > { %4291 = vmatprep.subr.bf16.mxu0 %v4779_v24  ;;  %4098 = vmatpush3.bf16.msra.mxu1 %v4783_v20  ;;  %v4793_v20 = vld [vmem:[%s5768_s1 + $0x90] sm:$0xff]  }
  0x6f   : > { %4068 = vmatmul.mubr.bf16.gmra.mrb[12].mxu1 %v4926_v14  ;;  %4099 = vmatprep.subr.bf16.mxu1 %v4785_v8  ;;  %v1812_v14 = vld [vmem:[#allocation2 + $0x69] sm:$0xff] }
  0x70   : > { %4260 = vmatmul.mubr.bf16.gmra.mrb[12].mxu0 %v4929_v15  ;;  %4071 = vmatprep.mubr.bf16.mxu1 %v4929_v15  ;;  %v5241_v15 = vpack.c.bf16 %v1811_v32, %v1810_v31  ;;  %v5243_v37 = vpack.c.bf16 %v1813_v35, %v1812_v14  ;;  %v4795_v31 = vld [vmem:[%s5768_s1 + $0x98] sm:$0xff]   ;;  %v353_v32 = vld [vmem:[#allocation2 + $0xa7] sm:$0xff] }
  0x71   : > { %4292 = vmatpush3.bf16.msra.mxu0 %v4779_v24  ;;  %4295 = vmatprep.mubr.bf16.mxu0 %v5221_v27  ;;  %v1832_v24 = vld [vmem:[#allocation2 + $0x1a9] sm:$0xff]  ;;  %v1835_v35 = vld [vmem:[#allocation2 + $0x1d1] sm:$0xff] }
  0x72   : > { %4293 = vmatprep.subr.bf16.mxu0 %v4780_v9  ;;  %4100 = vmatpush3.bf16.msra.mxu1 %v4785_v8  ;;  %v5321_v8 = vpack.c.bf16 %v1831_v19, %v1830_v18  ;;  %v1834_v14 = vld [vmem:[#allocation2 + $0x1c9] sm:$0xff]  ;;  %v5386_v18 = vpack.c.bf16 %v366_v6, %v365_v5  ;;  %v5388_v19 = vpack.c.bf16 %v368_v0, %v367_v17 }
  0x73   : > { %4101 = vmatprep.subr.bf16.mxu1 %v4787_v30  ;;  %v4816_v17 = vld [vmem:[%s5768_s1 + $0x208] sm:$0xff]   ;;  %v2428_v0 = vld [vmem:[#allocation2 + $0xb0] sm:$0xff] }
  0x75   : > { %4294 = vmatpush3.bf16.msra.mxu0 %v4780_v9  ;;  %v5323_v9 = vpack.c.bf16 %v352_v7, %v351_v2  ;;  %v4804_v2 = vld [vmem:[%s5768_s1 + $0x1d8] sm:$0xff]   ;;  %v370_v7 = vld [vmem:[#allocation2 + $0x1af] sm:$0xff] }
  0x76   : > { %4327 = vmatprep.subr.bf16.mxu0 %v4782_v33  ;;  %4102 = vmatpush3.bf16.msra.mxu1 %v4787_v30  ;;  %v5325_v30 = vpack.c.bf16 %v1833_v25, %v1832_v24  ;;  %v372_v24 = vld [vmem:[#allocation2 + $0x1cf] sm:$0xff]  ;;  %v4806_v25 = vld [vmem:[%s5768_s1 + $0x1e0] sm:$0xff]  }
  0x77   : > { %4072 = vmatmul.mubr.bf16.gmra.mrb[16].mxu1 %v4932_v16  ;;  %4135 = vmatprep.subr.bf16.mxu1 %v5239_v36  ;;  %v5258_v16 = vpack.c.bf16 %v1817_v42, %v1816_v41  ;;  %v4797_v41 = vld [vmem:[%s5768_s1 + $0xa0] sm:$0xff]  }
  0x78   : > { %4296 = vmatmul.mubr.bf16.vlgmr.msra.gmra.mrb[0].mxu0 %v5241_v15  ;;  %4075 = vmatprep.mubr.bf16.mxu1 %v4939_v21  ;;  %v4788_v21 = vld [vmem:[%s5768_s1 + $0x198] sm:$0xff]  }
  0x79   : > { %4328 = vmatpush3.bf16.msra.mxu0 %v4782_v33  ;;  %4299 = vmatprep.mubr.bf16.mxu0 %v5243_v37  ;;  %v354_v33 = vld [vmem:[#allocation2 + $0xaf] sm:$0xff] }
  0x7a   : > { %4329 = vmatprep.subr.bf16.mxu0 %v4784_v38  ;;  %v5337_v42 = vpack.c.bf16 %v354_v33, %v353_v32  ;;  %v4808_v33 = vld [vmem:[%s5768_s1 + $0x1e8] sm:$0xff]  }
  0x7d   : > { %4330 = vmatpush3.bf16.msra.mxu0 %v4784_v38  ;;  %v356_v38 = vld [vmem:[#allocation2 + $0xcf] sm:$0xff] }
  0x7e   : > { %4331 = vmatprep.subr.bf16.mxu0 %v4786_v43 }
  0x7f   : > { %4076 = vmatmul.mubr.bf16.gmra.mrb[20].mxu1 %v4942_v22  ;;  %v4792_v22 = vld [vmem:[%s5768_s1 + $0x1a8] sm:$0xff]  }
  0x80   : > { %4300 = vmatmul.mubr.bf16.gmra.mrb[4].mxu0 %v5256_v44  ;;  %4079 = vmatprep.mubr.bf16.mxu1 %v4945_v23  ;;  %v1822_v23 = vld [vmem:[#allocation2 + $0x109] sm:$0xff] }
  0x81   : > { %4303 = vmatprep.mubr.bf16.mxu0 %v5258_v16  ;;  %4332 = vmatpush3.bf16.msra.mxu0 %v4786_v43  ;;  %v5284_v58 = vpack.c.bf16 %v1823_v52, %v1822_v23  ;;  %v5339_v43 = vpack.c.bf16 %v1835_v35, %v1834_v14  ;;  %v359_v23 = vld [vmem:[#allocation2 + $0x107] sm:$0xff]  ;;  %v360_v52 = vld [vmem:[#allocation2 + $0x10f] sm:$0xff] }
  0x82   : > { %4333 = vmatprep.subr.bf16.mxu0 %v4788_v21  ;;  %v5357_v56 = vpack.c.bf16 %v360_v52, %v359_v23  ;;  %v373_v14 = vld [vmem:[#allocation2 + $0x1e7] sm:$0xff]  ;;  %v374_v35 = vld [vmem:[#allocation2 + $0x1ef] sm:$0xff] }
  0x83   : > { %v5414_v40 = vpack.c.bf16 %v374_v35, %v373_v14  ;;  %v4813_v23 = vld [vmem:[%s5768_s1 + $0xe0] sm:$0xff]  }
  0x84   : > { %v4821_v14 = vld [vmem:[%s5768_s1 + $0x220] sm:$0xff]  }
  0x85   : > { %4334 = vmatpush3.bf16.msra.mxu0 %v4788_v21 }
  0x86   : > { %4335 = vmatprep.subr.bf16.mxu0 %v4790_v49 }
  0x87   : > { %4080 = vmatmul.mubr.bf16.gmra.mrb[24].mxu1 %v4952_v28  ;;  %v375_v28 = vpack.c.bf16 %v344_v54, %v343_v53  ;;  %v4801_v53 = vld [vmem:[%s5768_s1 + $0xb0] sm:$0xff]   ;;  %v5355_v54 = vpack.c.bf16 %v358_v48, %v357_v47  ;;  %v4814_v47 = vld [vmem:[%s5768_s1 + $0x200] sm:$0xff]   ;;  %v4807_v48 = vld [vmem:[%s5768_s1 + $0xc8] sm:$0xff]  }
  0x88   : > { %4304 = vmatmul.mubr.bf16.gmra.mrb[8].mxu0 %v5270_v50  ;;  %4083 = vmatprep.mubr.bf16.mxu1 %v4955_v29  ;;  %v346_v29 = vld [vmem:[#allocation2 + $0x2f] sm:$0xff] }
  0x89   : > { %4307 = vmatprep.mubr.bf16.mxu0 %v5272_v51  ;;  %4336 = vmatpush3.bf16.msra.mxu0 %v4790_v49  ;;  %v5299_v11 = vpack.c.bf16 %v346_v29, %v345_v60  ;;  %v1838_v49 = vld [vmem:[#allocation2 + $0x209] sm:$0xff] }
  0x8a   : > { %4337 = vmatprep.subr.bf16.mxu0 %v4792_v22  ;;  %v362_v60 = vld [vmem:[#allocation2 + $0x12f] sm:$0xff]  ;;  %v363_v29 = vld [vmem:[#allocation2 + $0x147] sm:$0xff] }
  0x8d   : > { %4338 = vmatpush3.bf16.msra.mxu0 %v4792_v22  ;;  %v1839_v22 = vld [vmem:[#allocation2 + $0x211] sm:$0xff] }
  0x8e   : > { %4339 = vmatprep.subr.bf16.mxu0 %v4794_v57  ;;  %v1855_v55 = vpack.c.bf16 %v1839_v22, %v1838_v49  ;;  %v4809_v49 = vld [vmem:[%s5768_s1 + $0xd0] sm:$0xff]   ;;  %v4811_v22 = vld [vmem:[%s5768_s1 + $0xd8] sm:$0xff]  }
  0x8f   : > { %4084 = vmatmul.mubr.bf16.gmra.mrb[28].mxu1 %v4962_v34  ;;  %v5301_v34 = vpack.c.bf16 %v1827_v63, %v1826_v62  ;;  %v5368_v62 = vld [vmem:[%s5768_s1 + $0xc0] sm:$0xff]  }
  0x90   : > { %4308 = vmatmul.mubr.bf16.gmra.mrb[12].mxu0 %v5284_v58  ;;  %4103 = vmatprep.mubr.bf16.mxu1 %v375_v28  ;;  %v361_v28 = vld [vmem:[#allocation2 + $0x127] sm:$0xff] }
  0x91   : > { %4311 = vmatprep.mubr.bf16.mxu0 %v5286_v59  ;;  %4340 = vmatpush3.bf16.msra.mxu0 %v4794_v57  ;;  %v4803_v57 = vld [vmem:[%s5768_s1 + $0xb8] sm:$0xff]   ;;  %v5370_v63 = vpack.c.bf16 %v362_v60, %v361_v28  ;;  %v4817_v28 = vld [vmem:[%s5768_s1 + $0xf0] sm:$0xff]  }
  0x92   : > { %4341 = vmatprep.subr.bf16.mxu0 %v4796_v61 }
  0x95   : > { %4342 = vmatpush3.bf16.msra.mxu0 %v4796_v61  ;;  %v364_v61 = vld [vmem:[#allocation2 + $0x14f] sm:$0xff] }
  0x96   : > { %4375 = vmatprep.subr.bf16.mxu0 %v5297_v10  ;;  %v5372_v3 = vpack.c.bf16 %v364_v61, %v363_v29  ;;  %v2424_v61 = vld [vmem:[#allocation2 + $0x70] sm:$0xff] }
  0x97   : > { %4104 = vmatmul.mubr.bf16.vlgmr.msra.gmra.mrb[0].mxu1 %v5299_v11 }
  0x98   : > { %4312 = vmatmul.mubr.bf16.gmra.mrb[16].mxu0 %v5301_v34  ;;  %4136 = vmatpush3.bf16.msra.mxu1 %v5239_v36  ;;  %v355_v36 = vld [vmem:[#allocation2 + $0xc7] sm:$0xff] }
  0x99   : > { %4107 = vmatprep.mubr.bf16.mxu1 %v5303_v12  ;;  %4315 = vmatprep.mubr.bf16.mxu0 %v5305_v13  ;;  %v5341_v21 = vpack.c.bf16 %v356_v38, %v355_v36  ;;  %v890_v36 = vld [vmem:[#allocation2 + $0x9] sm:$0xff]  ;;  %v891_v38 = vld [vmem:[#allocation2 + $0x11] sm:$0xff] }
  0x9a   : > { %4137 = vmatprep.subr.bf16.mxu1 %v4791_v1 }
  0x9c   : > { %4138 = vmatpush3.bf16.msra.mxu1 %v4791_v1  ;;  %v4802_v1 = vld [vmem:[%s5768_s1 + $0x1d0] sm:$0xff]  }
  0x9d   : > { %4139 = vmatprep.subr.bf16.mxu1 %v4793_v20 }
  0x9f   : > { %4108 = vmatmul.mubr.bf16.gmra.mrb[4].mxu1 %v5319_v26 }
  0xa0   : > { %4316 = vmatmul.mubr.bf16.gmra.mrb[20].mxu0 %v5321_v8  ;;  %4111 = vmatprep.mubr.bf16.mxu1 %v5323_v9 }
  0xa1   : > { %4319 = vmatprep.mubr.bf16.mxu0 %v5325_v30  ;;  %4140 = vmatpush3.bf16.msra.mxu1 %v4793_v20  ;;  %v371_v20 = vld [vmem:[#allocation2 + $0x1c7] sm:$0xff] }
  0xa2   : > { %4141 = vmatprep.subr.bf16.mxu1 %v4795_v31  ;;  %v5402_v32 = vpack.c.bf16 %v372_v24, %v371_v20  ;;  %v2432_v24 = vld [vmem:[#allocation2 + $0xf0] sm:$0xff] }
  0xa5   : > { %4142 = vmatpush3.bf16.msra.mxu1 %v4795_v31 }
  0xa6   : > { %4143 = vmatprep.subr.bf16.mxu1 %v4797_v41 }
  0xa7   : > { %4112 = vmatmul.mubr.bf16.gmra.mrb[8].mxu1 %v5337_v42 }
  0xa8   : > { %4320 = vmatmul.mubr.bf16.gmra.mrb[24].mxu0 %v5339_v43  ;;  %4115 = vmatprep.mubr.bf16.mxu1 %v5341_v21 }
  0xa9   : > { %4323 = vmatprep.mubr.bf16.mxu0 %v5343_v45  ;;  %4144 = vmatpush3.bf16.msra.mxu1 %v4797_v41  ;;  %v922_v41 = vpack.c.bf16 %v891_v38, %v890_v36  ;;  %v2436_v38 = vld [vmem:[#allocation2 + $0x130] sm:$0xff] }
  0xaa   : > { %4145 = vmatprep.subr.bf16.mxu1 %v4799_v46 }
  0xad   : > { %4146 = vmatpush3.bf16.msra.mxu1 %v4799_v46  ;;  %v4812_v46 = vld [vmem:[%s5768_s1 + $0x1f8] sm:$0xff]  }
  0xae   : > { %4147 = vmatprep.subr.bf16.mxu1 %v4801_v53 }
  0xaf   : > { %4116 = vmatmul.mubr.bf16.gmra.mrb[12].mxu1 %v5355_v54 }
  0xb0   : > { %4324 = vmatmul.mubr.bf16.gmra.mrb[28].mxu0 %v1855_v55  ;;  %4119 = vmatprep.mubr.bf16.mxu1 %v5357_v56  ;;  %v2421_v55 = vld [vmem:[#allocation2 + $0x48] sm:$0xff] }
  0xb1   : > { %4343 = vmatprep.mubr.bf16.mxu0 %v5303_v12  ;;  %4148 = vmatpush3.bf16.msra.mxu1 %v4801_v53  ;;  %v2146_v53 = vld [vmem:[#allocation2 + $0x22f] sm:$0xff] }
  0xb2   : > { %4149 = vmatprep.subr.bf16.mxu1 %v4803_v57 }
  0xb5   : > { %4150 = vmatpush3.bf16.msra.mxu1 %v4803_v57  ;;  %v2422_v57 = vld [vmem:[#allocation2 + $0x50] sm:$0xff] }
  0xb6   : > { %4183 = vmatprep.subr.bf16.mxu1 %v5368_v62  ;;  %v2453_v29 = vpack.c.bf16 %v2422_v57, %v2421_v55  ;;  %v4836_v55 = vld [vmem:[#allocation2 + $0x1d0] sm:$0xff] }
  0xb7   : > { %4120 = vmatmul.mubr.bf16.gmra.mrb[16].mxu1 %v5370_v63 }
  0xb8   : > { %4344 = vmatmul.mubr.bf16.vlgmr.msra.gmra.mrb[0].mxu0 %v5319_v26  ;;  %4123 = vmatprep.mubr.bf16.mxu1 %v5372_v3 }
  0xb9   : > { %4376 = vmatpush3.bf16.msra.mxu0 %v5297_v10  ;;  %4347 = vmatprep.mubr.bf16.mxu0 %v5323_v9  ;;  %v369_v10 = vld [vmem:[#allocation2 + $0x1a7] sm:$0xff] }
  0xba   : > { %4377 = vmatprep.subr.bf16.mxu0 %v4800_v4  ;;  %v5400_v31 = vpack.c.bf16 %v370_v7, %v369_v10  ;;  %v4818_v10 = vld [vmem:[%s5768_s1 + $0x210] sm:$0xff]  }
  0xbd   : > { %4378 = vmatpush3.bf16.msra.mxu0 %v4800_v4  ;;  %v2426_v4 = vld [vmem:[#allocation2 + $0x90] sm:$0xff] }
  0xbe   : > { %4379 = vmatprep.subr.bf16.mxu0 %v4802_v1 }
  0xbf   : > { %4124 = vmatmul.mubr.bf16.gmra.mrb[20].mxu1 %v5386_v18 }
  0xc0   : > { %4348 = vmatmul.mubr.bf16.gmra.mrb[4].mxu0 %v5337_v42  ;;  %4127 = vmatprep.mubr.bf16.mxu1 %v5388_v19 }
  0xc1   : > { %4351 = vmatprep.mubr.bf16.mxu0 %v5341_v21  ;;  %4380 = vmatpush3.bf16.msra.mxu0 %v4802_v1  ;;  %v2429_v1 = vld [vmem:[#allocation2 + $0xc8] sm:$0xff] }
  0xc2   : > { %4381 = vmatprep.subr.bf16.mxu0 %v4804_v2 }
  0xc5   : > { %4382 = vmatpush3.bf16.msra.mxu0 %v4804_v2  ;;  %v2430_v2 = vld [vmem:[#allocation2 + $0xd0] sm:$0xff] }
  0xc6   : > { %4383 = vmatprep.subr.bf16.mxu0 %v4806_v25  ;;  %v2457_v20 = vpack.c.bf16 %v2430_v2, %v2429_v1  ;;  %v2732_v1 = vld [vmem:[#allocation2 + $0x91] sm:$0xff] }
  0xc7   : > { %4128 = vmatmul.mubr.bf16.gmra.mrb[24].mxu1 %v5400_v31  ;;  %v4846_v2 = vld [vmem:[%s5768_s1 + $0x138] sm:$0xff]  }
  0xc8   : > { %4352 = vmatmul.mubr.bf16.gmra.mrb[8].mxu0 %v5355_v54  ;;  %4131 = vmatprep.mubr.bf16.mxu1 %v5402_v32 }
  0xc9   : > { %4355 = vmatprep.mubr.bf16.mxu0 %v5357_v56  ;;  %4384 = vmatpush3.bf16.msra.mxu0 %v4806_v25  ;;  %v2433_v25 = vld [vmem:[#allocation2 + $0x108] sm:$0xff] }
  0xca   : > { %4385 = vmatprep.subr.bf16.mxu0 %v4808_v33 }
  0xcd   : > { %4386 = vmatpush3.bf16.msra.mxu0 %v4808_v33  ;;  %v2434_v33 = vld [vmem:[#allocation2 + $0x110] sm:$0xff] }
  0xce   : > { %4387 = vmatprep.subr.bf16.mxu0 %v4810_v39  ;;  %v2459_v36 = vpack.c.bf16 %v2434_v33, %v2433_v25  ;;  %v2737_v25 = vld [vmem:[#allocation2 + $0xe9] sm:$0xff]  ;;  %v2738_v33 = vld [vmem:[#allocation2 + $0xf1] sm:$0xff] }
  0xcf   : > { %4132 = vmatmul.mubr.bf16.gmra.mrb[28].mxu1 %v5414_v40 }
  0xd0   : > { %4356 = vmatmul.mubr.bf16.gmra.mrb[12].mxu0 %v5370_v63  ;;  %4151 = vmatprep.mubr.bf16.mxu1 %v922_v41 }
  0xd1   : > { %4359 = vmatprep.mubr.bf16.mxu0 %v5372_v3  ;;  %4388 = vmatpush3.bf16.msra.mxu0 %v4810_v39  ;;  %v4823_v39 = vld [vmem:[%s5768_s1 + $0x230] sm:$0xff]  }
  0xd2   : > { %4389 = vmatprep.subr.bf16.mxu0 %v4812_v46 }
  0xd5   : > { %4390 = vmatpush3.bf16.msra.mxu0 %v4812_v46  ;;  %v4826_v46 = vld [vmem:[#allocation2 + $0x148] sm:$0xff] }
  0xd6   : > { %4423 = vmatprep.subr.bf16.mxu0 %v4814_v47 }
  0xd7   : > { %4152 = vmatmul.mubr.bf16.vlgmr.msra.gmra.mrb[0].mxu1 %v5221_v27  ;;  %v2143_v27 = vld [vmem:[#allocation2 + $0x207] sm:$0xff] }
  0xd8   : > { %4360 = vmatmul.mubr.bf16.gmra.mrb[16].mxu0 %v5386_v18  ;;  %4184 = vmatpush3.bf16.msra.mxu1 %v5368_v62  ;;  %v2425_v62 = vld [vmem:[#allocation2 + $0x88] sm:$0xff] }
  0xd9   : > { %4155 = vmatprep.mubr.bf16.mxu1 %v5241_v15  ;;  %4363 = vmatprep.mubr.bf16.mxu0 %v5388_v19  ;;  %v2144_v15 = vld [vmem:[#allocation2 + $0x20f] sm:$0xff]  ;;  %v2455_v6 = vpack.c.bf16 %v2426_v4, %v2425_v62 }
  0xda   : > { %4185 = vmatprep.subr.bf16.mxu1 %v4807_v48  ;;  %v5446_v52 = vpack.c.bf16 %v2144_v15, %v2143_v27  ;;  %v4830_v27 = vld [vmem:[#allocation2 + $0x188] sm:$0xff]  ;;  %v4831_v15 = vld [vmem:[#allocation2 + $0x190] sm:$0xff] }
  0xdb   : > { %v2452_v62 = vld [vmem:[#allocation2 + $0x230] sm:$0xff] }
  0xdc   : > { %4186 = vmatpush3.bf16.msra.mxu1 %v4807_v48  ;;  %v2727_v4 = vld [vmem:[#allocation2 + $0x49] sm:$0xff] }
  0xdd   : > { %4187 = vmatprep.subr.bf16.mxu1 %v4809_v49 }
  0xdf   : > { %4156 = vmatmul.mubr.bf16.gmra.mrb[4].mxu1 %v5243_v37  ;;  %v4815_v37 = vld [vmem:[%s5768_s1 + $0xe8] sm:$0xff]  }
  0xe0   : > { %4364 = vmatmul.mubr.bf16.gmra.mrb[20].mxu0 %v5400_v31  ;;  %4159 = vmatprep.mubr.bf16.mxu1 %v5256_v44  ;;  %v2145_v44 = vld [vmem:[#allocation2 + $0x227] sm:$0xff] }
  0xe1   : > { %4367 = vmatprep.mubr.bf16.mxu0 %v5402_v32  ;;  %4188 = vmatpush3.bf16.msra.mxu1 %v4809_v49  ;;  %v2162_v60 = vpack.c.bf16 %v2146_v53, %v2145_v44  ;;  %v4829_v49 = vld [vmem:[#allocation2 + $0x170] sm:$0xff]  ;;  %v4835_v53 = vld [vmem:[#allocation2 + $0x1c8] sm:$0xff] }
  0xe2   : > { %4189 = vmatprep.subr.bf16.mxu1 %v4811_v22  ;;  %v2465_v57 = vpack.c.bf16 %v4836_v55, %v4835_v53  ;;  %v2752_v53 = vld [vmem:[#allocation2 + $0x1d1] sm:$0xff] }
  0xe5   : > { %4190 = vmatpush3.bf16.msra.mxu1 %v4811_v22 }
  0xe6   : > { %4191 = vmatprep.subr.bf16.mxu1 %v4813_v23 }
  0xe7   : > { %4160 = vmatmul.mubr.bf16.gmra.mrb[8].mxu1 %v5258_v16  ;;  %v4819_v16 = vld [vmem:[%s5768_s1 + $0xf8] sm:$0xff]  }
  0xe8   : > { %4368 = vmatmul.mubr.bf16.gmra.mrb[24].mxu0 %v5414_v40  ;;  %4163 = vmatprep.mubr.bf16.mxu1 %v5270_v50  ;;  %v2423_v50 = vld [vmem:[#allocation2 + $0x68] sm:$0xff] }
  0xe9   : > { %4371 = vmatprep.mubr.bf16.mxu0 %v5446_v52  ;;  %4192 = vmatpush3.bf16.msra.mxu1 %v4813_v23  ;;  %v2454_v5 = vpack.c.bf16 %v2424_v61, %v2423_v50  ;;  %v2463_v23 = vpack.c.bf16 %v4831_v15, %v4830_v27  ;;  %v4842_v50 = vld [vmem:[#allocation2 + $0x210] sm:$0xff] }
  0xea   : > { %4193 = vmatprep.subr.bf16.mxu1 %v4815_v37 }
  0xed   : > { %4194 = vmatpush3.bf16.msra.mxu1 %v4815_v37  ;;  %v4834_v37 = vld [vmem:[#allocation2 + $0x1b0] sm:$0xff] }
  0xee   : > { %4195 = vmatprep.subr.bf16.mxu1 %v4817_v28 }
  0xef   : > { %4164 = vmatmul.mubr.bf16.gmra.mrb[12].mxu1 %v5272_v51  ;;  %v5469_v51 = vld [vmem:[%s5768_s1 + $0x100] sm:$0xff]  }
  0xf0   : > { %4372 = vmatmul.mubr.bf16.gmra.mrb[28].mxu0 %v2162_v60  ;;  %4167 = vmatprep.mubr.bf16.mxu1 %v5284_v58  ;;  %v2427_v58 = vld [vmem:[#allocation2 + $0xa8] sm:$0xff]  ;;  %v4840_v60 = vld [vmem:[#allocation2 + $0x1f0] sm:$0xff] }
  0xf1   : > { %4391 = vmatprep.mubr.bf16.mxu0 %v2453_v29  ;;  %4196 = vmatpush3.bf16.msra.mxu1 %v4817_v28  ;;  %v2456_v7 = vpack.c.bf16 %v2428_v0, %v2427_v58  ;;  %v4839_v28 = vld [vmem:[#allocation2 + $0x1e8] sm:$0xff]  ;;  %v2730_v58 = vld [vmem:[#allocation2 + $0x71] sm:$0xff] }
  0xf2   : > { %4197 = vmatprep.subr.bf16.mxu1 %v4819_v16  ;;  %v2466_v29 = vpack.c.bf16 %v4840_v60, %v4839_v28  ;;  %v2731_v0 = vld [vmem:[#allocation2 + $0x89] sm:$0xff] }
  0xf3   : > { %v1528_v28 = vld [vmem:[#allocation2 + $0x1c8] sm:$0xff]  ;;  %v1529_v60 = vld [vmem:[#allocation2 + $0x1d0] sm:$0xff] }
  0xf5   : > { %4198 = vmatpush3.bf16.msra.mxu1 %v4819_v16  ;;  %v4841_v16 = vld [vmem:[#allocation2 + $0x208] sm:$0xff] }
  0xf6   : > { %4471 = vmatprep.subr.bf16.mxu1 %v5469_v51  ;;  %v2467_v61 = vpack.c.bf16 %v4842_v50, %v4841_v16  ;;  %v2754_v16 = vld [vmem:[#allocation2 + $0x1f1] sm:$0xff]  ;;  %v1530_v50 = vld [vmem:[#allocation2 + $0x1e8] sm:$0xff] }
  0xf7   : > { %4168 = vmatmul.mubr.bf16.gmra.mrb[16].mxu1 %v5286_v59  ;;  %v4820_v59 = vld [vmem:[%s5768_s1 + $0x218] sm:$0xff]  }
  0xf8   : > { %4392 = vmatmul.mubr.bf16.vlgmr.msra.gmra.mrb[0].mxu0 %v2454_v5  ;;  %4171 = vmatprep.mubr.bf16.mxu1 %v5301_v34  ;;  %v2431_v34 = vld [vmem:[#allocation2 + $0xe8] sm:$0xff]  ;;  %v2728_v5 = vld [vmem:[#allocation2 + $0x51] sm:$0xff] }
  0xf9   : > { %4424 = vmatpush3.bf16.msra.mxu0 %v4814_v47  ;;  %4395 = vmatprep.mubr.bf16.mxu0 %v2455_v6  ;;  %v2458_v35 = vpack.c.bf16 %v2432_v24, %v2431_v34  ;;  %v4827_v47 = vld [vmem:[#allocation2 + $0x150] sm:$0xff]  ;;  %v4844_v6 = vld [vmem:[%s5768_s1 + $0x128] sm:$0xff]  }
  0xfa   : > { %4425 = vmatprep.subr.bf16.mxu0 %v4816_v17  ;;  %v2461_v48 = vpack.c.bf16 %v4827_v47, %v4826_v46  ;;  %v1521_v46 = vld [vmem:[#allocation2 + $0x150] sm:$0xff] }
  0xfb   : > { %v2745_v47 = vld [vmem:[#allocation2 + $0x169] sm:$0xff] }
  0xfd   : > { %4426 = vmatpush3.bf16.msra.mxu0 %v4816_v17 }
  0xfe   : > { %4427 = vmatprep.subr.bf16.mxu0 %v4818_v10 }
  0xff   : > { %4172 = vmatmul.mubr.bf16.gmra.mrb[20].mxu1 %v5305_v13  ;;  %v4822_v13 = vld [vmem:[%s5768_s1 + $0x228] sm:$0xff]  }
 0x100   : > { %4396 = vmatmul.mubr.bf16.gmra.mrb[4].mxu0 %v2456_v7  ;;  %4175 = vmatprep.mubr.bf16.mxu1 %v5321_v8  ;;  %v2435_v8 = vld [vmem:[#allocation2 + $0x128] sm:$0xff]  ;;  %v2761_v7 = vpack.c.bf16 %v2732_v1, %v2731_v0 }
 0x101   : > { %4399 = vmatprep.mubr.bf16.mxu0 %v2457_v20  ;;  %4428 = vmatpush3.bf16.msra.mxu0 %v4818_v10  ;;  %v5493_v41 = vpack.c.bf16 %v2436_v38, %v2435_v8  ;;  %v2735_v20 = vld [vmem:[#allocation2 + $0xc9] sm:$0xff] }
 0x102   : > { %4429 = vmatprep.subr.bf16.mxu0 %v4820_v59  ;;  %v2743_v8 = vld [vmem:[#allocation2 + $0x149] sm:$0xff] }
 0x105   : > { %4430 = vmatpush3.bf16.msra.mxu0 %v4820_v59  ;;  %v2736_v59 = vld [vmem:[#allocation2 + $0xd1] sm:$0xff] }
 0x106   : > { %4431 = vmatprep.subr.bf16.mxu0 %v4821_v14  ;;  %v2763_v24 = vpack.c.bf16 %v2736_v59, %v2735_v20 }
 0x107   : > { %4176 = vmatmul.mubr.bf16.gmra.mrb[24].mxu1 %v5325_v30  ;;  %v4824_v30 = vld [vmem:[%s5768_s1 + $0x238] sm:$0xff]  }
 0x108   : > { %4400 = vmatmul.mubr.bf16.gmra.mrb[8].mxu0 %v2458_v35  ;;  %4179 = vmatprep.mubr.bf16.mxu1 %v5339_v43  ;;  %v4828_v43 = vld [vmem:[#allocation2 + $0x168] sm:$0xff]  ;;  %v2764_v35 = vpack.c.bf16 %v2738_v33, %v2737_v25 }
 0x109   : > { %4403 = vmatprep.mubr.bf16.mxu0 %v2459_v36  ;;  %4432 = vmatpush3.bf16.msra.mxu0 %v4821_v14  ;;  %v2462_v22 = vpack.c.bf16 %v4829_v49, %v4828_v43  ;;  %v2739_v14 = vld [vmem:[#allocation2 + $0x109] sm:$0xff]  ;;  %v2748_v43 = vld [vmem:[#allocation2 + $0x191] sm:$0xff] }
 0x10a   : > { %4433 = vmatprep.subr.bf16.mxu0 %v4822_v13 }
 0x10d   : > { %4434 = vmatpush3.bf16.msra.mxu0 %v4822_v13  ;;  %v2742_v13 = vld [vmem:[#allocation2 + $0x131] sm:$0xff] }
 0x10e   : > { %4435 = vmatprep.subr.bf16.mxu0 %v4823_v39 }
 0x10f   : > { %4180 = vmatmul.mubr.bf16.gmra.mrb[28].mxu1 %v5343_v45  ;;  %v4833_v45 = vld [vmem:[#allocation2 + $0x1a8] sm:$0xff] }
 0x110   : > { %4404 = vmatmul.mubr.bf16.gmra.mrb[12].mxu0 %v5493_v41  ;;  %4199 = vmatprep.mubr.bf16.mxu1 %v5299_v11  ;;  %v4832_v11 = vld [vmem:[%s5768_s1 + $0x108] sm:$0xff]   ;;  %v2464_v44 = vpack.c.bf16 %v4834_v37, %v4833_v45  ;;  %v1527_v37 = vld [vmem:[#allocation2 + $0x1b0] sm:$0xff] }
 0x111   : > { %4407 = vmatprep.mubr.bf16.mxu0 %v2461_v48  ;;  %4436 = vmatpush3.bf16.msra.mxu0 %v4823_v39  ;;  %v1522_v48 = vld [vmem:[#allocation2 + $0x168] sm:$0xff] }
 0x112   : > { %4437 = vmatprep.subr.bf16.mxu0 %v4824_v30  ;;  %v1526_v45 = vld [vmem:[#allocation2 + $0x1a8] sm:$0xff] }
 0x115   : > { %4438 = vmatpush3.bf16.msra.mxu0 %v4824_v30  ;;  %v1523_v30 = vld [vmem:[#allocation2 + $0x170] sm:$0xff] }
 0x116   : > { %v1544_v27 = vpack.c.bf16 %v1523_v30, %v1522_v48 }
 0x117   : > { %4200 = vmatmul.mubr.bf16.vlgmr.msra.gmra.mrb[0].mxu1 %v5303_v12  ;;  %v4837_v12 = vld [vmem:[%s5768_s1 + $0x110] sm:$0xff]  }
 0x118   : > { %4408 = vmatmul.mubr.bf16.gmra.mrb[16].mxu0 %v2462_v22  ;;  %4479 = vmatpush3.bf16.msra.mxu1 %v5469_v51  ;;  %v2759_v51 = vpack.c.bf16 %v2728_v5, %v2727_v4 }
 0x119   : > { %4203 = vmatprep.mubr.bf16.mxu1 %v5319_v26  ;;  %4411 = vmatprep.mubr.bf16.mxu0 %v2463_v23  ;;  %v4838_v26 = vld [vmem:[%s5768_s1 + $0x118] sm:$0xff]   ;;  %v1525_v23 = vld [vmem:[#allocation2 + $0x190] sm:$0xff] }
 0x11a   : > { %4472 = vmatprep.subr.bf16.mxu1 %v4832_v11 }
 0x11c   : > { %4480 = vmatpush3.bf16.msra.mxu1 %v4832_v11  ;;  %v2749_v11 = vld [vmem:[#allocation2 + $0x1a9] sm:$0xff] }
 0x11d   : > { %4473 = vmatprep.subr.bf16.mxu1 %v4837_v12 }
 0x11f   : > { %4204 = vmatmul.mubr.bf16.gmra.mrb[4].mxu1 %v5323_v9  ;;  %v4843_v9 = vld [vmem:[%s5768_s1 + $0x120] sm:$0xff]  }
 0x120   : > { %4412 = vmatmul.mubr.bf16.gmra.mrb[20].mxu0 %v2464_v44  ;;  %4207 = vmatprep.mubr.bf16.mxu1 %v5337_v42  ;;  %v2451_v42 = vld [vmem:[#allocation2 + $0x228] sm:$0xff] }
 0x121   : > { %4415 = vmatprep.mubr.bf16.mxu0 %v2465_v57  ;;  %4481 = vmatpush3.bf16.msra.mxu1 %v4837_v12  ;;  %v2468_v17 = vpack.c.bf16 %v2452_v62, %v2451_v42  ;;  %v2751_v44 = vld [vmem:[#allocation2 + $0x1c9] sm:$0xff]  ;;  %v1546_v12 = vpack.c.bf16 %v1527_v37, %v1526_v45  ;;  %v2756_v42 = vld [vmem:[#allocation2 + $0x211] sm:$0xff]  ;;  %v1547_v62 = vpack.c.bf16 %v1529_v60, %v1528_v28 }
 0x122   : > { %4474 = vmatprep.subr.bf16.mxu1 %v4838_v26 }
 0x125   : > { %4482 = vmatpush3.bf16.msra.mxu1 %v4838_v26  ;;  %v2771_v26 = vpack.c.bf16 %v2752_v53, %v2751_v44 }
 0x126   : > { %4475 = vmatprep.subr.bf16.mxu1 %v4843_v9 }
 0x127   : > { %4208 = vmatmul.mubr.bf16.gmra.mrb[8].mxu1 %v5341_v21  ;;  %v4845_v21 = vld [vmem:[%s5768_s1 + $0x130] sm:$0xff]  }
 0x128   : > { %4416 = vmatmul.mubr.bf16.gmra.mrb[24].mxu0 %v2466_v29  ;;  %4211 = vmatprep.mubr.bf16.mxu1 %v5355_v54  ;;  %v2729_v54 = vld [vmem:[#allocation2 + $0x69] sm:$0xff] }
 0x129   : > { %4419 = vmatprep.mubr.bf16.mxu0 %v2467_v61  ;;  %4483 = vmatpush3.bf16.msra.mxu1 %v4843_v9  ;;  %v2760_v10 = vpack.c.bf16 %v2730_v58, %v2729_v54  ;;  %v2753_v29 = vld [vmem:[#allocation2 + $0x1e9] sm:$0xff]  ;;  %v2758_v54 = vld [vmem:[#allocation2 + $0x231] sm:$0xff] }
 0x12a   : > { %4476 = vmatprep.subr.bf16.mxu1 %v4844_v6  ;;  %v1531_v61 = vld [vmem:[#allocation2 + $0x1f0] sm:$0xff]  ;;  %v2772_v4 = vpack.c.bf16 %v2754_v16, %v2753_v29 }
 0x12b   : > { %v2755_v9 = vld [vmem:[#allocation2 + $0x209] sm:$0xff]  ;;  %v1548_v5 = vpack.c.bf16 %v1531_v61, %v1530_v50 }
 0x12d   : > { %4484 = vmatpush3.bf16.msra.mxu1 %v4844_v6  ;;  %v2773_v6 = vpack.c.bf16 %v2756_v42, %v2755_v9 }
 0x12e   : > { %4477 = vmatprep.subr.bf16.mxu1 %v4845_v21 }
 0x12f   : > { %4212 = vmatmul.mubr.bf16.gmra.mrb[12].mxu1 %v5357_v56  ;;  %v2733_v56 = vld [vmem:[#allocation2 + $0xa9] sm:$0xff] }
 0x130   : > { %4420 = vmatmul.mubr.bf16.gmra.mrb[28].mxu0 %v2468_v17  ;;  %4215 = vmatprep.mubr.bf16.mxu1 %v5370_v63  ;;  %v2734_v63 = vld [vmem:[#allocation2 + $0xb1] sm:$0xff]  ;;  %v1532_v17 = vld [vmem:[#allocation2 + $0x208] sm:$0xff] }
 0x131   : > { %4439 = vmatprep.mubr.bf16.mxu0 %v2759_v51  ;;  %4485 = vmatpush3.bf16.msra.mxu1 %v4845_v21  ;;  %v2762_v34 = vpack.c.bf16 %v2734_v63, %v2733_v56  ;;  %v1533_v51 = vld [vmem:[#allocation2 + $0x210] sm:$0xff] }
 0x132   : > { %4478 = vmatprep.subr.bf16.mxu1 %v4846_v2  ;;  %v2757_v21 = vld [vmem:[#allocation2 + $0x229] sm:$0xff]  ;;  %v1549_v58 = vpack.c.bf16 %v1533_v51, %v1532_v17 }
 0x133   : > { %v2774_v0 = vpack.c.bf16 %v2758_v54, %v2757_v21 }
 0x135   : > { %4486 = vmatpush3.bf16.msra.mxu1 %v4846_v2 }
 0x137   : > { %4216 = vmatmul.mubr.bf16.gmra.mrb[16].mxu1 %v5372_v3  ;;  %v2740_v3 = vld [vmem:[#allocation2 + $0x111] sm:$0xff] }
 0x138   : > { %4440 = vmatmul.mubr.bf16.vlgmr.msra.gmra.mrb[0].mxu0 %v2760_v10  ;;  %4219 = vmatprep.mubr.bf16.mxu1 %v5386_v18  ;;  %v2765_v36 = vpack.c.bf16 %v2740_v3, %v2739_v14  ;;  %v2741_v18 = vld [vmem:[#allocation2 + $0x129] sm:$0xff] }
 0x139   : > { %4443 = vmatprep.mubr.bf16.mxu0 %v2761_v7  ;;  %v2766_v38 = vpack.c.bf16 %v2742_v13, %v2741_v18 }
 0x13f   : > { %4220 = vmatmul.mubr.bf16.gmra.mrb[20].mxu1 %v5388_v19  ;;  %v2744_v19 = vld [vmem:[#allocation2 + $0x151] sm:$0xff] }
 0x140   : > { %4444 = vmatmul.mubr.bf16.gmra.mrb[4].mxu0 %v2762_v34  ;;  %4223 = vmatprep.mubr.bf16.mxu1 %v5400_v31  ;;  %v2767_v39 = vpack.c.bf16 %v2744_v19, %v2743_v8  ;;  %v1520_v31 = vld [vmem:[#allocation2 + $0x148] sm:$0xff] }
 0x141   : > { %4447 = vmatprep.mubr.bf16.mxu0 %v2763_v24  ;;  %v1543_v49 = vpack.c.bf16 %v1521_v46, %v1520_v31 }
 0x147   : > { %4224 = vmatmul.mubr.bf16.gmra.mrb[24].mxu1 %v5402_v32  ;;  %v2746_v32 = vld [vmem:[#allocation2 + $0x171] sm:$0xff] }
 0x148   : > { %4448 = vmatmul.mubr.bf16.gmra.mrb[8].mxu0 %v2764_v35  ;;  %4227 = vmatprep.mubr.bf16.mxu1 %v5414_v40  ;;  %v2747_v40 = vld [vmem:[#allocation2 + $0x189] sm:$0xff]  ;;  %v2768_v22 = vpack.c.bf16 %v2746_v32, %v2745_v47 }
 0x149   : > { %4451 = vmatprep.mubr.bf16.mxu0 %v2765_v36  ;;  %v2769_v15 = vpack.c.bf16 %v2748_v43, %v2747_v40 }
 0x14f   : > { %4228 = vmatmul.mubr.bf16.gmra.mrb[28].mxu1 %v5446_v52  ;;  %v1524_v52 = vld [vmem:[#allocation2 + $0x188] sm:$0xff] }
 0x150   : > { %4452 = vmatmul.mubr.bf16.gmra.mrb[12].mxu0 %v2766_v38  ;;  %4263 = vmatprep.mubr.bf16.mxu1 %v5493_v41  ;;  %v2750_v41 = vld [vmem:[#allocation2 + $0x1b1] sm:$0xff]  ;;  %v1545_v55 = vpack.c.bf16 %v1525_v23, %v1524_v52 }
 0x151   : > { %4455 = vmatprep.mubr.bf16.mxu0 %v2767_v39  ;;  %v2770_v57 = vpack.c.bf16 %v2750_v41, %v2749_v11 }
 0x157   : > { %4264 = vmatmul.mubr.bf16.vlgmr.msra.gmra.mrb[16].mxu1 %v1543_v49 }
 0x158   : > { %4456 = vmatmul.mubr.bf16.gmra.mrb[16].mxu0 %v2768_v22  ;;  %4267 = vmatprep.mubr.bf16.mxu1 %v1544_v27 }
 0x159   : > { %4459 = vmatprep.mubr.bf16.mxu0 %v2769_v15 }
 0x15f   : > { %4268 = vmatmul.mubr.bf16.gmra.mrb[20].mxu1 %v1545_v55 }
 0x160   : > { %4460 = vmatmul.mubr.bf16.gmra.mrb[20].mxu0 %v2770_v57  ;;  %4271 = vmatprep.mubr.bf16.mxu1 %v1546_v12 }
 0x161   : > { %4463 = vmatprep.mubr.bf16.mxu0 %v2771_v26 }
 0x167   : > { %4272 = vmatmul.mubr.bf16.gmra.mrb[24].mxu1 %v1547_v62 }
 0x168   : > { %4464 = vmatmul.mubr.bf16.gmra.mrb[24].mxu0 %v2772_v4  ;;  %4275 = vmatprep.mubr.bf16.mxu1 %v1548_v5 }
 0x169   : > { %4467 = vmatprep.mubr.bf16.mxu0 %v2773_v6 }
 0x16f   : > { %4276 = vmatmul.mubr.bf16.gmra.mrb[28].mxu1 %v1549_v58 }
 0x170   : > { %4468 = vmatmul.mubr.bf16.gmra.mrb[28].mxu0 %v2774_v0 }
 0x1ea   : > { %v4201_v1 = vpop.f32.mrb[0].mxu1 }
 0x1eb   : > { %v1343_v2 = vpop.f32.mrb[1].mxu1 }
 0x1ec   : > { %v4202_v10 = vpop.f32.mrb[2].mxu1 }
 0x1ed   : > { %v1346_v7 = vpop.f32.mrb[3].mxu1 }
 0x1f2   : > { %v4205_v56 = vpop.f32.mrb[4].mxu1 }
 0x1f3   : > { %v1359_v63 = vpop.f32.mrb[5].mxu1 }
 0x1f4   : > { %v4206_v20 = vpop.f32.mrb[6].mxu1 }
 0x1f5   : > { %v1362_v59 = vpop.f32.mrb[7].mxu1 }
 0x1fa   : > { %v4209_v34 = vpop.f32.mrb[8].mxu1 }
 0x1fb   : > { %v1375_v24 = vpop.f32.mrb[9].mxu1 }
 0x1fc   : > { %v4210_v25 = vpop.f32.mrb[10].mxu1 }
 0x1fd   : > { %v1378_v33 = vpop.f32.mrb[11].mxu1 }
 0x202   : > { %v4213_v14 = vpop.f32.mrb[12].mxu1 }
 0x203   : > { %v1391_v3 = vpop.f32.mrb[13].mxu1 }
 0x204   : > { %v4214_v35 = vpop.f32.mrb[14].mxu1 }
 0x205   : > { %v1394_v36 = vpop.f32.mrb[15].mxu1 }
 0x20b   : > { %v4441_v18 = vpop.f32.mrb[0].mxu0 }
 0x20c   : > { %v5539_v13 = vadd.f32 %v4441_v18, %v4201_v1  ;;  %v2874_v8 = vpop.f32.mrb[1].mxu0 }
 0x20d   : > { %v5541_v19 = vadd.f32 %v2874_v8, %v1343_v2  ;;  %v4442_v38 = vpop.f32.mrb[2].mxu0 }
 0x20e   : > { %v5543_v39 = vadd.f32 %v4442_v38, %v4202_v10  ;;  %v2877_v31 = vpop.f32.mrb[3].mxu0 }
 0x20f   : > { %v5545_v46 = vadd.f32 %v2877_v31, %v1346_v7 }
 0x210   : > { %v3721_v47 = vpack.c.bf16 %v5543_v39, %v5539_v13 }
 0x211   : > { %v3716_v32 = vpack.c.bf16 %v5545_v46, %v5541_v19 }
 0x212   : > { %3808 = vst [vmem:[%s4897_s21 + $0x8] sm:$0xff] %v3721_v47  }
 0x213   : > { %3717 = vst [vmem:[%s4897_s21] sm:$0xff] %v3716_v32   ;;  %v4445_v48 = vpop.f32.mrb[4].mxu0 }
 0x214   : > { %v5553_v30 = vadd.f32 %v4445_v48, %v4205_v56  ;;  %v2890_v40 = vpop.f32.mrb[5].mxu0 }
 0x215   : > { %v5555_v43 = vadd.f32 %v2890_v40, %v1359_v63  ;;  %v4446_v49 = vpop.f32.mrb[6].mxu0 }
 0x216   : > { %v5557_v22 = vadd.f32 %v4446_v49, %v4206_v20  ;;  %v2893_v27 = vpop.f32.mrb[7].mxu0 }
 0x217   : > { %v5559_v15 = vadd.f32 %v2893_v27, %v1362_v59 }
 0x218   : > { %v3731_v52 = vpack.c.bf16 %v5557_v22, %v5553_v30 }
 0x219   : > { %v3726_v23 = vpack.c.bf16 %v5559_v15, %v5555_v43 }
 0x21a   : > { %3810 = vst [vmem:[%s4897_s21 + $0x18] sm:$0xff] %v3731_v52  }
 0x21b   : > { %3809 = vst [vmem:[%s4897_s21 + $0x10] sm:$0xff] %v3726_v23   ;;  %v4449_v11 = vpop.f32.mrb[8].mxu0 }
 0x21c   : > { %v5567_v41 = vadd.f32 %v4449_v11, %v4209_v34  ;;  %v2906_v45 = vpop.f32.mrb[9].mxu0 }
 0x21d   : > { %v5569_v37 = vadd.f32 %v2906_v45, %v1375_v24  ;;  %v4450_v44 = vpop.f32.mrb[10].mxu0 }
 0x21e   : > { %v5571_v53 = vadd.f32 %v4450_v44, %v4210_v25  ;;  %v2909_v55 = vpop.f32.mrb[11].mxu0 }
 0x21f   : > { %v5573_v57 = vadd.f32 %v2909_v55, %v1378_v33 }
 0x220   : > { %v3741_v12 = vpack.c.bf16 %v5571_v53, %v5567_v41 }
 0x221   : > { %v3736_v26 = vpack.c.bf16 %v5573_v57, %v5569_v37 }
 0x222   : > { %3812 = vst [vmem:[%s4897_s21 + $0x28] sm:$0xff] %v3741_v12  }
 0x223   : > { %3811 = vst [vmem:[%s4897_s21 + $0x20] sm:$0xff] %v3736_v26   ;;  %v4453_v28 = vpop.f32.mrb[12].mxu0 }
 0x224   : > { %v5581_v60 = vadd.f32 %v4453_v28, %v4213_v14  ;;  %v2922_v29 = vpop.f32.mrb[13].mxu0 }
 0x225   : > { %v5583_v16 = vadd.f32 %v2922_v29, %v1391_v3  ;;  %v4454_v50 = vpop.f32.mrb[14].mxu0 }
 0x226   : > { %v5585_v61 = vadd.f32 %v4454_v50, %v4214_v35  ;;  %v2925_v9 = vpop.f32.mrb[15].mxu0 }
 0x227   : > { %v5587_v42 = vadd.f32 %v2925_v9, %v1394_v36 }
 0x228   : > { %v3751_v62 = vpack.c.bf16 %v5585_v61, %v5581_v60 }
 0x229   : > { %v3746_v4 = vpack.c.bf16 %v5587_v42, %v5583_v16 }
 0x22a   : > { %3814 = vst [vmem:[%s4897_s21 + $0x38] sm:$0xff] %v3751_v62   ;;  %v4265_v5 = vpop.f32.mrb[16].mxu1 }
 0x22b   : > { %3813 = vst [vmem:[%s4897_s21 + $0x30] sm:$0xff] %v3746_v4   ;;  %v4457_v6 = vpop.f32.mrb[16].mxu0  ;;  %v1713_v17 = vpop.f32.mrb[17].mxu1 }
 0x22c   : > { %v5595_v51 = vadd.f32 %v4457_v6, %v4265_v5  ;;  %v2938_v21 = vpop.f32.mrb[17].mxu0  ;;  %v4266_v54 = vpop.f32.mrb[18].mxu1 }
 0x22d   : > { %v5597_v58 = vadd.f32 %v2938_v21, %v1713_v17  ;;  %v4458_v0 = vpop.f32.mrb[18].mxu0  ;;  %v1716_v1 = vpop.f32.mrb[19].mxu1 }
 0x22e   : > { %v5599_v2 = vadd.f32 %v4458_v0, %v4266_v54  ;;  %v2941_v10 = vpop.f32.mrb[19].mxu0 }
 0x22f   : > { %v5601_v7 = vadd.f32 %v2941_v10, %v1716_v1 }
 0x230   : > { %v3761_v56 = vpack.c.bf16 %v5599_v2, %v5595_v51 }
 0x231   : > { %v3756_v63 = vpack.c.bf16 %v5601_v7, %v5597_v58 }
 0x232   : > { %3816 = vst [vmem:[%s4897_s21 + $0x48] sm:$0xff] %v3761_v56   ;;  %v4269_v20 = vpop.f32.mrb[20].mxu1  ;;  %v4856_v56 = vmov (!%p3379_p4), 0.0  }
 0x233   : > { %3815 = vst [vmem:[%s4897_s21 + $0x40] sm:$0xff] %v3756_v63   ;;  %v4461_v59 = vpop.f32.mrb[20].mxu0  ;;  %v1729_v34 = vpop.f32.mrb[21].mxu1  ;;  %3196 = vst [vmem:[%s5770_s3] sm:$0x3] (!%p3379_p4), %v4856_v56 }
 0x234   : > { %v5609_v24 = vadd.f32 %v4461_v59, %v4269_v20  ;;  %v2954_v25 = vpop.f32.mrb[21].mxu0  ;;  %v4270_v33 = vpop.f32.mrb[22].mxu1 }
 0x235   : > { %v5611_v14 = vadd.f32 %v2954_v25, %v1729_v34  ;;  %v4462_v3 = vpop.f32.mrb[22].mxu0  ;;  %v1732_v35 = vpop.f32.mrb[23].mxu1 }
 0x236   : > { %v5613_v36 = vadd.f32 %v4462_v3, %v4270_v33  ;;  %v2957_v18 = vpop.f32.mrb[23].mxu0 }
 0x237   : > { %v5615_v8 = vadd.f32 %v2957_v18, %v1732_v35 }
 0x238   : > { %v3771_v38 = vpack.c.bf16 %v5613_v36, %v5609_v24 }
 0x239   : > { %v3766_v31 = vpack.c.bf16 %v5615_v8, %v5611_v14 }
 0x23a   : > { %3818 = vst [vmem:[%s4897_s21 + $0x58] sm:$0xff] %v3771_v38   ;;  %v4273_v47 = vpop.f32.mrb[24].mxu1 }
 0x23b   : > { %3817 = vst [vmem:[%s4897_s21 + $0x50] sm:$0xff] %v3766_v31   ;;  %v4465_v32 = vpop.f32.mrb[24].mxu0  ;;  %v1745_v48 = vpop.f32.mrb[25].mxu1 }
 0x23c   : > { %v5623_v40 = vadd.f32 %v4465_v32, %v4273_v47  ;;  %v2970_v49 = vpop.f32.mrb[25].mxu0  ;;  %v4274_v27 = vpop.f32.mrb[26].mxu1 }
 0x23d   : > { %v5625_v52 = vadd.f32 %v2970_v49, %v1745_v48  ;;  %v4466_v23 = vpop.f32.mrb[26].mxu0  ;;  %v1748_v11 = vpop.f32.mrb[27].mxu1 }
 0x23e   : > { %v5627_v45 = vadd.f32 %v4466_v23, %v4274_v27  ;;  %v2973_v44 = vpop.f32.mrb[27].mxu0 }
 0x23f   : > { %v5629_v55 = vadd.f32 %v2973_v44, %v1748_v11 }
 0x240   : > { %v3781_v12 = vpack.c.bf16 %v5627_v45, %v5623_v40 }
 0x241   : > { %v3776_v26 = vpack.c.bf16 %v5629_v55, %v5625_v52 }
 0x242   : > { %3820 = vst [vmem:[%s4897_s21 + $0x68] sm:$0xff] %v3781_v12   ;;  %v4277_v28 = vpop.f32.mrb[28].mxu1 }
 0x243   : > { %3819 = vst [vmem:[%s4897_s21 + $0x60] sm:$0xff] %v3776_v26   ;;  %v4469_v29 = vpop.f32.mrb[28].mxu0  ;;  %v1761_v50 = vpop.f32.mrb[29].mxu1 }
 0x244   : > { %v5637_v9 = vadd.f32 %v4469_v29, %v4277_v28  ;;  %v2986_v62 = vpop.f32.mrb[29].mxu0  ;;  %v4278_v4 = vpop.f32.mrb[30].mxu1 }
 0x245   : > { %v5639_v5 = vadd.f32 %v2986_v62, %v1761_v50  ;;  %v4470_v6 = vpop.f32.mrb[30].mxu0  ;;  %v1764_v17 = vpop.f32.mrb[31].mxu1  ;;  %3195 = sbr.rel (%p3379_p4) target bundleno = 588 (0x24c), region = 36 }
 0x246   : > { %v5641_v21 = vadd.f32 %v4470_v6, %v4278_v4  ;;  %v2989_v54 = vpop.f32.mrb[31].mxu0 }
 0x247   : > { %v5643_v0 = vadd.f32 %v2989_v54, %v1764_v17 }
 0x248   : > { %v3791_v1 = vpack.c.bf16 %v5641_v21, %v5637_v9 }
 0x249   : > { %v3786_v10 = vpack.c.bf16 %v5643_v0, %v5639_v5 }
 0x24a   : > { %3822 = vst [vmem:[%s4897_s21 + $0x78] sm:$0xff] %v3791_v1  }
 0x24b   : > { %3821 = vst [vmem:[%s4897_s21 + $0x70] sm:$0xff] %v3786_v10  }
 0x24c PF: > { %v3198_v63 = vadd.f32 %v5545_v46, %v5541_v19  ;;  %v3238_v34 = vmul.f32 %v5541_v19, %v5541_v19  ;;  %v3239_v25 = vmul.f32 %v5545_v46, %v5545_v46  ;;  %v3240_v3 = vmul.f32 %v5539_v13, %v5539_v13 }
 0x24d   : > { %v3241_v18 = vmul.f32 %v5543_v39, %v5543_v39  ;;  %v3242_v47 = vmul.f32 %v5555_v43, %v5555_v43  ;;  %v3243_v46 = vmul.f32 %v5559_v15, %v5559_v15  ;;  %v3244_v49 = vmul.f32 %v5553_v30, %v5553_v30 }
 0x24e   : > { %v3199_v20 = vadd.f32 %v5539_v13, %v3198_v63  ;;  %v3270_v38 = vadd.f32 %v3239_v25, %v3238_v34  ;;  %v3245_v23 = vmul.f32 %v5557_v22, %v5557_v22  ;;  %v3246_v44 = vmul.f32 %v5569_v37, %v5569_v37 }
 0x24f   : > { %v3247_v26 = vmul.f32 %v5573_v57, %v5573_v57  ;;  %v3248_v29 = vmul.f32 %v5567_v41, %v5567_v41  ;;  %v3249_v62 = vmul.f32 %v5571_v53, %v5571_v53  ;;  %v3250_v6 = vmul.f32 %v5583_v16, %v5583_v16 }
 0x250   : > { %v3200_v59 = vadd.f32 %v5543_v39, %v3199_v20  ;;  %v3271_v19 = vadd.f32 %v3270_v38, %v3240_v3  ;;  %v3251_v54 = vmul.f32 %v5587_v42, %v5587_v42  ;;  %v3252_v10 = vmul.f32 %v5581_v60, %v5581_v60 }
 0x251   : > { %v3253_v63 = vmul.f32 %v5585_v61, %v5585_v61  ;;  %v3255_v25 = vmul.f32 %v5601_v7, %v5601_v7  ;;  %v3256_v3 = vmul.f32 %v5595_v51, %v5595_v51 }
 0x252   : > { %v3201_v33 = vadd.f32 %v5555_v43, %v3200_v59  ;;  %v3272_v48 = vadd.f32 %v3271_v19, %v3241_v18  ;;  %v3254_v59 = vmul.f32 %v5597_v58, %v5597_v58  ;;  %v3257_v18 = vmul.f32 %v5599_v2, %v5599_v2 }
 0x253   : > { %v3259_v19 = vmul.f32 %v5615_v8, %v5615_v8 }
 0x254   : > { %v3202_v35 = vadd.f32 %v5559_v15, %v3201_v33  ;;  %v3273_v27 = vadd.f32 %v3272_v48, %v3242_v47 }
 0x256   : > { %v3203_v31 = vadd.f32 %v5553_v30, %v3202_v35  ;;  %v3274_v11 = vadd.f32 %v3273_v27, %v3243_v46  ;;  %v3260_v46 = vmul.f32 %v5609_v24, %v5609_v24  ;;  %v3262_v27 = vmul.f32 %v5625_v52, %v5625_v52 }
 0x258   : > { %v3204_v32 = vadd.f32 %v5557_v22, %v3203_v31  ;;  %v3275_v12 = vadd.f32 %v3274_v11, %v3244_v49  ;;  %v3258_v31 = vmul.f32 %v5611_v14, %v5611_v14 }
 0x25a   : > { %v3205_v13 = vadd.f32 %v5569_v37, %v3204_v32  ;;  %v3276_v28 = vadd.f32 %v3275_v12, %v3245_v23  ;;  %v3263_v23 = vmul.f32 %v5629_v55, %v5629_v55  ;;  %v3265_v12 = vmul.f32 %v5627_v45, %v5627_v45 }
 0x25c   : > { %v3206_v39 = vadd.f32 %v5573_v57, %v3205_v13  ;;  %v3277_v50 = vadd.f32 %v3276_v28, %v3246_v44  ;;  %v3261_v13 = vmul.f32 %v5613_v36, %v5613_v36 }
 0x25e   : > { %v3207_v43 = vadd.f32 %v5567_v41, %v3206_v39  ;;  %v3278_v4 = vadd.f32 %v3277_v50, %v3247_v26  ;;  %v3266_v26 = vmul.f32 %v5639_v5, %v5639_v5  ;;  %v3268_v50 = vmul.f32 %v5637_v9, %v5637_v9 }
 0x260   : > { %v3208_v15 = vadd.f32 %v5571_v53, %v3207_v43  ;;  %v3279_v17 = vadd.f32 %v3278_v4, %v3248_v29  ;;  %v3264_v43 = vmul.f32 %v5623_v40, %v5623_v40 }
 0x262   : > { %v3209_v30 = vadd.f32 %v5583_v16, %v3208_v15  ;;  %v3280_v1 = vadd.f32 %v3279_v17, %v3249_v62 }
 0x264   : > { %v3210_v22 = vadd.f32 %v5587_v42, %v3209_v30  ;;  %v3281_v56 = vadd.f32 %v3280_v1, %v3250_v6  ;;  %v3267_v30 = vmul.f32 %v5643_v0, %v5643_v0 }
 0x266   : > { %v3211_v37 = vadd.f32 %v5581_v60, %v3210_v22  ;;  %v3282_v20 = vadd.f32 %v3281_v56, %v3251_v54 }
 0x268   : > { %v3212_v57 = vadd.f32 %v5585_v61, %v3211_v37  ;;  %v3283_v34 = vadd.f32 %v3282_v20, %v3252_v10 }
 0x26a   : > { %v3213_v41 = vadd.f32 %v5597_v58, %v3212_v57  ;;  %v3284_v33 = vadd.f32 %v3283_v34, %v3253_v63 }
 0x26c   : > { %v3214_v53 = vadd.f32 %v5601_v7, %v3213_v41  ;;  %v3285_v35 = vadd.f32 %v3284_v33, %v3254_v59 }
 0x26e   : > { %v3215_v16 = vadd.f32 %v5595_v51, %v3214_v53  ;;  %v3286_v38 = vadd.f32 %v3285_v35, %v3255_v25  ;;  %v3237_v53 = vld [vmem:[%s5770_s3 + $0x1] sm:$0x1] }
 0x270   : > { %v3216_v42 = vadd.f32 %v5599_v2, %v3215_v16  ;;  %v3287_v47 = vadd.f32 %v3286_v38, %v3256_v3 }
 0x272   : > { %v3217_v60 = vadd.f32 %v5611_v14, %v3216_v42  ;;  %v3288_v32 = vadd.f32 %v3287_v47, %v3257_v18 }
 0x274   : > { %v3218_v61 = vadd.f32 %v5615_v8, %v3217_v60  ;;  %v3289_v48 = vadd.f32 %v3288_v32, %v3258_v31 }
 0x276   : > { %v3219_v58 = vadd.f32 %v5609_v24, %v3218_v61  ;;  %v3290_v49 = vadd.f32 %v3289_v48, %v3259_v19 }
 0x278   : > { %v3220_v7 = vadd.f32 %v5613_v36, %v3219_v58  ;;  %v3291_v39 = vadd.f32 %v3290_v49, %v3260_v46 }
 0x27a   : > { %v3221_v51 = vadd.f32 %v5625_v52, %v3220_v7  ;;  %v3292_v11 = vadd.f32 %v3291_v39, %v3261_v13 }
 0x27c   : > { %v3222_v2 = vadd.f32 %v5629_v55, %v3221_v51  ;;  %v3293_v44 = vadd.f32 %v3292_v11, %v3262_v27 }
 0x27e   : > { %v3223_v14 = vadd.f32 %v5623_v40, %v3222_v2  ;;  %v3294_v15 = vadd.f32 %v3293_v44, %v3263_v23 }
 0x280   : > { %v3224_v8 = vadd.f32 %v5627_v45, %v3223_v14  ;;  %v3295_v28 = vadd.f32 %v3294_v15, %v3264_v43  ;;  %v3269_v45 = vmul.f32 %v5641_v21, %v5641_v21 }
 0x282   : > { %v3225_v24 = vadd.f32 %v5639_v5, %v3224_v8  ;;  %v3296_v29 = vadd.f32 %v3295_v28, %v3265_v12 }
 0x284   : > { %v3226_v36 = vadd.f32 %v5643_v0, %v3225_v24  ;;  %v3297_v22 = vadd.f32 %v3296_v29, %v3266_v26  ;;  %v3197_v0 = vld [vmem:[%s5770_s3] sm:$0x1] }
 0x286   : > { %v3227_v52 = vadd.f32 %v5637_v9, %v3226_v36  ;;  %v3298_v4 = vadd.f32 %v3297_v22, %v3267_v30 }
 0x288   : > { %v3228_v55 = vadd.f32 %v5641_v21, %v3227_v52  ;;  %v3299_v6 = vadd.f32 %v3298_v4, %v3268_v50 }
 0x28a   : > { %v3229_v40 = vrot.slane %v3228_v55, 4  ;;  %v3300_v17 = vadd.f32 %v3299_v6, %v3269_v45 }
 0x28c   : > { %v3230_v62 = vadd.f32 %v3229_v40, %v3228_v55  ;;  %v3301_v54 = vrot.slane %v3300_v17, 4 }
 0x28e   : > { %v3231_v37 = vrot.slane %v3230_v62, 2  ;;  %v3302_v41 = vadd.f32 %v3301_v54, %v3300_v17 }
 0x290   : > { %v3232_v5 = vadd.f32 %v3231_v37, %v3230_v62  ;;  %v3303_v9 = vrot.slane %v3302_v41, 2 }
 0x292   : > { %v3233_v57 = vrot.slane %v3232_v5, 1  ;;  %v3304_v21 = vadd.f32 %v3303_v9, %v3302_v41 }
 0x294   : > { %v3234_v1 = vadd.f32 %v3233_v57, %v3232_v5  ;;  %v3305_v56 = vrot.slane %v3304_v21, 1 }
 0x296   : > { %v3235_v10 = vadd.f32 %v3234_v1, %v3197_v0  ;;  %v3306_v63 = vadd.f32 %v3305_v56, %v3304_v21 }
 0x298   : > { %3236 = vst [vmem:[%s5770_s3] sm:$0x1] %v3235_v10  ;;  %v3307_v20 = vadd.f32 %v3306_v63, %v3237_v53 }
 0x29a   : > { %3308 = vst [vmem:[%s5770_s3 + $0x1] sm:$0x1] %v3307_v20 }
 0x29b PF: > { %s14_s12 = sadd.s32 1, %s4853_s12  }
 0x29c   : > { %p11_p5 = scmp.ge.s32.totalorder %s14_s12, 4  }
 0x29e   :  { %13 = sbr.rel (!%p11_p5) target bundleno = 1 (0x1), region = 84 }

// kernel: unet_down_forward.4
= control target key start
LH: loop header
LB: loop body
LE: loop exit
PB: predicated region body
PF: predicated region fallthrough
CT: control target
= control target key end

     0   :  { %s5289_s21 = smov 0   ;;  %s6283_s0 = inlined_call_operand.vmem [shape: bf16[2,16,16,128], index: 0, kind: input, shape index: {}]   ;;  %s6284_s1 = inlined_call_operand.vmem [shape: f32[2,128], index: 1, kind: input, shape index: {}]   ;;  %s6285_s2 = inlined_call_operand.vmem [shape: f32[1,128], index: 2, kind: input, shape index: {}]   ;;  %s6286_s3 = inlined_call_operand.vmem [shape: f32[1,128], index: 3, kind: input, shape index: {}]   ;;  %s6287_s4 = inlined_call_operand.vmem [shape: bf16[9,128,128], index: 4, kind: input, shape index: {}]   ;;  %s6288_s5 = inlined_call_operand.vmem [shape: bf16[2,16,16,128], index: 5, kind: output, shape index: {0}]   ;;  %s6289_s6 = inlined_call_operand.vmem [shape: f32[2,128], index: 6, kind: output, shape index: {1}]  }
   0x1 LB: > { %s5295_s22 = sadd.s32 4294967295, %s5250_s21   ;;  %p3705_p0 = scmp.ge.s32.totalorder %s5250_s21, 1  ;;  %s5250_s21 = sphi %s5289_s21, %s17_s21  }
   0x2   : > { %p210_p1 = scmp.lt.s32.totalorder %s5250_s21, 3 }
   0x4   : > { %p211_p2 = pnand %p3705_p0, %p210_p1 }
   0x5   : > { %p240_p3 = scmp.lt.s32.totalorder (!%p211_p2), %s5295_s22, 1  ;;  %v315_v0 = vld [vmem:[%s6284_s1] sm:$0x1] (!%p211_p2)  ;;  %v317_v2 = vld [vmem:[%s6284_s1 + $0x1] sm:$0x1] (!%p211_p2)  ;;  %v330_v8 = vlaneseq (!%p211_p2)  ;;  %p3710_p4 = scmp.ne.s32.totalorder (!%p211_p2), %s5295_s22, 0 }
   0x6   : > { %214 = sbr.rel (%p211_p2) target bundleno = 734 (0x2de), region = 40  ;;  %v316_v1 = vmul.f32 (!%p211_p2), 0.001953125, %v315_v0  ;;  %v318_v3 = vmul.f32 (!%p211_p2), 0.001953125, %v317_v2  ;;  %v322_v13 = vld [vmem:[%s6285_s2] sm:$0x1] (!%p211_p2) }
   0x7   : > { %v5317_v9 = vshrl.u32 (!%p211_p2), %v330_v8, 7  ;;  %v326_v52 = vld [vmem:[%s6286_s3] sm:$0x1] (!%p211_p2) }
   0x8   : > { %v319_v4 = vmul.f32 (!%p211_p2), %v316_v1, %v316_v1 }
   0x9   : > { %v332_v18 = vsub.s32 (!%p211_p2), 0, %v5317_v9 }
   0xa   : > { %v320_v5 = vsub.f32 (!%p211_p2), %v318_v3, %v319_v4 }
   0xc   : > { %v321_v6 = vmax.f32 (!%p211_p2), %v320_v5, 0.0 }
   0xd   : > { %s241_s25 = scalar_select %p240_p3, %s5295_s22, 1 }
   0xe   : > { %v323_v7 = vadd.f32 1e-05, %v321_v6 }
   0xf   : > { %s3946_s26 = sshll.u32 %s241_s25, 7 }
  0x10   : > { %s5307_s29 = scalar_lea.vmem %s6288_s5, %s3946_s26  ;;  %5084 = vrsqrt.f32 %v323_v7  ;;  %s5315_s10 = scalar_lea.vmem %s6283_s0, %s3946_s26 }
  0x11   : > { %v3981_v11 = vld [vmem:[%s5315_s10] sm:$0xff]   ;;  %v4124_v12 = vld [vmem:[%s5315_s10 + $0x8] sm:$0xff]   ;;  %v4125_v14 = vld [vmem:[%s5315_s10 + $0x10] sm:$0xff]  }
  0x12   : > { %v4126_v15 = vld [vmem:[%s5315_s10 + $0x18] sm:$0xff]   ;;  %v4127_v16 = vld [vmem:[%s5315_s10 + $0x20] sm:$0xff]   ;;  %v4128_v17 = vld [vmem:[%s5315_s10 + $0x28] sm:$0xff]   ;;  %v3982_v19 = vunpack.c.l.bf16 %v3981_v11  ;;  %v3983_v20 = vunpack.c.h.bf16 %v3981_v11  ;;  %v3986_v21 = vunpack.c.l.bf16 %v4124_v12  ;;  %v3987_v25 = vunpack.c.h.bf16 %v4124_v12 }
  0x13   : > { %v4129_v22 = vld [vmem:[%s5315_s10 + $0x30] sm:$0xff]   ;;  %v4130_v23 = vld [vmem:[%s5315_s10 + $0x38] sm:$0xff]   ;;  %v3990_v26 = vunpack.c.l.bf16 %v4125_v14  ;;  %v3991_v27 = vunpack.c.h.bf16 %v4125_v14  ;;  %v3994_v28 = vunpack.c.l.bf16 %v4126_v15  ;;  %v4131_v29 = vld [vmem:[%s5315_s10 + $0x40] sm:$0xff]   ;;  %v3995_v30 = vunpack.c.h.bf16 %v4126_v15 }
  0x14   : > { %v3998_v31 = vunpack.c.l.bf16 %v4127_v16  ;;  %v3999_v32 = vunpack.c.h.bf16 %v4127_v16  ;;  %v4002_v33 = vunpack.c.l.bf16 %v4128_v17  ;;  %v4132_v34 = vld [vmem:[%s5315_s10 + $0x48] sm:$0xff]   ;;  %v4133_v35 = vld [vmem:[%s5315_s10 + $0x50] sm:$0xff]   ;;  %v4003_v36 = vunpack.c.h.bf16 %v4128_v17  ;;  %v4134_v40 = vld [vmem:[%s5315_s10 + $0x58] sm:$0xff]  }
  0x15   : > { %v4006_v37 = vunpack.c.l.bf16 %v4129_v22  ;;  %v4007_v38 = vunpack.c.h.bf16 %v4129_v22  ;;  %v4010_v39 = vunpack.c.l.bf16 %v4130_v23  ;;  %v4135_v41 = vld [vmem:[%s5315_s10 + $0x60] sm:$0xff]   ;;  %v4011_v42 = vunpack.c.h.bf16 %v4130_v23  ;;  %v4136_v45 = vld [vmem:[%s5315_s10 + $0x68] sm:$0xff]   ;;  %v4137_v46 = vld [vmem:[%s5315_s10 + $0x70] sm:$0xff]  }
  0x16   : > { %v4014_v43 = vunpack.c.l.bf16 %v4131_v29  ;;  %v4015_v44 = vunpack.c.h.bf16 %v4131_v29  ;;  %v4018_v48 = vunpack.c.l.bf16 %v4132_v34  ;;  %v4019_v49 = vunpack.c.h.bf16 %v4132_v34  ;;  %v4138_v51 = vld [vmem:[%s5315_s10 + $0x78] sm:$0xff]  }
  0x17   : > { %v4022_v50 = vunpack.c.l.bf16 %v4133_v35  ;;  %v4023_v54 = vunpack.c.h.bf16 %v4133_v35  ;;  %v4026_v55 = vunpack.c.l.bf16 %v4134_v40  ;;  %v4027_v56 = vunpack.c.h.bf16 %v4134_v40 }
  0x18   : > { %v4030_v57 = vunpack.c.l.bf16 %v4135_v41  ;;  %v4031_v58 = vunpack.c.h.bf16 %v4135_v41  ;;  %v4034_v59 = vunpack.c.l.bf16 %v4136_v45  ;;  %v4035_v60 = vunpack.c.h.bf16 %v4136_v45 }
  0x19   : > { %v4038_v61 = vunpack.c.l.bf16 %v4137_v46  ;;  %v4039_v62 = vunpack.c.h.bf16 %v4137_v46  ;;  %v4042_v63 = vunpack.c.l.bf16 %v4138_v51  ;;  %v4043_v0 = vunpack.c.h.bf16 %v4138_v51 }
  0x1a   : > { %v5085_v10 = vpop.eup %5084 }
  0x1b   : > { %v325_v24 = vmul.f32 %v5085_v10, %v322_v13 }
  0x1d   : > { %v327_v47 = vmul.f32 %v325_v24, %v316_v1  ;;  %v333_v53 = vrot.slane %v325_v24, %v332_v18 }
  0x1f   : > { %v328_v1 = vsub.f32 %v326_v52, %v327_v47  ;;  %v335_v2 = vmul.f32 %v3982_v19, %v333_v53  ;;  %v336_v3 = vmul.f32 %v3983_v20, %v333_v53  ;;  %v337_v4 = vmul.f32 %v3986_v21, %v333_v53 }
  0x20   : > { %v338_v5 = vmul.f32 %v3987_v25, %v333_v53  ;;  %v339_v6 = vmul.f32 %v3990_v26, %v333_v53  ;;  %v340_v7 = vmul.f32 %v3991_v27, %v333_v53  ;;  %v341_v8 = vmul.f32 %v3994_v28, %v333_v53 }
  0x21   : > { %v342_v10 = vmul.f32 %v3995_v30, %v333_v53  ;;  %v343_v11 = vmul.f32 %v3998_v31, %v333_v53  ;;  %v344_v12 = vmul.f32 %v3999_v32, %v333_v53  ;;  %v345_v13 = vmul.f32 %v4002_v33, %v333_v53 }
  0x22   : > { %v346_v14 = vmul.f32 %v4003_v36, %v333_v53  ;;  %v347_v15 = vmul.f32 %v4006_v37, %v333_v53  ;;  %v348_v16 = vmul.f32 %v4007_v38, %v333_v53  ;;  %v349_v17 = vmul.f32 %v4010_v39, %v333_v53 }
  0x23   : > { %v350_v22 = vmul.f32 %v4011_v42, %v333_v53  ;;  %v351_v23 = vmul.f32 %v4014_v43, %v333_v53  ;;  %v352_v24 = vmul.f32 %v4015_v44, %v333_v53  ;;  %v353_v29 = vmul.f32 %v4018_v48, %v333_v53 }
  0x24   : > { %v371_v19 = vrot.slane %v328_v1, %v332_v18  ;;  %v354_v20 = vmul.f32 %v4019_v49, %v333_v53  ;;  %v355_v21 = vmul.f32 %v4022_v50, %v333_v53  ;;  %v356_v25 = vmul.f32 %v4023_v54, %v333_v53 }
  0x25   : > { %v357_v26 = vmul.f32 %v4026_v55, %v333_v53  ;;  %v358_v27 = vmul.f32 %v4027_v56, %v333_v53  ;;  %v359_v28 = vmul.f32 %v4030_v57, %v333_v53  ;;  %v360_v30 = vmul.f32 %v4031_v58, %v333_v53 }
  0x26   : > { %v361_v31 = vmul.f32 %v4034_v59, %v333_v53  ;;  %v362_v32 = vmul.f32 %v4035_v60, %v333_v53  ;;  %v363_v33 = vmul.f32 %v4038_v61, %v333_v53  ;;  %v364_v34 = vmul.f32 %v4039_v62, %v333_v53 }
  0x27   : > { %v365_v35 = vmul.f32 %v4042_v63, %v333_v53  ;;  %v366_v36 = vmul.f32 %v4043_v0, %v333_v53  ;;  %v373_v37 = vadd.f32 %v371_v19, %v335_v2  ;;  %v374_v38 = vadd.f32 %v371_v19, %v336_v3 }
  0x28   : > { %v375_v39 = vadd.f32 %v371_v19, %v337_v4  ;;  %v376_v40 = vadd.f32 %v371_v19, %v338_v5  ;;  %v377_v41 = vadd.f32 %v371_v19, %v339_v6  ;;  %v378_v9 = vadd.f32 %v371_v19, %v340_v7 }
  0x29   : > { %v379_v18 = vadd.f32 %v371_v19, %v341_v8  ;;  %v380_v42 = vadd.f32 %v371_v19, %v342_v10  ;;  %v381_v43 = vadd.f32 %v371_v19, %v343_v11  ;;  %v382_v44 = vadd.f32 %v371_v19, %v344_v12 }
  0x2a   : > { %v383_v45 = vadd.f32 %v371_v19, %v345_v13  ;;  %v384_v46 = vadd.f32 %v371_v19, %v346_v14  ;;  %v385_v47 = vadd.f32 %v371_v19, %v347_v15  ;;  %v386_v48 = vadd.f32 %v371_v19, %v348_v16 }
  0x2b   : > { %v387_v49 = vadd.f32 %v371_v19, %v349_v17  ;;  %v388_v50 = vadd.f32 %v371_v19, %v350_v22  ;;  %v5346_v51 = vadd.f32 %v371_v19, %v351_v23  ;;  %v5348_v52 = vadd.f32 %v371_v19, %v352_v24 }
  0x2c   : > { %v5350_v53 = vadd.f32 %v371_v19, %v353_v29  ;;  %v5352_v54 = vadd.f32 %v371_v19, %v354_v20  ;;  %v5354_v55 = vadd.f32 %v371_v19, %v355_v21  ;;  %v5356_v56 = vadd.f32 %v371_v19, %v356_v25 }
  0x2d   : > { %v5358_v57 = vadd.f32 %v371_v19, %v357_v26  ;;  %v5360_v58 = vadd.f32 %v371_v19, %v358_v27  ;;  %v437_v59 = vmul.f32 0.70710677, %v373_v37  ;;  %v438_v60 = vmul.f32 0.70710677, %v374_v38 }
  0x2e   : > { %v439_v61 = vmul.f32 0.70710677, %v375_v39  ;;  %v5362_v62 = vadd.f32 %v371_v19, %v359_v28  ;;  %v5364_v63 = vadd.f32 %v371_v19, %v360_v30  ;;  %v5366_v0 = vadd.f32 %v371_v19, %v361_v31 }
  0x2f   : > { %v440_v1 = vmul.f32 0.70710677, %v376_v40  ;;  %v5368_v2 = vadd.f32 %v371_v19, %v362_v32  ;;  %v5370_v3 = vadd.f32 %v371_v19, %v363_v33  ;;  %v441_v4 = vmul.f32 0.70710677, %v377_v41 }
  0x30   : > { %5086 = verf.f32 %v437_v59  ;;  %v5372_v5 = vadd.f32 %v371_v19, %v364_v34  ;;  %v5374_v6 = vadd.f32 %v371_v19, %v365_v35  ;;  %v442_v7 = vmul.f32 0.70710677, %v378_v9 }
  0x31   : > { %5088 = verf.f32 %v438_v60  ;;  %v5376_v8 = vadd.f32 %v371_v19, %v366_v36  ;;  %v405_v10 = vmul.f32 0.5, %v373_v37  ;;  %v443_v11 = vmul.f32 0.70710677, %v379_v18 }
  0x32   : > { %5090 = verf.f32 %v439_v61  ;;  %v406_v12 = vmul.f32 0.5, %v374_v38  ;;  %v407_v13 = vmul.f32 0.5, %v375_v39  ;;  %v444_v14 = vmul.f32 0.70710677, %v380_v42 }
  0x33   : > { %5092 = verf.f32 %v440_v1  ;;  %v408_v15 = vmul.f32 0.5, %v376_v40  ;;  %v409_v16 = vmul.f32 0.5, %v377_v41  ;;  %v445_v17 = vmul.f32 0.70710677, %v381_v43 }
  0x34   : > { %5094 = verf.f32 %v441_v4  ;;  %v5378_v22 = vmul.f32 0.5, %v378_v9  ;;  %v5380_v23 = vmul.f32 0.5, %v379_v18  ;;  %v446_v24 = vmul.f32 0.70710677, %v382_v44 }
  0x35   : > { %5096 = verf.f32 %v442_v7  ;;  %v5382_v29 = vmul.f32 0.5, %v380_v42  ;;  %v5384_v19 = vmul.f32 0.5, %v381_v43  ;;  %v447_v20 = vmul.f32 0.70710677, %v383_v45 }
  0x36   : > { %5098 = verf.f32 %v443_v11  ;;  %v5386_v21 = vmul.f32 0.5, %v382_v44  ;;  %v5388_v25 = vmul.f32 0.5, %v383_v45  ;;  %v448_v26 = vmul.f32 0.70710677, %v384_v46 }
  0x37   : > { %5100 = verf.f32 %v444_v14  ;;  %v5390_v27 = vmul.f32 0.5, %v384_v46  ;;  %v5392_v28 = vmul.f32 0.5, %v385_v47  ;;  %v449_v30 = vmul.f32 0.70710677, %v385_v47 }
  0x38   : > { %5102 = verf.f32 %v445_v17  ;;  %v5394_v31 = vmul.f32 0.5, %v386_v48  ;;  %v5396_v32 = vmul.f32 0.5, %v387_v49  ;;  %v450_v33 = vmul.f32 0.70710677, %v386_v48 }
  0x39   : > { %5104 = verf.f32 %v446_v24  ;;  %v5398_v35 = vmul.f32 0.5, %v388_v50  ;;  %v5401_v36 = vmul.f32 0.5, %v5346_v51  ;;  %v451_v37 = vmul.f32 0.70710677, %v387_v49 }
  0x3a   : > { %v5087_v34 = vpop.eup %5086  ;;  %5106 = verf.f32 %v447_v20  ;;  %v5404_v39 = vmul.f32 0.5, %v5348_v52  ;;  %v452_v40 = vmul.f32 0.70710677, %v388_v50  ;;  %v5407_v18 = vmul.f32 0.5, %v5350_v53 }
  0x3b   : > { %v5089_v38 = vpop.eup %5088  ;;  %5108 = verf.f32 %v448_v26  ;;  %v501_v41 = vadd.f32 1.0, %v5087_v34  ;;  %v453_v42 = vmul.f32 0.70710677, %v5346_v51  ;;  %v454_v45 = vmul.f32 0.70710677, %v5348_v52 }
  0x3c   : > { %v5091_v9 = vpop.eup %5090  ;;  %5110 = verf.f32 %v449_v30  ;;  %v502_v43 = vadd.f32 1.0, %v5089_v38  ;;  %v455_v49 = vmul.f32 0.70710677, %v5350_v53  ;;  %v456_v61 = vmul.f32 0.70710677, %v5352_v54 }
  0x3d   : > { %v5093_v44 = vpop.eup %5092  ;;  %5112 = verf.f32 %v450_v33  ;;  %v503_v46 = vadd.f32 1.0, %v5091_v9  ;;  %v5411_v47 = vmul.f32 %v501_v41, %v405_v10  ;;  %v457_v52 = vmul.f32 0.70710677, %v5354_v55 }
  0x3e   : > { %v5095_v48 = vpop.eup %5094  ;;  %5114 = verf.f32 %v451_v37  ;;  %v504_v50 = vadd.f32 1.0, %v5093_v44  ;;  %v5414_v59 = vmul.f32 %v502_v43, %v406_v12  ;;  %v458_v53 = vmul.f32 0.70710677, %v5356_v56 }
  0x3f   : > { %v5097_v60 = vpop.eup %5096  ;;  %5116 = verf.f32 %v452_v40  ;;  %v505_v51 = vadd.f32 1.0, %v5095_v48  ;;  %v5417_v1 = vmul.f32 %v503_v46, %v407_v13  ;;  %v459_v24 = vmul.f32 0.70710677, %v5358_v57 }
  0x40   : > { %v5099_v4 = vpop.eup %5098  ;;  %5118 = verf.f32 %v453_v42  ;;  %v506_v7 = vadd.f32 1.0, %v5097_v60  ;;  %v5420_v10 = vmul.f32 %v504_v50, %v408_v15  ;;  %v460_v30 = vmul.f32 0.70710677, %v5360_v58 }
  0x41   : > { %v5101_v11 = vpop.eup %5100  ;;  %5120 = verf.f32 %v454_v45  ;;  %v507_v12 = vadd.f32 1.0, %v5099_v4  ;;  %v5423_v14 = vmul.f32 %v505_v51, %v409_v16  ;;  %v461_v16 = vmul.f32 0.70710677, %v5362_v62 }
  0x42   : > { %v5103_v17 = vpop.eup %5102  ;;  %5122 = verf.f32 %v455_v49  ;;  %v508_v13 = vadd.f32 1.0, %v5101_v11  ;;  %v5427_v20 = vmul.f32 %v506_v7, %v5378_v22  ;;  %v462_v22 = vmul.f32 0.70710677, %v5364_v63 }
  0x43   : > { %v5105_v26 = vpop.eup %5104  ;;  %5124 = verf.f32 %v456_v61  ;;  %v509_v15 = vadd.f32 1.0, %v5103_v17  ;;  %v5431_v33 = vmul.f32 %v507_v12, %v5380_v23  ;;  %v463_v23 = vmul.f32 0.70710677, %v5366_v0 }
  0x44   : > { %v5107_v34 = vpop.eup %5106  ;;  %5126 = verf.f32 %v457_v52  ;;  %v510_v37 = vadd.f32 1.0, %v5105_v26  ;;  %v5435_v38 = vmul.f32 %v508_v13, %v5382_v29  ;;  %v464_v29 = vmul.f32 0.70710677, %v5368_v2 }
  0x45   : > { %v5109_v40 = vpop.eup %5108  ;;  %5128 = verf.f32 %v458_v53  ;;  %v511_v41 = vadd.f32 1.0, %v5107_v34  ;;  %v5439_v9 = vmul.f32 %v509_v15, %v5384_v19  ;;  %v465_v19 = vmul.f32 0.70710677, %v5370_v3 }
  0x46   : > { %v5111_v42 = vpop.eup %5110  ;;  %5130 = verf.f32 %v459_v24  ;;  %v512_v43 = vadd.f32 1.0, %v5109_v40  ;;  %v5443_v44 = vmul.f32 %v510_v37, %v5386_v21  ;;  %v466_v21 = vmul.f32 0.70710677, %v5372_v5 }
  0x47   : > { %v5113_v45 = vpop.eup %5112  ;;  %5132 = verf.f32 %v460_v30  ;;  %v513_v46 = vadd.f32 1.0, %v5111_v42  ;;  %v5447_v48 = vmul.f32 %v511_v41, %v5388_v25  ;;  %v467_v25 = vmul.f32 0.70710677, %v5374_v6 }
  0x48   : > { %v5115_v49 = vpop.eup %5114  ;;  %5134 = verf.f32 %v461_v16  ;;  %v514_v50 = vadd.f32 1.0, %v5113_v45  ;;  %v5451_v60 = vmul.f32 %v512_v43, %v5390_v27  ;;  %v468_v27 = vmul.f32 0.70710677, %v5376_v8 }
  0x49   : > { %v5117_v61 = vpop.eup %5116  ;;  %5136 = verf.f32 %v462_v22  ;;  %v515_v51 = vadd.f32 1.0, %v5115_v49  ;;  %v5455_v4 = vmul.f32 %v513_v46, %v5392_v28  ;;  %v424_v28 = vmul.f32 0.5, %v5352_v54 }
  0x4a   : > { %v5119_v52 = vpop.eup %5118  ;;  %5138 = verf.f32 %v463_v23  ;;  %v516_v7 = vadd.f32 1.0, %v5117_v61  ;;  %v5459_v11 = vmul.f32 %v514_v50, %v5394_v31  ;;  %v425_v31 = vmul.f32 0.5, %v5354_v55 }
  0x4b   : > { %v5121_v53 = vpop.eup %5120  ;;  %5140 = verf.f32 %v464_v29  ;;  %v517_v12 = vadd.f32 1.0, %v5119_v52  ;;  %v5463_v17 = vmul.f32 %v515_v51, %v5396_v32  ;;  %v426_v32 = vmul.f32 0.5, %v5356_v56 }
  0x4c   : > { %v5123_v24 = vpop.eup %5122  ;;  %5142 = verf.f32 %v465_v19  ;;  %v518_v13 = vadd.f32 1.0, %v5121_v53  ;;  %v5467_v26 = vmul.f32 %v516_v7, %v5398_v35  ;;  %v427_v35 = vmul.f32 0.5, %v5358_v57 }
  0x4d   : > { %v5125_v30 = vpop.eup %5124  ;;  %5144 = verf.f32 %v466_v21  ;;  %v519_v15 = vadd.f32 1.0, %v5123_v24  ;;  %v5471_v34 = vmul.f32 %v517_v12, %v5401_v36  ;;  %v428_v36 = vmul.f32 0.5, %v5360_v58 }
  0x4e   : > { %v5127_v16 = vpop.eup %5126  ;;  %5146 = verf.f32 %v467_v25  ;;  %v520_v37 = vadd.f32 1.0, %v5125_v30  ;;  %v5475_v54 = vmul.f32 %v518_v13, %v5404_v39  ;;  %v429_v43 = vmul.f32 0.5, %v5362_v62 }
  0x4f   : > { %v5129_v40 = vpop.eup %5128  ;;  %5148 = verf.f32 %v468_v27  ;;  %v521_v22 = vadd.f32 1.0, %v5127_v16  ;;  %v5479_v55 = vmul.f32 %v519_v15, %v5407_v18  ;;  %v430_v57 = vmul.f32 0.5, %v5364_v63 }
  0x50   : > { %v5131_v41 = vpop.eup %5130  ;;  %v522_v42 = vadd.f32 1.0, %v5129_v40  ;;  %v5482_v23 = vmul.f32 %v520_v37, %v424_v28  ;;  %v431_v19 = vmul.f32 0.5, %v5366_v0  ;;  %v432_v21 = vmul.f32 0.5, %v5368_v2 }
  0x51   : > { %v5133_v56 = vpop.eup %5132  ;;  %v523_v45 = vadd.f32 1.0, %v5131_v41  ;;  %v5485_v39 = vmul.f32 %v521_v22, %v425_v31  ;;  %v433_v25 = vmul.f32 0.5, %v5370_v3  ;;  %v434_v27 = vmul.f32 0.5, %v5372_v5 }
  0x52   : > { %v5135_v29 = vpop.eup %5134  ;;  %v524_v46 = vadd.f32 1.0, %v5133_v56  ;;  %v5488_v49 = vmul.f32 %v522_v42, %v426_v32  ;;  %v435_v28 = vmul.f32 0.5, %v5374_v6  ;;  %v436_v31 = vmul.f32 0.5, %v5376_v8 }
  0x53   : > { %v5137_v18 = vpop.eup %5136  ;;  %v525_v50 = vadd.f32 1.0, %v5135_v29  ;;  %v5491_v58 = vmul.f32 %v523_v45, %v427_v35  ;;  %v5252_v6 = vmov (!%p3710_p4), 0.0  }
  0x54   : > { %v5139_v61 = vpop.eup %5138  ;;  %v526_v51 = vadd.f32 1.0, %v5137_v18  ;;  %v5494_v62 = vmul.f32 %v524_v46, %v428_v36  ;;  %569 = vst [vmem:[#allocation2] sm:$0xff] (!%p3710_p4), %v5252_v6  ;;  %570 = vst [vmem:[#allocation2 + $0x8] sm:$0xff] (!%p3710_p4), %v5252_v6 }
  0x55   : > { %v5141_v52 = vpop.eup %5140  ;;  %v527_v7 = vadd.f32 1.0, %v5139_v61  ;;  %v5497_v63 = vmul.f32 %v525_v50, %v429_v43  ;;  %571 = vst [vmem:[#allocation2 + $0x10] sm:$0xff] (!%p3710_p4), %v5252_v6  ;;  %572 = vst [vmem:[#allocation2 + $0x18] sm:$0xff] (!%p3710_p4), %v5252_v6 }
  0x56   : > { %v5143_v53 = vpop.eup %5142  ;;  %v528_v12 = vadd.f32 1.0, %v5141_v52  ;;  %v5500_v0 = vmul.f32 %v526_v51, %v430_v57  ;;  %568 = sbr.rel (%p3710_p4) target bundleno = 120 (0x78), region = 44  ;;  %573 = vst [vmem:[#allocation2 + $0x20] sm:$0xff] (!%p3710_p4), %v5252_v6  ;;  %574 = vst [vmem:[#allocation2 + $0x28] sm:$0xff] (!%p3710_p4), %v5252_v6 }
  0x57   : > { %v5145_v24 = vpop.eup %5144  ;;  %v529_v13 = vadd.f32 1.0, %v5143_v53  ;;  %v5503_v2 = vmul.f32 %v527_v7, %v431_v19  ;;  %575 = vst [vmem:[#allocation2 + $0x30] sm:$0xff] (!%p3710_p4), %v5252_v6  ;;  %576 = vst [vmem:[#allocation2 + $0x38] sm:$0xff] (!%p3710_p4), %v5252_v6 }
  0x58   : > { %v5147_v30 = vpop.eup %5146  ;;  %v530_v15 = vadd.f32 1.0, %v5145_v24  ;;  %v5506_v3 = vmul.f32 %v528_v12, %v432_v21  ;;  %577 = vst [vmem:[#allocation2 + $0x40] sm:$0xff] (!%p3710_p4), %v5252_v6  ;;  %578 = vst [vmem:[#allocation2 + $0x48] sm:$0xff] (!%p3710_p4), %v5252_v6 }
  0x59   : > { %v5149_v16 = vpop.eup %5148  ;;  %v531_v32 = vadd.f32 1.0, %v5147_v30  ;;  %v5508_v37 = vmul.f32 %v529_v13, %v433_v25  ;;  %579 = vst [vmem:[#allocation2 + $0x50] sm:$0xff] (!%p3710_p4), %v5252_v6  ;;  %580 = vst [vmem:[#allocation2 + $0x58] sm:$0xff] (!%p3710_p4), %v5252_v6 }
  0x5a   : > { %v532_v5 = vadd.f32 1.0, %v5149_v16  ;;  %v5510_v40 = vmul.f32 %v530_v15, %v434_v27  ;;  %581 = vst [vmem:[#allocation2 + $0x60] sm:$0xff] (!%p3710_p4), %v5252_v6  ;;  %582 = vst [vmem:[#allocation2 + $0x68] sm:$0xff] (!%p3710_p4), %v5252_v6 }
  0x5b   : > { %v5512_v35 = vmul.f32 %v531_v32, %v435_v28  ;;  %583 = vst [vmem:[#allocation2 + $0x70] sm:$0xff] (!%p3710_p4), %v5252_v6  ;;  %584 = vst [vmem:[#allocation2 + $0x78] sm:$0xff] (!%p3710_p4), %v5252_v6 }
  0x5c   : > { %v5514_v22 = vmul.f32 %v532_v5, %v436_v31  ;;  %585 = vst [vmem:[#allocation2 + $0x80] sm:$0xff] (!%p3710_p4), %v5252_v6  ;;  %586 = vst [vmem:[#allocation2 + $0x88] sm:$0xff] (!%p3710_p4), %v5252_v6 }
  0x5d   : > { %587 = vst [vmem:[#allocation2 + $0x90] sm:$0xff] %v5252_v6  ;;  %588 = vst [vmem:[#allocation2 + $0x98] sm:$0xff] %v5252_v6 }
  0x5e   : > { %589 = vst [vmem:[#allocation2 + $0xa0] sm:$0xff] %v5252_v6  ;;  %590 = vst [vmem:[#allocation2 + $0xa8] sm:$0xff] %v5252_v6 }
  0x5f   : > { %591 = vst [vmem:[#allocation2 + $0xb0] sm:$0xff] %v5252_v6  ;;  %592 = vst [vmem:[#allocation2 + $0xb8] sm:$0xff] %v5252_v6 }
  0x60   : > { %593 = vst [vmem:[#allocation2 + $0xc0] sm:$0xff] %v5252_v6  ;;  %594 = vst [vmem:[#allocation2 + $0xc8] sm:$0xff] %v5252_v6 }
  0x61   : > { %595 = vst [vmem:[#allocation2 + $0xd0] sm:$0xff] %v5252_v6  ;;  %596 = vst [vmem:[#allocation2 + $0xd8] sm:$0xff] %v5252_v6 }
  0x62   : > { %597 = vst [vmem:[#allocation2 + $0xe0] sm:$0xff] %v5252_v6  ;;  %598 = vst [vmem:[#allocation2 + $0xe8] sm:$0xff] %v5252_v6 }
  0x63   : > { %599 = vst [vmem:[#allocation2 + $0xf0] sm:$0xff] %v5252_v6  ;;  %600 = vst [vmem:[#allocation2 + $0xf8] sm:$0xff] %v5252_v6 }
  0x64   : > { %601 = vst [vmem:[#allocation2 + $0x100] sm:$0xff] %v5252_v6  ;;  %602 = vst [vmem:[#allocation2 + $0x108] sm:$0xff] %v5252_v6 }
  0x65   : > { %603 = vst [vmem:[#allocation2 + $0x110] sm:$0xff] %v5252_v6  ;;  %604 = vst [vmem:[#allocation2 + $0x118] sm:$0xff] %v5252_v6 }
  0x66   : > { %605 = vst [vmem:[#allocation2 + $0x120] sm:$0xff] %v5252_v6  ;;  %606 = vst [vmem:[#allocation2 + $0x128] sm:$0xff] %v5252_v6 }
  0x67   : > { %607 = vst [vmem:[#allocation2 + $0x130] sm:$0xff] %v5252_v6  ;;  %608 = vst [vmem:[#allocation2 + $0x138] sm:$0xff] %v5252_v6 }
  0x68   : > { %609 = vst [vmem:[#allocation2 + $0x140] sm:$0xff] %v5252_v6  ;;  %610 = vst [vmem:[#allocation2 + $0x148] sm:$0xff] %v5252_v6 }
  0x69   : > { %611 = vst [vmem:[#allocation2 + $0x150] sm:$0xff] %v5252_v6  ;;  %612 = vst [vmem:[#allocation2 + $0x158] sm:$0xff] %v5252_v6 }
  0x6a   : > { %613 = vst [vmem:[#allocation2 + $0x160] sm:$0xff] %v5252_v6  ;;  %614 = vst [vmem:[#allocation2 + $0x168] sm:$0xff] %v5252_v6 }
  0x6b   : > { %615 = vst [vmem:[#allocation2 + $0x170] sm:$0xff] %v5252_v6  ;;  %616 = vst [vmem:[#allocation2 + $0x178] sm:$0xff] %v5252_v6 }
  0x6c   : > { %617 = vst [vmem:[#allocation2 + $0x180] sm:$0xff] %v5252_v6  ;;  %618 = vst [vmem:[#allocation2 + $0x188] sm:$0xff] %v5252_v6 }
  0x6d   : > { %619 = vst [vmem:[#allocation2 + $0x190] sm:$0xff] %v5252_v6  ;;  %620 = vst [vmem:[#allocation2 + $0x198] sm:$0xff] %v5252_v6 }
  0x6e   : > { %621 = vst [vmem:[#allocation2 + $0x1a0] sm:$0xff] %v5252_v6  ;;  %622 = vst [vmem:[#allocation2 + $0x1a8] sm:$0xff] %v5252_v6 }
  0x6f   : > { %623 = vst [vmem:[#allocation2 + $0x1b0] sm:$0xff] %v5252_v6  ;;  %624 = vst [vmem:[#allocation2 + $0x1b8] sm:$0xff] %v5252_v6 }
  0x70   : > { %625 = vst [vmem:[#allocation2 + $0x1c0] sm:$0xff] %v5252_v6  ;;  %626 = vst [vmem:[#allocation2 + $0x1c8] sm:$0xff] %v5252_v6 }
  0x71   : > { %627 = vst [vmem:[#allocation2 + $0x1d0] sm:$0xff] %v5252_v6  ;;  %628 = vst [vmem:[#allocation2 + $0x1d8] sm:$0xff] %v5252_v6 }
  0x72   : > { %629 = vst [vmem:[#allocation2 + $0x1e0] sm:$0xff] %v5252_v6  ;;  %630 = vst [vmem:[#allocation2 + $0x1e8] sm:$0xff] %v5252_v6 }
  0x73   : > { %631 = vst [vmem:[#allocation2 + $0x1f0] sm:$0xff] %v5252_v6  ;;  %632 = vst [vmem:[#allocation2 + $0x1f8] sm:$0xff] %v5252_v6 }
  0x74   : > { %633 = vst [vmem:[#allocation2 + $0x200] sm:$0xff] %v5252_v6  ;;  %634 = vst [vmem:[#allocation2 + $0x208] sm:$0xff] %v5252_v6 }
  0x75   : > { %635 = vst [vmem:[#allocation2 + $0x210] sm:$0xff] %v5252_v6  ;;  %636 = vst [vmem:[#allocation2 + $0x218] sm:$0xff] %v5252_v6 }
  0x76   : > { %637 = vst [vmem:[#allocation2 + $0x220] sm:$0xff] %v5252_v6  ;;  %638 = vst [vmem:[#allocation2 + $0x228] sm:$0xff] %v5252_v6 }
  0x77   : > { %639 = vst [vmem:[#allocation2 + $0x230] sm:$0xff] %v5252_v6  ;;  %640 = vst [vmem:[#allocation2 + $0x238] sm:$0xff] %v5252_v6 }
  0x78 PF: > { %v5150_v8 = vld [vmem:[%s6287_s4 + $0x40] sm:$0xff]   ;;  %642 = vst [vmem:[#allocation2 + $0x28] sm:$0xff] %v5411_v47  ;;  %643 = vst [vmem:[#allocation2 + $0x30] sm:$0xff] %v5414_v59  ;;  %v5598_v41 = vpack.c.bf16 %v5414_v59, %v5411_v47  ;;  %v5152_v59 = vld [vmem:[%s6287_s4 + $0x48] sm:$0xff]   ;;  %v1866_v27 = vpack.c.bf16 %v5420_v10, %v5417_v1  ;;  %v1867_v24 = vpack.c.bf16 %v5427_v20, %v5423_v14 }
  0x79   : > { %644 = vst [vmem:[#allocation2 + $0x48] sm:$0xff] %v5417_v1  ;;  %645 = vst [vmem:[#allocation2 + $0x50] sm:$0xff] %v5420_v10  ;;  %v5151_v47 = vld [vmem:[%s6287_s4 + $0x100] sm:$0xff]   ;;  %4370 = vmatprep.subr.bf16.mxu1 %v5150_v8  ;;  %v5153_v36 = vld [vmem:[%s6287_s4 + $0x108] sm:$0xff]   ;;  %v1872_v16 = vpack.c.bf16 %v5467_v26, %v5463_v17 }
  0x7a   : > { %646 = vst [vmem:[#allocation2 + $0x68] sm:$0xff] %v5423_v14  ;;  %647 = vst [vmem:[#allocation2 + $0x70] sm:$0xff] %v5427_v20  ;;  %4578 = vmatprep.mubr.bf16.mxu0 %v5598_v41  ;;  %4562 = vmatprep.subr.bf16.mxu0 %v5151_v47  ;;  %v5154_v42 = vld [vmem:[%s6287_s4 + $0x50] sm:$0xff]   ;;  %v5156_v43 = vld [vmem:[%s6287_s4 + $0x58] sm:$0xff]   ;;  %v1868_v14 = vpack.c.bf16 %v5435_v38, %v5431_v33  ;;  %v1869_v20 = vpack.c.bf16 %v5443_v44, %v5439_v9 }
  0x7b   : > { %648 = vst [vmem:[#allocation2 + $0x88] sm:$0xff] %v5431_v33  ;;  %649 = vst [vmem:[#allocation2 + $0x90] sm:$0xff] %v5435_v38  ;;  %4371 = vmatpush3.bf16.msra.mxu1 %v5150_v8  ;;  %4563 = vmatpush3.bf16.msra.mxu0 %v5151_v47  ;;  %v5155_v56 = vld [vmem:[%s6287_s4 + $0x110] sm:$0xff]   ;;  %v5157_v45 = vld [vmem:[%s6287_s4 + $0x118] sm:$0xff]  }
  0x7c   : > { %650 = vst [vmem:[#allocation2 + $0xa8] sm:$0xff] %v5439_v9  ;;  %651 = vst [vmem:[#allocation2 + $0xb0] sm:$0xff] %v5443_v44  ;;  %4372 = vmatprep.subr.bf16.mxu1 %v5152_v59  ;;  %4564 = vmatprep.subr.bf16.mxu0 %v5153_v36  ;;  %v5158_v29 = vld [vmem:[%s6287_s4 + $0x60] sm:$0xff]   ;;  %v5160_v46 = vld [vmem:[%s6287_s4 + $0x68] sm:$0xff]   ;;  %v1870_v9 = vpack.c.bf16 %v5451_v60, %v5447_v48  ;;  %v1871_v44 = vpack.c.bf16 %v5459_v11, %v5455_v4 }
  0x7d   : > { %652 = vst [vmem:[#allocation2 + $0xc8] sm:$0xff] %v5447_v48  ;;  %653 = vst [vmem:[#allocation2 + $0xd0] sm:$0xff] %v5451_v60  ;;  %v5159_v57 = vld [vmem:[%s6287_s4 + $0x120] sm:$0xff]   ;;  %v738_v18 = vld [vmem:[#allocation2 + $0x8] sm:$0xff] }
  0x7e   : > { %654 = vst [vmem:[#allocation2 + $0xe8] sm:$0xff] %v5455_v4  ;;  %655 = vst [vmem:[#allocation2 + $0xf0] sm:$0xff] %v5459_v11  ;;  %v739_v19 = vld [vmem:[#allocation2 + $0x10] sm:$0xff]  ;;  %v5161_v50 = vld [vmem:[%s6287_s4 + $0x128] sm:$0xff]  }
  0x7f   : > { %656 = vst [vmem:[#allocation2 + $0x108] sm:$0xff] %v5463_v17  ;;  %657 = vst [vmem:[#allocation2 + $0x110] sm:$0xff] %v5467_v26  ;;  %4373 = vmatpush3.bf16.msra.mxu1 %v5152_v59  ;;  %4565 = vmatpush3.bf16.msra.mxu0 %v5153_v36  ;;  %v770_v61 = vpack.c.bf16 %v739_v19, %v738_v18  ;;  %v5162_v21 = vld [vmem:[%s6287_s4 + $0x70] sm:$0xff]   ;;  %v5164_v52 = vld [vmem:[%s6287_s4 + $0x78] sm:$0xff]   ;;  %v780_v36 = vpack.c.bf16 %v5482_v23, %v5479_v55 }
  0x80   : > { %658 = vst [vmem:[#allocation2 + $0x128] sm:$0xff] %v5471_v34  ;;  %659 = vst [vmem:[#allocation2 + $0x130] sm:$0xff] %v5475_v54  ;;  %4374 = vmatprep.subr.bf16.mxu1 %v5154_v42  ;;  %4566 = vmatprep.subr.bf16.mxu0 %v5155_v56  ;;  %v5163_v51 = vld [vmem:[%s6287_s4 + $0x130] sm:$0xff]   ;;  %v5165_v25 = vld [vmem:[%s6287_s4 + $0x138] sm:$0xff]  }
  0x81   : > { %660 = vst [vmem:[#allocation2 + $0x148] sm:$0xff] %v5479_v55  ;;  %661 = vst [vmem:[#allocation2 + $0x150] sm:$0xff] %v5482_v23  ;;  %4386 = vmatprep.mubr.bf16.mxu1 %v770_v61  ;;  %v5166_v7 = vld [vmem:[%s6287_s4] sm:$0xff]   ;;  %v5168_v12 = vld [vmem:[%s6287_s4 + $0x148] sm:$0xff]  }
  0x82   : > { %662 = vst [vmem:[#allocation2 + $0x168] sm:$0xff] %v5485_v39  ;;  %663 = vst [vmem:[#allocation2 + $0x170] sm:$0xff] %v5488_v49  ;;  %v5167_v53 = vld [vmem:[%s6287_s4 + $0x140] sm:$0xff]   ;;  %v5169_v28 = vld [vmem:[%s6287_s4 + $0x8] sm:$0xff]  }
  0x83   : > { %664 = vst [vmem:[#allocation2 + $0x188] sm:$0xff] %v5491_v58  ;;  %665 = vst [vmem:[#allocation2 + $0x190] sm:$0xff] %v5494_v62  ;;  %4375 = vmatpush3.bf16.msra.mxu1 %v5154_v42  ;;  %4567 = vmatpush3.bf16.msra.mxu0 %v5155_v56  ;;  %v5172_v1 = vld [vmem:[%s6287_s4 + $0x10] sm:$0xff]   ;;  %v5171_v13 = vld [vmem:[%s6287_s4 + $0x158] sm:$0xff]  }
  0x84   : > { %666 = vst [vmem:[#allocation2 + $0x1a8] sm:$0xff] %v5497_v63  ;;  %667 = vst [vmem:[#allocation2 + $0x1b0] sm:$0xff] %v5500_v0  ;;  %4376 = vmatprep.subr.bf16.mxu1 %v5156_v43  ;;  %4568 = vmatprep.subr.bf16.mxu0 %v5157_v45  ;;  %v5170_v10 = vld [vmem:[%s6287_s4 + $0x150] sm:$0xff]   ;;  %v5175_v30 = vld [vmem:[%s6287_s4 + $0x18] sm:$0xff]  }
  0x85   : > { %668 = vst [vmem:[#allocation2 + $0x1c8] sm:$0xff] %v5503_v2  ;;  %669 = vst [vmem:[#allocation2 + $0x1d0] sm:$0xff] %v5506_v3  ;;  %v5173_v33 = vld [vmem:[%s6287_s4 + $0x160] sm:$0xff]   ;;  %v5174_v31 = vld [vmem:[%s6287_s4 + $0x168] sm:$0xff]  }
  0x86   : > { %670 = vst [vmem:[#allocation2 + $0x1e8] sm:$0xff] %v5508_v37  ;;  %671 = vst [vmem:[#allocation2 + $0x1f0] sm:$0xff] %v5510_v40  ;;  %v5178_v38 = vld [vmem:[%s6287_s4 + $0x20] sm:$0xff]   ;;  %v5180_v15 = vld [vmem:[%s6287_s4 + $0x28] sm:$0xff]  }
  0x87   : > { %672 = vst [vmem:[#allocation2 + $0x208] sm:$0xff] %v5512_v35  ;;  %673 = vst [vmem:[#allocation2 + $0x210] sm:$0xff] %v5514_v22  ;;  %4377 = vmatpush3.bf16.msra.mxu1 %v5156_v43  ;;  %4569 = vmatpush3.bf16.msra.mxu0 %v5157_v45  ;;  %v5176_v48 = vld [vmem:[%s6287_s4 + $0x170] sm:$0xff]   ;;  %v5177_v5 = vld [vmem:[%s6287_s4 + $0x178] sm:$0xff]   ;;  %v781_v45 = vpack.c.bf16 %v5488_v49, %v5485_v39 }
  0x88   : > { %4378 = vmatprep.subr.bf16.mxu1 %v5158_v29  ;;  %4570 = vmatprep.subr.bf16.mxu0 %v5159_v57  ;;  %v2139_v60 = vld [vmem:[#allocation2 + $0x29] sm:$0xff]  ;;  %v2140_v4 = vld [vmem:[#allocation2 + $0x31] sm:$0xff]  ;;  %v5179_v22 = vld [vmem:[%s6287_s4 + $0x180] sm:$0xff]  }
  0x89   : > { %v5182_v11 = vld [vmem:[%s6287_s4 + $0x30] sm:$0xff]   ;;  %v5733_v32 = vpack.c.bf16 %v2140_v4, %v2139_v60  ;;  %v5184_v35 = vld [vmem:[%s6287_s4 + $0x38] sm:$0xff]   ;;  %v5750_v47 = vld [vmem:[%s6287_s4 + $0x80] sm:$0xff]  }
  0x8a   : > { %v2141_v17 = vld [vmem:[#allocation2 + $0x49] sm:$0xff]  ;;  %v2142_v26 = vld [vmem:[#allocation2 + $0x51] sm:$0xff] }
  0x8b   : > { %4379 = vmatpush3.bf16.msra.mxu1 %v5158_v29  ;;  %4571 = vmatpush3.bf16.msra.mxu0 %v5159_v57  ;;  %v2143_v6 = vld [vmem:[#allocation2 + $0x69] sm:$0xff]  ;;  %v2144_v8 = vld [vmem:[#allocation2 + $0x71] sm:$0xff]  ;;  %v5752_v59 = vpack.c.bf16 %v2142_v26, %v2141_v17  ;;  %v782_v57 = vpack.c.bf16 %v5494_v62, %v5491_v58  ;;  %v5187_v58 = vld [vmem:[%s6287_s4 + $0x1a0] sm:$0xff]   ;;  %v783_v62 = vpack.c.bf16 %v5500_v0, %v5497_v63 }
  0x8c   : > { %4380 = vmatprep.subr.bf16.mxu1 %v5160_v46  ;;  %4572 = vmatprep.subr.bf16.mxu0 %v5161_v50  ;;  %v5756_v42 = vpack.c.bf16 %v2144_v8, %v2143_v6  ;;  %v5181_v56 = vld [vmem:[%s6287_s4 + $0x188] sm:$0xff]   ;;  %v2148_v23 = vld [vmem:[#allocation2 + $0xb1] sm:$0xff] }
  0x8d   : > { %v2147_v55 = vld [vmem:[#allocation2 + $0xa9] sm:$0xff]  ;;  %v5185_v18 = vld [vmem:[%s6287_s4 + $0x198] sm:$0xff]  }
  0x8e   : > { %v5183_v43 = vld [vmem:[%s6287_s4 + $0x190] sm:$0xff]   ;;  %v674_v63 = vld [vmem:[#allocation2 + $0x7] sm:$0xff] }
  0x8f   : > { %4381 = vmatpush3.bf16.msra.mxu1 %v5160_v46  ;;  %4573 = vmatpush3.bf16.msra.mxu0 %v5161_v50  ;;  %v5773_v46 = vpack.c.bf16 %v2148_v23, %v2147_v55  ;;  %v2149_v19 = vld [vmem:[#allocation2 + $0xc9] sm:$0xff]  ;;  %v2150_v50 = vld [vmem:[#allocation2 + $0xd1] sm:$0xff] }
  0x90   : > { %4382 = vmatprep.subr.bf16.mxu1 %v5162_v21  ;;  %4574 = vmatprep.subr.bf16.mxu0 %v5163_v51  ;;  %v2151_v39 = vld [vmem:[#allocation2 + $0xe9] sm:$0xff]  ;;  %v2152_v49 = vld [vmem:[#allocation2 + $0xf1] sm:$0xff]  ;;  %v5785_v61 = vpack.c.bf16 %v2150_v50, %v2149_v19 }
  0x91   : > { %v675_v0 = vld [vmem:[#allocation2 + $0xf] sm:$0xff]  ;;  %v686_v23 = vld [vmem:[#allocation2 + $0xc7] sm:$0xff] }
  0x92   : > { %v681_v60 = vld [vmem:[#allocation2 + $0x6f] sm:$0xff] }
  0x93   : > { %4383 = vmatpush3.bf16.msra.mxu1 %v5162_v21  ;;  %4575 = vmatpush3.bf16.msra.mxu0 %v5163_v51  ;;  %v784_v21 = vpack.c.bf16 %v5506_v3, %v5503_v2  ;;  %v5789_v51 = vpack.c.bf16 %v2152_v49, %v2151_v39  ;;  %v2156_v2 = vld [vmem:[#allocation2 + $0x131] sm:$0xff]  ;;  %v5188_v4 = vld [vmem:[%s6287_s4 + $0x88] sm:$0xff]  }
  0x94   : > { %4384 = vmatprep.subr.bf16.mxu1 %v5164_v52  ;;  %4576 = vmatprep.subr.bf16.mxu0 %v5165_v25  ;;  %v5191_v3 = vld [vmem:[%s6287_s4 + $0x1b0] sm:$0xff]  }
  0x95   : > { %v5190_v17 = vld [vmem:[%s6287_s4 + $0x90] sm:$0xff]  }
  0x96   : > { %v2163_v26 = vld [vmem:[#allocation2 + $0x1a9] sm:$0xff]  ;;  %v2166_v55 = vld [vmem:[#allocation2 + $0x1d1] sm:$0xff] }
  0x97   : > { %4385 = vmatpush3.bf16.msra.mxu1 %v5164_v52  ;;  %4577 = vmatpush3.bf16.msra.mxu0 %v5165_v25  ;;  %v5189_v52 = vld [vmem:[%s6287_s4 + $0x1a8] sm:$0xff]  }
  0x98   : > { %4418 = vmatprep.subr.bf16.mxu1 %v5166_v7  ;;  %4610 = vmatprep.subr.bf16.mxu0 %v5167_v53  ;;  %v2153_v25 = vld [vmem:[#allocation2 + $0x109] sm:$0xff] }
  0x9a   : > { %4387 = vmatmul.mubr.bf16.vlgmr.msra.gmra.mrb[0].mxu1 %v5598_v41  ;;  %4579 = vmatmul.mubr.bf16.vlgmr.msra.gmra.mrb[0].mxu0 %v1866_v27  ;;  %v779_v41 = vpack.c.bf16 %v5475_v54, %v5471_v34  ;;  %v2145_v34 = vld [vmem:[#allocation2 + $0x89] sm:$0xff]  ;;  %v2146_v54 = vld [vmem:[#allocation2 + $0x91] sm:$0xff] }
  0x9b   : > { %4419 = vmatpush3.bf16.msra.mxu1 %v5166_v7  ;;  %4611 = vmatpush3.bf16.msra.mxu0 %v5167_v53  ;;  %v5769_v29 = vpack.c.bf16 %v2146_v54, %v2145_v34  ;;  %v2154_v7 = vld [vmem:[#allocation2 + $0x111] sm:$0xff]  ;;  %v2155_v53 = vld [vmem:[#allocation2 + $0x129] sm:$0xff] }
  0x9c   : > { %4390 = vmatprep.mubr.bf16.mxu1 %v1866_v27  ;;  %4612 = vmatprep.subr.bf16.mxu0 %v5168_v12  ;;  %v785_v27 = vpack.c.bf16 %v5510_v40, %v5508_v37  ;;  %v678_v37 = vld [vmem:[#allocation2 + $0x47] sm:$0xff]  ;;  %v679_v40 = vld [vmem:[#allocation2 + $0x4f] sm:$0xff] }
  0x9d   : > { %4582 = vmatprep.mubr.bf16.mxu0 %v1867_v24  ;;  %4420 = vmatprep.subr.bf16.mxu1 %v5169_v28  ;;  %v685_v34 = vld [vmem:[#allocation2 + $0xaf] sm:$0xff] }
  0x9e   : > { %v2165_v54 = vld [vmem:[#allocation2 + $0x1c9] sm:$0xff] }
  0x9f   : > { %4421 = vmatpush3.bf16.msra.mxu1 %v5169_v28  ;;  %4613 = vmatpush3.bf16.msra.mxu0 %v5168_v12  ;;  %v5801_v12 = vpack.c.bf16 %v2154_v7, %v2153_v25  ;;  %v5803_v28 = vpack.c.bf16 %v2156_v2, %v2155_v53  ;;  %v5855_v50 = vpack.c.bf16 %v2166_v55, %v2165_v54  ;;  %v2170_v25 = vld [vmem:[#allocation2 + $0x211] sm:$0xff]  ;;  %v690_v7 = vld [vmem:[#allocation2 + $0x107] sm:$0xff] }
  0xa0   : > { %4422 = vmatprep.subr.bf16.mxu1 %v5172_v1  ;;  %4614 = vmatprep.subr.bf16.mxu0 %v5170_v10  ;;  %v704_v54 = vld [vmem:[#allocation2 + $0x1e7] sm:$0xff]  ;;  %v705_v55 = vld [vmem:[#allocation2 + $0x1ef] sm:$0xff] }
  0xa2   : > { %4391 = vmatmul.mubr.bf16.gmra.mrb[4].mxu1 %v1867_v24  ;;  %4583 = vmatmul.mubr.bf16.gmra.mrb[4].mxu0 %v1868_v14  ;;  %v706_v24 = vpack.c.bf16 %v675_v0, %v674_v63  ;;  %v691_v63 = vld [vmem:[#allocation2 + $0x10f] sm:$0xff] }
  0xa3   : > { %4394 = vmatprep.mubr.bf16.mxu1 %v1868_v14  ;;  %4615 = vmatpush3.bf16.msra.mxu0 %v5170_v10  ;;  %v677_v10 = vld [vmem:[#allocation2 + $0x2f] sm:$0xff]  ;;  %v5193_v14 = vld [vmem:[%s6287_s4 + $0x1b8] sm:$0xff]  }
  0xa4   : > { %4586 = vmatprep.mubr.bf16.mxu0 %v1869_v20  ;;  %4616 = vmatprep.subr.bf16.mxu0 %v5171_v13  ;;  %v5198_v0 = vld [vmem:[%s6287_s4 + $0xb0] sm:$0xff]  }
  0xa5   : > { %4423 = vmatpush3.bf16.msra.mxu1 %v5172_v1  ;;  %v676_v1 = vld [vmem:[#allocation2 + $0x27] sm:$0xff] }
  0xa6   : > { %4424 = vmatprep.subr.bf16.mxu1 %v5175_v30 }
  0xa7   : > { %4617 = vmatpush3.bf16.msra.mxu0 %v5171_v13  ;;  %v2158_v13 = vld [vmem:[#allocation2 + $0x151] sm:$0xff] }
  0xa8   : > { %4618 = vmatprep.subr.bf16.mxu0 %v5173_v33 }
  0xa9   : > { %4425 = vmatpush3.bf16.msra.mxu1 %v5175_v30  ;;  %v2159_v30 = vld [vmem:[#allocation2 + $0x169] sm:$0xff] }
  0xaa   : > { %4395 = vmatmul.mubr.bf16.gmra.mrb[8].mxu1 %v1869_v20  ;;  %4426 = vmatprep.subr.bf16.mxu1 %v5178_v38  ;;  %v2157_v20 = vld [vmem:[#allocation2 + $0x149] sm:$0xff] }
  0xab   : > { %4587 = vmatmul.mubr.bf16.gmra.mrb[8].mxu0 %v1870_v9  ;;  %4398 = vmatprep.mubr.bf16.mxu1 %v1870_v9  ;;  %v5815_v9 = vpack.c.bf16 %v677_v10, %v676_v1  ;;  %v693_v1 = vld [vmem:[#allocation2 + $0x12f] sm:$0xff]  ;;  %v694_v10 = vld [vmem:[#allocation2 + $0x147] sm:$0xff] }
  0xac   : > { %4619 = vmatpush3.bf16.msra.mxu0 %v5173_v33  ;;  %4590 = vmatprep.mubr.bf16.mxu0 %v1871_v44  ;;  %v2160_v33 = vld [vmem:[#allocation2 + $0x171] sm:$0xff] }
  0xad   : > { %4620 = vmatprep.subr.bf16.mxu0 %v5174_v31  ;;  %4427 = vmatpush3.bf16.msra.mxu1 %v5178_v38  ;;  %v5813_v38 = vld [vmem:[%s6287_s4 + $0x1c0] sm:$0xff]  }
  0xae   : > { %4428 = vmatprep.subr.bf16.mxu1 %v5180_v15 }
  0xb0   : > { %4621 = vmatpush3.bf16.msra.mxu0 %v5174_v31  ;;  %v5819_v31 = vpack.c.bf16 %v679_v40, %v678_v37  ;;  %v5197_v40 = vld [vmem:[%s6287_s4 + $0x1c8] sm:$0xff]  }
  0xb1   : > { %4622 = vmatprep.subr.bf16.mxu0 %v5176_v48  ;;  %4429 = vmatpush3.bf16.msra.mxu1 %v5180_v15  ;;  %v5821_v15 = vpack.c.bf16 %v2160_v33, %v2159_v30  ;;  %v696_v30 = vld [vmem:[#allocation2 + $0x167] sm:$0xff]  ;;  %v697_v33 = vld [vmem:[#allocation2 + $0x16f] sm:$0xff] }
  0xb2   : > { %4399 = vmatmul.mubr.bf16.gmra.mrb[12].mxu1 %v1871_v44  ;;  %4430 = vmatprep.subr.bf16.mxu1 %v5182_v11  ;;  %v5817_v44 = vpack.c.bf16 %v2158_v13, %v2157_v20  ;;  %v5884_v20 = vld [vmem:[%s6287_s4 + $0xc0] sm:$0xff]  }
  0xb3   : > { %4591 = vmatmul.mubr.bf16.gmra.mrb[12].mxu0 %v1872_v16  ;;  %4402 = vmatprep.mubr.bf16.mxu1 %v1872_v16  ;;  %v2162_v16 = vld [vmem:[#allocation2 + $0x191] sm:$0xff] }
  0xb4   : > { %4623 = vmatpush3.bf16.msra.mxu0 %v5176_v48  ;;  %4626 = vmatprep.mubr.bf16.mxu0 %v5733_v32  ;;  %v680_v48 = vld [vmem:[#allocation2 + $0x67] sm:$0xff] }
  0xb5   : > { %4624 = vmatprep.subr.bf16.mxu0 %v5177_v5  ;;  %4431 = vmatpush3.bf16.msra.mxu1 %v5182_v11  ;;  %v2161_v11 = vld [vmem:[#allocation2 + $0x189] sm:$0xff]  ;;  %v5835_v6 = vpack.c.bf16 %v681_v60, %v680_v48 }
  0xb6   : > { %4432 = vmatprep.subr.bf16.mxu1 %v5184_v35  ;;  %v5837_v8 = vpack.c.bf16 %v2162_v16, %v2161_v11  ;;  %v698_v48 = vld [vmem:[#allocation2 + $0x187] sm:$0xff]  ;;  %v699_v60 = vld [vmem:[#allocation2 + $0x18f] sm:$0xff]  ;;  %v5902_v11 = vpack.c.bf16 %v697_v33, %v696_v30 }
  0xb7   : > { %v5904_v16 = vpack.c.bf16 %v699_v60, %v698_v48  ;;  %v5213_v48 = vld [vmem:[%s6287_s4 + $0x208] sm:$0xff]   ;;  %v2759_v60 = vld [vmem:[#allocation2 + $0xb0] sm:$0xff] }
  0xb8   : > { %4625 = vmatpush3.bf16.msra.mxu0 %v5177_v5  ;;  %v682_v5 = vld [vmem:[#allocation2 + $0x87] sm:$0xff] }
  0xb9   : > { %4658 = vmatprep.subr.bf16.mxu0 %v5179_v22  ;;  %4433 = vmatpush3.bf16.msra.mxu1 %v5184_v35  ;;  %v683_v35 = vld [vmem:[#allocation2 + $0x8f] sm:$0xff] }
  0xba   : > { %4403 = vmatmul.mubr.bf16.gmra.mrb[16].mxu1 %v779_v41  ;;  %4466 = vmatprep.subr.bf16.mxu1 %v5750_v47  ;;  %v5839_v41 = vpack.c.bf16 %v683_v35, %v682_v5  ;;  %v5201_v5 = vld [vmem:[%s6287_s4 + $0x1d8] sm:$0xff]   ;;  %v701_v35 = vld [vmem:[#allocation2 + $0x1af] sm:$0xff] }
  0xbb   : > { %4627 = vmatmul.mubr.bf16.vlgmr.msra.gmra.mrb[0].mxu0 %v5752_v59  ;;  %4406 = vmatprep.mubr.bf16.mxu1 %v780_v36  ;;  %v5192_v36 = vld [vmem:[%s6287_s4 + $0x98] sm:$0xff]  }
  0xbc   : > { %4659 = vmatpush3.bf16.msra.mxu0 %v5179_v22  ;;  %4630 = vmatprep.mubr.bf16.mxu0 %v5756_v42  ;;  %v2164_v22 = vld [vmem:[#allocation2 + $0x1b1] sm:$0xff] }
  0xbd   : > { %4660 = vmatprep.subr.bf16.mxu0 %v5181_v56 }
  0xc0   : > { %4661 = vmatpush3.bf16.msra.mxu0 %v5181_v56  ;;  %v684_v56 = vld [vmem:[#allocation2 + $0xa7] sm:$0xff] }
  0xc1   : > { %4662 = vmatprep.subr.bf16.mxu0 %v5183_v43  ;;  %v5853_v19 = vpack.c.bf16 %v685_v34, %v684_v56  ;;  %v5205_v34 = vld [vmem:[%s6287_s4 + $0x1e8] sm:$0xff]  }
  0xc2   : > { %4407 = vmatmul.mubr.bf16.gmra.mrb[20].mxu1 %v781_v45  ;;  %v2167_v45 = vld [vmem:[#allocation2 + $0x1e9] sm:$0xff] }
  0xc3   : > { %4631 = vmatmul.mubr.bf16.gmra.mrb[4].mxu0 %v5769_v29  ;;  %4410 = vmatprep.mubr.bf16.mxu1 %v782_v57  ;;  %v2168_v57 = vld [vmem:[#allocation2 + $0x1f1] sm:$0xff] }
  0xc4   : > { %4634 = vmatprep.mubr.bf16.mxu0 %v5773_v46  ;;  %4663 = vmatpush3.bf16.msra.mxu0 %v5183_v43  ;;  %v687_v43 = vld [vmem:[#allocation2 + $0xcf] sm:$0xff]  ;;  %v5859_v49 = vpack.c.bf16 %v2168_v57, %v2167_v45  ;;  %v5930_v57 = vpack.c.bf16 %v705_v55, %v704_v54  ;;  %v5218_v54 = vld [vmem:[%s6287_s4 + $0x220] sm:$0xff]  }
  0xc5   : > { %4664 = vmatprep.subr.bf16.mxu0 %v5185_v18  ;;  %v5857_v39 = vpack.c.bf16 %v687_v43, %v686_v23  ;;  %v1221_v23 = vld [vmem:[#allocation2 + $0x9] sm:$0xff]  ;;  %v1222_v43 = vld [vmem:[#allocation2 + $0x11] sm:$0xff] }
  0xc6   : > { %v5207_v45 = vld [vmem:[%s6287_s4 + $0x1f0] sm:$0xff]  }
  0xc8   : > { %4665 = vmatpush3.bf16.msra.mxu0 %v5185_v18  ;;  %v5194_v18 = vld [vmem:[%s6287_s4 + $0xa0] sm:$0xff]  }
  0xc9   : > { %4666 = vmatprep.subr.bf16.mxu0 %v5187_v58 }
  0xca   : > { %4411 = vmatmul.mubr.bf16.gmra.mrb[24].mxu1 %v783_v62  ;;  %v688_v62 = vld [vmem:[#allocation2 + $0xe7] sm:$0xff] }
  0xcb   : > { %4635 = vmatmul.mubr.bf16.gmra.mrb[8].mxu0 %v5785_v61  ;;  %4414 = vmatprep.mubr.bf16.mxu1 %v784_v21  ;;  %v689_v21 = vld [vmem:[#allocation2 + $0xef] sm:$0xff] }
  0xcc   : > { %4638 = vmatprep.mubr.bf16.mxu0 %v5789_v51  ;;  %4667 = vmatpush3.bf16.msra.mxu0 %v5187_v58  ;;  %v5196_v58 = vld [vmem:[%s6287_s4 + $0xa8] sm:$0xff]   ;;  %v5871_v53 = vpack.c.bf16 %v689_v21, %v688_v62  ;;  %v5211_v62 = vld [vmem:[%s6287_s4 + $0x200] sm:$0xff]  }
  0xcd   : > { %4668 = vmatprep.subr.bf16.mxu0 %v5189_v52  ;;  %v5204_v21 = vld [vmem:[%s6287_s4 + $0xc8] sm:$0xff]  }
  0xd0   : > { %4669 = vmatpush3.bf16.msra.mxu0 %v5189_v52  ;;  %v2169_v52 = vld [vmem:[#allocation2 + $0x209] sm:$0xff] }
  0xd1   : > { %4670 = vmatprep.subr.bf16.mxu0 %v5191_v3  ;;  %v2186_v2 = vpack.c.bf16 %v2170_v25, %v2169_v52  ;;  %v5206_v52 = vld [vmem:[%s6287_s4 + $0xd0] sm:$0xff]   ;;  %v5208_v25 = vld [vmem:[%s6287_s4 + $0xd8] sm:$0xff]  }
  0xd2   : > { %4415 = vmatmul.mubr.bf16.gmra.mrb[28].mxu1 %v785_v27  ;;  %v5200_v27 = vld [vmem:[%s6287_s4 + $0xb8] sm:$0xff]  }
  0xd3   : > { %4639 = vmatmul.mubr.bf16.gmra.mrb[12].mxu0 %v5801_v12  ;;  %4434 = vmatprep.mubr.bf16.mxu1 %v706_v24  ;;  %v692_v24 = vld [vmem:[#allocation2 + $0x127] sm:$0xff] }
  0xd4   : > { %4642 = vmatprep.mubr.bf16.mxu0 %v5803_v28  ;;  %4671 = vmatpush3.bf16.msra.mxu0 %v5191_v3  ;;  %v5873_v3 = vpack.c.bf16 %v691_v63, %v690_v7  ;;  %v5886_v13 = vpack.c.bf16 %v693_v1, %v692_v24  ;;  %v5210_v7 = vld [vmem:[%s6287_s4 + $0xe0] sm:$0xff]   ;;  %v5214_v24 = vld [vmem:[%s6287_s4 + $0xf0] sm:$0xff]  }
  0xd5   : > { %4672 = vmatprep.subr.bf16.mxu0 %v5193_v14 }
  0xd8   : > { %4673 = vmatpush3.bf16.msra.mxu0 %v5193_v14  ;;  %v695_v14 = vld [vmem:[#allocation2 + $0x14f] sm:$0xff] }
  0xd9   : > { %4706 = vmatprep.subr.bf16.mxu0 %v5813_v38  ;;  %v5888_v37 = vpack.c.bf16 %v695_v14, %v694_v10  ;;  %v2755_v14 = vld [vmem:[#allocation2 + $0x70] sm:$0xff] }
  0xda   : > { %4435 = vmatmul.mubr.bf16.vlgmr.msra.gmra.mrb[0].mxu1 %v5815_v9 }
  0xdb   : > { %4643 = vmatmul.mubr.bf16.gmra.mrb[16].mxu0 %v5817_v44  ;;  %4467 = vmatpush3.bf16.msra.mxu1 %v5750_v47  ;;  %v5841_v47 = vpack.c.bf16 %v2164_v22, %v2163_v26  ;;  %v703_v26 = vld [vmem:[#allocation2 + $0x1cf] sm:$0xff]  ;;  %v5203_v22 = vld [vmem:[%s6287_s4 + $0x1e0] sm:$0xff]  }
  0xdc   : > { %4438 = vmatprep.mubr.bf16.mxu1 %v5819_v31  ;;  %4646 = vmatprep.mubr.bf16.mxu0 %v5821_v15 }
  0xdd   : > { %4468 = vmatprep.subr.bf16.mxu1 %v5188_v4 }
  0xdf   : > { %4469 = vmatpush3.bf16.msra.mxu1 %v5188_v4  ;;  %v5199_v4 = vld [vmem:[%s6287_s4 + $0x1d0] sm:$0xff]  }
  0xe0   : > { %4470 = vmatprep.subr.bf16.mxu1 %v5190_v17 }
  0xe2   : > { %4439 = vmatmul.mubr.bf16.gmra.mrb[4].mxu1 %v5835_v6 }
  0xe3   : > { %4647 = vmatmul.mubr.bf16.gmra.mrb[20].mxu0 %v5837_v8  ;;  %4442 = vmatprep.mubr.bf16.mxu1 %v5839_v41 }
  0xe4   : > { %4650 = vmatprep.mubr.bf16.mxu0 %v5841_v47  ;;  %4471 = vmatpush3.bf16.msra.mxu1 %v5190_v17  ;;  %v702_v17 = vld [vmem:[#allocation2 + $0x1c7] sm:$0xff] }
  0xe5   : > { %4472 = vmatprep.subr.bf16.mxu1 %v5192_v36  ;;  %v5918_v56 = vpack.c.bf16 %v703_v26, %v702_v17  ;;  %v2763_v26 = vld [vmem:[#allocation2 + $0xf0] sm:$0xff] }
  0xe8   : > { %4473 = vmatpush3.bf16.msra.mxu1 %v5192_v36 }
  0xe9   : > { %4474 = vmatprep.subr.bf16.mxu1 %v5194_v18 }
  0xea   : > { %4443 = vmatmul.mubr.bf16.gmra.mrb[8].mxu1 %v5853_v19 }
  0xeb   : > { %4651 = vmatmul.mubr.bf16.gmra.mrb[24].mxu0 %v5855_v50  ;;  %4446 = vmatprep.mubr.bf16.mxu1 %v5857_v39 }
  0xec   : > { %4654 = vmatprep.mubr.bf16.mxu0 %v5859_v49  ;;  %4475 = vmatpush3.bf16.msra.mxu1 %v5194_v18  ;;  %v1253_v18 = vpack.c.bf16 %v1222_v43, %v1221_v23  ;;  %v2767_v43 = vld [vmem:[#allocation2 + $0x130] sm:$0xff] }
  0xed   : > { %4476 = vmatprep.subr.bf16.mxu1 %v5196_v58 }
  0xf0   : > { %4477 = vmatpush3.bf16.msra.mxu1 %v5196_v58  ;;  %v5209_v58 = vld [vmem:[%s6287_s4 + $0x1f8] sm:$0xff]  }
  0xf1   : > { %4478 = vmatprep.subr.bf16.mxu1 %v5198_v0 }
  0xf2   : > { %4447 = vmatmul.mubr.bf16.gmra.mrb[12].mxu1 %v5871_v53 }
  0xf3   : > { %4655 = vmatmul.mubr.bf16.gmra.mrb[28].mxu0 %v2186_v2  ;;  %4450 = vmatprep.mubr.bf16.mxu1 %v5873_v3  ;;  %v2752_v2 = vld [vmem:[#allocation2 + $0x48] sm:$0xff] }
  0xf4   : > { %4674 = vmatprep.mubr.bf16.mxu0 %v5819_v31  ;;  %4479 = vmatpush3.bf16.msra.mxu1 %v5198_v0  ;;  %v2477_v0 = vld [vmem:[#allocation2 + $0x22f] sm:$0xff] }
  0xf5   : > { %4480 = vmatprep.subr.bf16.mxu1 %v5200_v27 }
  0xf8   : > { %4481 = vmatpush3.bf16.msra.mxu1 %v5200_v27  ;;  %v2753_v27 = vld [vmem:[#allocation2 + $0x50] sm:$0xff] }
  0xf9   : > { %4514 = vmatprep.subr.bf16.mxu1 %v5884_v20  ;;  %v2784_v10 = vpack.c.bf16 %v2753_v27, %v2752_v2  ;;  %v5233_v2 = vld [vmem:[#allocation2 + $0x1d0] sm:$0xff] }
  0xfa   : > { %4451 = vmatmul.mubr.bf16.gmra.mrb[16].mxu1 %v5886_v13 }
  0xfb   : > { %4675 = vmatmul.mubr.bf16.vlgmr.msra.gmra.mrb[0].mxu0 %v5835_v6  ;;  %4454 = vmatprep.mubr.bf16.mxu1 %v5888_v37 }
  0xfc   : > { %4707 = vmatpush3.bf16.msra.mxu0 %v5813_v38  ;;  %4678 = vmatprep.mubr.bf16.mxu0 %v5839_v41  ;;  %v700_v38 = vld [vmem:[#allocation2 + $0x1a7] sm:$0xff] }
  0xfd   : > { %4708 = vmatprep.subr.bf16.mxu0 %v5197_v40  ;;  %v5916_v36 = vpack.c.bf16 %v701_v35, %v700_v38  ;;  %v5215_v38 = vld [vmem:[%s6287_s4 + $0x210] sm:$0xff]  }
 0x100   : > { %4709 = vmatpush3.bf16.msra.mxu0 %v5197_v40  ;;  %v2757_v40 = vld [vmem:[#allocation2 + $0x90] sm:$0xff] }
 0x101   : > { %4710 = vmatprep.subr.bf16.mxu0 %v5199_v4 }
 0x102   : > { %4455 = vmatmul.mubr.bf16.gmra.mrb[20].mxu1 %v5902_v11 }
 0x103   : > { %4679 = vmatmul.mubr.bf16.gmra.mrb[4].mxu0 %v5853_v19  ;;  %4458 = vmatprep.mubr.bf16.mxu1 %v5904_v16 }
 0x104   : > { %4682 = vmatprep.mubr.bf16.mxu0 %v5857_v39  ;;  %4711 = vmatpush3.bf16.msra.mxu0 %v5199_v4  ;;  %v2760_v4 = vld [vmem:[#allocation2 + $0xc8] sm:$0xff] }
 0x105   : > { %4712 = vmatprep.subr.bf16.mxu0 %v5201_v5 }
 0x108   : > { %4713 = vmatpush3.bf16.msra.mxu0 %v5201_v5  ;;  %v2761_v5 = vld [vmem:[#allocation2 + $0xd0] sm:$0xff] }
 0x109   : > { %4714 = vmatprep.subr.bf16.mxu0 %v5203_v22  ;;  %v2788_v17 = vpack.c.bf16 %v2761_v5, %v2760_v4  ;;  %v3063_v4 = vld [vmem:[#allocation2 + $0x91] sm:$0xff] }
 0x10a   : > { %4459 = vmatmul.mubr.bf16.gmra.mrb[24].mxu1 %v5916_v36  ;;  %v5243_v5 = vld [vmem:[%s6287_s4 + $0x138] sm:$0xff]  }
 0x10b   : > { %4683 = vmatmul.mubr.bf16.gmra.mrb[8].mxu0 %v5871_v53  ;;  %4462 = vmatprep.mubr.bf16.mxu1 %v5918_v56 }
 0x10c   : > { %4686 = vmatprep.mubr.bf16.mxu0 %v5873_v3  ;;  %4715 = vmatpush3.bf16.msra.mxu0 %v5203_v22  ;;  %v2764_v22 = vld [vmem:[#allocation2 + $0x108] sm:$0xff] }
 0x10d   : > { %4716 = vmatprep.subr.bf16.mxu0 %v5205_v34 }
 0x110   : > { %4717 = vmatpush3.bf16.msra.mxu0 %v5205_v34  ;;  %v2765_v34 = vld [vmem:[#allocation2 + $0x110] sm:$0xff] }
 0x111   : > { %4718 = vmatprep.subr.bf16.mxu0 %v5207_v45  ;;  %v2790_v23 = vpack.c.bf16 %v2765_v34, %v2764_v22  ;;  %v3068_v22 = vld [vmem:[#allocation2 + $0xe9] sm:$0xff]  ;;  %v3069_v34 = vld [vmem:[#allocation2 + $0xf1] sm:$0xff] }
 0x112   : > { %4463 = vmatmul.mubr.bf16.gmra.mrb[28].mxu1 %v5930_v57 }
 0x113   : > { %4687 = vmatmul.mubr.bf16.gmra.mrb[12].mxu0 %v5886_v13  ;;  %4482 = vmatprep.mubr.bf16.mxu1 %v1253_v18 }
 0x114   : > { %4690 = vmatprep.mubr.bf16.mxu0 %v5888_v37  ;;  %4719 = vmatpush3.bf16.msra.mxu0 %v5207_v45  ;;  %v5220_v45 = vld [vmem:[%s6287_s4 + $0x230] sm:$0xff]  }
 0x115   : > { %4720 = vmatprep.subr.bf16.mxu0 %v5209_v58 }
 0x118   : > { %4721 = vmatpush3.bf16.msra.mxu0 %v5209_v58  ;;  %v5223_v58 = vld [vmem:[#allocation2 + $0x148] sm:$0xff] }
 0x119   : > { %4754 = vmatprep.subr.bf16.mxu0 %v5211_v62 }
 0x11a   : > { %4483 = vmatmul.mubr.bf16.vlgmr.msra.gmra.mrb[0].mxu1 %v5733_v32  ;;  %v2474_v32 = vld [vmem:[#allocation2 + $0x207] sm:$0xff] }
 0x11b   : > { %4691 = vmatmul.mubr.bf16.gmra.mrb[16].mxu0 %v5902_v11  ;;  %4515 = vmatpush3.bf16.msra.mxu1 %v5884_v20  ;;  %v2756_v20 = vld [vmem:[#allocation2 + $0x88] sm:$0xff] }
 0x11c   : > { %4486 = vmatprep.mubr.bf16.mxu1 %v5752_v59  ;;  %4694 = vmatprep.mubr.bf16.mxu0 %v5904_v16  ;;  %v2475_v59 = vld [vmem:[#allocation2 + $0x20f] sm:$0xff]  ;;  %v2786_v33 = vpack.c.bf16 %v2757_v40, %v2756_v20 }
 0x11d   : > { %4516 = vmatprep.subr.bf16.mxu1 %v5204_v21  ;;  %v5962_v63 = vpack.c.bf16 %v2475_v59, %v2474_v32  ;;  %v5227_v32 = vld [vmem:[#allocation2 + $0x188] sm:$0xff]  ;;  %v5228_v59 = vld [vmem:[#allocation2 + $0x190] sm:$0xff] }
 0x11e   : > { %v2783_v20 = vld [vmem:[#allocation2 + $0x230] sm:$0xff] }
 0x11f   : > { %4517 = vmatpush3.bf16.msra.mxu1 %v5204_v21  ;;  %v3058_v40 = vld [vmem:[#allocation2 + $0x49] sm:$0xff] }
 0x120   : > { %4518 = vmatprep.subr.bf16.mxu1 %v5206_v52 }
 0x122   : > { %4487 = vmatmul.mubr.bf16.gmra.mrb[4].mxu1 %v5756_v42  ;;  %v5212_v42 = vld [vmem:[%s6287_s4 + $0xe8] sm:$0xff]  }
 0x123   : > { %4695 = vmatmul.mubr.bf16.gmra.mrb[20].mxu0 %v5916_v36  ;;  %4490 = vmatprep.mubr.bf16.mxu1 %v5769_v29  ;;  %v2476_v29 = vld [vmem:[#allocation2 + $0x227] sm:$0xff] }
 0x124   : > { %4698 = vmatprep.mubr.bf16.mxu0 %v5918_v56  ;;  %4519 = vmatpush3.bf16.msra.mxu1 %v5206_v52  ;;  %v2493_v1 = vpack.c.bf16 %v2477_v0, %v2476_v29  ;;  %v5226_v52 = vld [vmem:[#allocation2 + $0x170] sm:$0xff]  ;;  %v5232_v0 = vld [vmem:[#allocation2 + $0x1c8] sm:$0xff] }
 0x125   : > { %4520 = vmatprep.subr.bf16.mxu1 %v5208_v25  ;;  %v2796_v27 = vpack.c.bf16 %v5233_v2, %v5232_v0  ;;  %v3083_v0 = vld [vmem:[#allocation2 + $0x1d1] sm:$0xff] }
 0x128   : > { %4521 = vmatpush3.bf16.msra.mxu1 %v5208_v25 }
 0x129   : > { %4522 = vmatprep.subr.bf16.mxu1 %v5210_v7 }
 0x12a   : > { %4491 = vmatmul.mubr.bf16.gmra.mrb[8].mxu1 %v5773_v46  ;;  %v5216_v46 = vld [vmem:[%s6287_s4 + $0xf8] sm:$0xff]  }
 0x12b   : > { %4699 = vmatmul.mubr.bf16.gmra.mrb[24].mxu0 %v5930_v57  ;;  %4494 = vmatprep.mubr.bf16.mxu1 %v5785_v61  ;;  %v2754_v61 = vld [vmem:[#allocation2 + $0x68] sm:$0xff] }
 0x12c   : > { %4702 = vmatprep.mubr.bf16.mxu0 %v5962_v63  ;;  %4523 = vmatpush3.bf16.msra.mxu1 %v5210_v7  ;;  %v2785_v30 = vpack.c.bf16 %v2755_v14, %v2754_v61  ;;  %v2794_v7 = vpack.c.bf16 %v5228_v59, %v5227_v32  ;;  %v5239_v61 = vld [vmem:[#allocation2 + $0x210] sm:$0xff] }
 0x12d   : > { %4524 = vmatprep.subr.bf16.mxu1 %v5212_v42 }
 0x130   : > { %4525 = vmatpush3.bf16.msra.mxu1 %v5212_v42  ;;  %v5231_v42 = vld [vmem:[#allocation2 + $0x1b0] sm:$0xff] }
 0x131   : > { %4526 = vmatprep.subr.bf16.mxu1 %v5214_v24 }
 0x132   : > { %4495 = vmatmul.mubr.bf16.gmra.mrb[12].mxu1 %v5789_v51  ;;  %v5985_v51 = vld [vmem:[%s6287_s4 + $0x100] sm:$0xff]  }
 0x133   : > { %4703 = vmatmul.mubr.bf16.gmra.mrb[28].mxu0 %v2493_v1  ;;  %4498 = vmatprep.mubr.bf16.mxu1 %v5801_v12  ;;  %v2758_v12 = vld [vmem:[#allocation2 + $0xa8] sm:$0xff]  ;;  %v5237_v1 = vld [vmem:[#allocation2 + $0x1f0] sm:$0xff] }
 0x134   : > { %4722 = vmatprep.mubr.bf16.mxu0 %v2784_v10  ;;  %4527 = vmatpush3.bf16.msra.mxu1 %v5214_v24  ;;  %v2787_v35 = vpack.c.bf16 %v2759_v60, %v2758_v12  ;;  %v5236_v24 = vld [vmem:[#allocation2 + $0x1e8] sm:$0xff]  ;;  %v3061_v12 = vld [vmem:[#allocation2 + $0x71] sm:$0xff] }
 0x135   : > { %4528 = vmatprep.subr.bf16.mxu1 %v5216_v46  ;;  %v2797_v10 = vpack.c.bf16 %v5237_v1, %v5236_v24  ;;  %v3062_v60 = vld [vmem:[#allocation2 + $0x89] sm:$0xff] }
 0x136   : > { %v1859_v24 = vld [vmem:[#allocation2 + $0x1c8] sm:$0xff]  ;;  %v1860_v1 = vld [vmem:[#allocation2 + $0x1d0] sm:$0xff] }
 0x138   : > { %4529 = vmatpush3.bf16.msra.mxu1 %v5216_v46  ;;  %v5238_v46 = vld [vmem:[#allocation2 + $0x208] sm:$0xff] }
 0x139   : > { %4802 = vmatprep.subr.bf16.mxu1 %v5985_v51  ;;  %v2798_v14 = vpack.c.bf16 %v5239_v61, %v5238_v46  ;;  %v3085_v46 = vld [vmem:[#allocation2 + $0x1f1] sm:$0xff]  ;;  %v1861_v61 = vld [vmem:[#allocation2 + $0x1e8] sm:$0xff] }
 0x13a   : > { %4499 = vmatmul.mubr.bf16.gmra.mrb[16].mxu1 %v5803_v28  ;;  %v5217_v28 = vld [vmem:[%s6287_s4 + $0x218] sm:$0xff]  }
 0x13b   : > { %4723 = vmatmul.mubr.bf16.vlgmr.msra.gmra.mrb[0].mxu0 %v2785_v30  ;;  %4502 = vmatprep.mubr.bf16.mxu1 %v5817_v44  ;;  %v2762_v44 = vld [vmem:[#allocation2 + $0xe8] sm:$0xff]  ;;  %v3059_v30 = vld [vmem:[#allocation2 + $0x51] sm:$0xff] }
 0x13c   : > { %4755 = vmatpush3.bf16.msra.mxu0 %v5211_v62  ;;  %4726 = vmatprep.mubr.bf16.mxu0 %v2786_v33  ;;  %v2789_v55 = vpack.c.bf16 %v2763_v26, %v2762_v44  ;;  %v5224_v62 = vld [vmem:[#allocation2 + $0x150] sm:$0xff]  ;;  %v5241_v33 = vld [vmem:[%s6287_s4 + $0x128] sm:$0xff]  }
 0x13d   : > { %4756 = vmatprep.subr.bf16.mxu0 %v5213_v48  ;;  %v2792_v21 = vpack.c.bf16 %v5224_v62, %v5223_v58  ;;  %v1852_v58 = vld [vmem:[#allocation2 + $0x150] sm:$0xff] }
 0x13e   : > { %v3076_v62 = vld [vmem:[#allocation2 + $0x169] sm:$0xff] }
 0x140   : > { %4757 = vmatpush3.bf16.msra.mxu0 %v5213_v48 }
 0x141   : > { %4758 = vmatprep.subr.bf16.mxu0 %v5215_v38 }
 0x142   : > { %4503 = vmatmul.mubr.bf16.gmra.mrb[20].mxu1 %v5821_v15  ;;  %v5219_v15 = vld [vmem:[%s6287_s4 + $0x228] sm:$0xff]  }
 0x143   : > { %4727 = vmatmul.mubr.bf16.gmra.mrb[4].mxu0 %v2787_v35  ;;  %4506 = vmatprep.mubr.bf16.mxu1 %v5837_v8  ;;  %v2766_v8 = vld [vmem:[#allocation2 + $0x128] sm:$0xff]  ;;  %v3092_v35 = vpack.c.bf16 %v3063_v4, %v3062_v60 }
 0x144   : > { %4730 = vmatprep.mubr.bf16.mxu0 %v2788_v17  ;;  %4759 = vmatpush3.bf16.msra.mxu0 %v5215_v38  ;;  %v6009_v18 = vpack.c.bf16 %v2767_v43, %v2766_v8  ;;  %v3066_v17 = vld [vmem:[#allocation2 + $0xc9] sm:$0xff] }
 0x145   : > { %4760 = vmatprep.subr.bf16.mxu0 %v5217_v28  ;;  %v3074_v8 = vld [vmem:[#allocation2 + $0x149] sm:$0xff] }
 0x148   : > { %4761 = vmatpush3.bf16.msra.mxu0 %v5217_v28  ;;  %v3067_v28 = vld [vmem:[#allocation2 + $0xd1] sm:$0xff] }
 0x149   : > { %4762 = vmatprep.subr.bf16.mxu0 %v5218_v54  ;;  %v3094_v26 = vpack.c.bf16 %v3067_v28, %v3066_v17 }
 0x14a   : > { %4507 = vmatmul.mubr.bf16.gmra.mrb[24].mxu1 %v5841_v47  ;;  %v5221_v47 = vld [vmem:[%s6287_s4 + $0x238] sm:$0xff]  }
 0x14b   : > { %4731 = vmatmul.mubr.bf16.gmra.mrb[8].mxu0 %v2789_v55  ;;  %4510 = vmatprep.mubr.bf16.mxu1 %v5855_v50  ;;  %v5225_v50 = vld [vmem:[#allocation2 + $0x168] sm:$0xff]  ;;  %v3095_v55 = vpack.c.bf16 %v3069_v34, %v3068_v22 }
 0x14c   : > { %4734 = vmatprep.mubr.bf16.mxu0 %v2790_v23  ;;  %4763 = vmatpush3.bf16.msra.mxu0 %v5218_v54  ;;  %v2793_v25 = vpack.c.bf16 %v5226_v52, %v5225_v50  ;;  %v3070_v54 = vld [vmem:[#allocation2 + $0x109] sm:$0xff]  ;;  %v3079_v50 = vld [vmem:[#allocation2 + $0x191] sm:$0xff] }
 0x14d   : > { %4764 = vmatprep.subr.bf16.mxu0 %v5219_v15 }
 0x150   : > { %4765 = vmatpush3.bf16.msra.mxu0 %v5219_v15  ;;  %v3073_v15 = vld [vmem:[#allocation2 + $0x131] sm:$0xff] }
 0x151   : > { %4766 = vmatprep.subr.bf16.mxu0 %v5220_v45 }
 0x152   : > { %4511 = vmatmul.mubr.bf16.gmra.mrb[28].mxu1 %v5859_v49  ;;  %v5230_v49 = vld [vmem:[#allocation2 + $0x1a8] sm:$0xff] }
 0x153   : > { %4735 = vmatmul.mubr.bf16.gmra.mrb[12].mxu0 %v6009_v18  ;;  %4530 = vmatprep.mubr.bf16.mxu1 %v5815_v9  ;;  %v5229_v9 = vld [vmem:[%s6287_s4 + $0x108] sm:$0xff]   ;;  %v2795_v29 = vpack.c.bf16 %v5231_v42, %v5230_v49  ;;  %v1858_v42 = vld [vmem:[#allocation2 + $0x1b0] sm:$0xff] }
 0x154   : > { %4738 = vmatprep.mubr.bf16.mxu0 %v2792_v21  ;;  %4767 = vmatpush3.bf16.msra.mxu0 %v5220_v45  ;;  %v1853_v21 = vld [vmem:[#allocation2 + $0x168] sm:$0xff] }
 0x155   : > { %4768 = vmatprep.subr.bf16.mxu0 %v5221_v47  ;;  %v1857_v49 = vld [vmem:[#allocation2 + $0x1a8] sm:$0xff] }
 0x158   : > { %4769 = vmatpush3.bf16.msra.mxu0 %v5221_v47  ;;  %v1854_v47 = vld [vmem:[#allocation2 + $0x170] sm:$0xff] }
 0x159   : > { %v1875_v32 = vpack.c.bf16 %v1854_v47, %v1853_v21 }
 0x15a   : > { %4531 = vmatmul.mubr.bf16.vlgmr.msra.gmra.mrb[0].mxu1 %v5819_v31  ;;  %v5234_v31 = vld [vmem:[%s6287_s4 + $0x110] sm:$0xff]  }
 0x15b   : > { %4739 = vmatmul.mubr.bf16.gmra.mrb[16].mxu0 %v2793_v25  ;;  %4810 = vmatpush3.bf16.msra.mxu1 %v5985_v51  ;;  %v3090_v51 = vpack.c.bf16 %v3059_v30, %v3058_v40 }
 0x15c   : > { %4534 = vmatprep.mubr.bf16.mxu1 %v5835_v6  ;;  %4742 = vmatprep.mubr.bf16.mxu0 %v2794_v7  ;;  %v5235_v6 = vld [vmem:[%s6287_s4 + $0x118] sm:$0xff]   ;;  %v1856_v7 = vld [vmem:[#allocation2 + $0x190] sm:$0xff] }
 0x15d   : > { %4803 = vmatprep.subr.bf16.mxu1 %v5229_v9 }
 0x15f   : > { %4811 = vmatpush3.bf16.msra.mxu1 %v5229_v9  ;;  %v3080_v9 = vld [vmem:[#allocation2 + $0x1a9] sm:$0xff] }
 0x160   : > { %4804 = vmatprep.subr.bf16.mxu1 %v5234_v31 }
 0x162   : > { %4535 = vmatmul.mubr.bf16.gmra.mrb[4].mxu1 %v5839_v41  ;;  %v5240_v41 = vld [vmem:[%s6287_s4 + $0x120] sm:$0xff]  }
 0x163   : > { %4743 = vmatmul.mubr.bf16.gmra.mrb[20].mxu0 %v2795_v29  ;;  %4538 = vmatprep.mubr.bf16.mxu1 %v5853_v19  ;;  %v2782_v19 = vld [vmem:[#allocation2 + $0x228] sm:$0xff] }
 0x164   : > { %4746 = vmatprep.mubr.bf16.mxu0 %v2796_v27  ;;  %4812 = vmatpush3.bf16.msra.mxu1 %v5234_v31  ;;  %v2799_v48 = vpack.c.bf16 %v2783_v20, %v2782_v19  ;;  %v3082_v29 = vld [vmem:[#allocation2 + $0x1c9] sm:$0xff]  ;;  %v1877_v31 = vpack.c.bf16 %v1858_v42, %v1857_v49  ;;  %v3087_v19 = vld [vmem:[#allocation2 + $0x211] sm:$0xff]  ;;  %v1878_v20 = vpack.c.bf16 %v1860_v1, %v1859_v24 }
 0x165   : > { %4805 = vmatprep.subr.bf16.mxu1 %v5235_v6 }
 0x168   : > { %4813 = vmatpush3.bf16.msra.mxu1 %v5235_v6  ;;  %v3102_v6 = vpack.c.bf16 %v3083_v0, %v3082_v29 }
 0x169   : > { %4806 = vmatprep.subr.bf16.mxu1 %v5240_v41 }
 0x16a   : > { %4539 = vmatmul.mubr.bf16.gmra.mrb[8].mxu1 %v5857_v39  ;;  %v5242_v39 = vld [vmem:[%s6287_s4 + $0x130] sm:$0xff]  }
 0x16b   : > { %4747 = vmatmul.mubr.bf16.gmra.mrb[24].mxu0 %v2797_v10  ;;  %4542 = vmatprep.mubr.bf16.mxu1 %v5871_v53  ;;  %v3060_v53 = vld [vmem:[#allocation2 + $0x69] sm:$0xff] }
 0x16c   : > { %4750 = vmatprep.mubr.bf16.mxu0 %v2798_v14  ;;  %4814 = vmatpush3.bf16.msra.mxu1 %v5240_v41  ;;  %v3091_v38 = vpack.c.bf16 %v3061_v12, %v3060_v53  ;;  %v3084_v10 = vld [vmem:[#allocation2 + $0x1e9] sm:$0xff]  ;;  %v3089_v53 = vld [vmem:[#allocation2 + $0x231] sm:$0xff] }
 0x16d   : > { %4807 = vmatprep.subr.bf16.mxu1 %v5241_v33  ;;  %v1862_v14 = vld [vmem:[#allocation2 + $0x1f0] sm:$0xff]  ;;  %v3103_v40 = vpack.c.bf16 %v3085_v46, %v3084_v10 }
 0x16e   : > { %v3086_v41 = vld [vmem:[#allocation2 + $0x209] sm:$0xff]  ;;  %v1879_v30 = vpack.c.bf16 %v1862_v14, %v1861_v61 }
 0x170   : > { %4815 = vmatpush3.bf16.msra.mxu1 %v5241_v33  ;;  %v3104_v33 = vpack.c.bf16 %v3087_v19, %v3086_v41 }
 0x171   : > { %4808 = vmatprep.subr.bf16.mxu1 %v5242_v39 }
 0x172   : > { %4543 = vmatmul.mubr.bf16.gmra.mrb[12].mxu1 %v5873_v3  ;;  %v3064_v3 = vld [vmem:[#allocation2 + $0xa9] sm:$0xff] }
 0x173   : > { %4751 = vmatmul.mubr.bf16.gmra.mrb[28].mxu0 %v2799_v48  ;;  %4546 = vmatprep.mubr.bf16.mxu1 %v5886_v13  ;;  %v3065_v13 = vld [vmem:[#allocation2 + $0xb1] sm:$0xff]  ;;  %v1863_v48 = vld [vmem:[#allocation2 + $0x208] sm:$0xff] }
 0x174   : > { %4770 = vmatprep.mubr.bf16.mxu0 %v3090_v51  ;;  %4816 = vmatpush3.bf16.msra.mxu1 %v5242_v39  ;;  %v3093_v44 = vpack.c.bf16 %v3065_v13, %v3064_v3  ;;  %v1864_v51 = vld [vmem:[#allocation2 + $0x210] sm:$0xff] }
 0x175   : > { %4809 = vmatprep.subr.bf16.mxu1 %v5243_v5  ;;  %v3088_v39 = vld [vmem:[#allocation2 + $0x229] sm:$0xff]  ;;  %v1880_v12 = vpack.c.bf16 %v1864_v51, %v1863_v48 }
 0x176   : > { %v3105_v60 = vpack.c.bf16 %v3089_v53, %v3088_v39 }
 0x178   : > { %4817 = vmatpush3.bf16.msra.mxu1 %v5243_v5 }
 0x17a   : > { %4547 = vmatmul.mubr.bf16.gmra.mrb[16].mxu1 %v5888_v37  ;;  %v3071_v37 = vld [vmem:[#allocation2 + $0x111] sm:$0xff] }
 0x17b   : > { %4771 = vmatmul.mubr.bf16.vlgmr.msra.gmra.mrb[0].mxu0 %v3091_v38  ;;  %4550 = vmatprep.mubr.bf16.mxu1 %v5902_v11  ;;  %v3096_v23 = vpack.c.bf16 %v3071_v37, %v3070_v54  ;;  %v3072_v11 = vld [vmem:[#allocation2 + $0x129] sm:$0xff] }
 0x17c   : > { %4774 = vmatprep.mubr.bf16.mxu0 %v3092_v35  ;;  %v3097_v43 = vpack.c.bf16 %v3073_v15, %v3072_v11 }
 0x182   : > { %4551 = vmatmul.mubr.bf16.gmra.mrb[20].mxu1 %v5904_v16  ;;  %v3075_v16 = vld [vmem:[#allocation2 + $0x151] sm:$0xff] }
 0x183   : > { %4775 = vmatmul.mubr.bf16.gmra.mrb[4].mxu0 %v3093_v44  ;;  %4554 = vmatprep.mubr.bf16.mxu1 %v5916_v36  ;;  %v3098_v45 = vpack.c.bf16 %v3075_v16, %v3074_v8  ;;  %v1851_v36 = vld [vmem:[#allocation2 + $0x148] sm:$0xff] }
 0x184   : > { %4778 = vmatprep.mubr.bf16.mxu0 %v3094_v26  ;;  %v1874_v52 = vpack.c.bf16 %v1852_v58, %v1851_v36 }
 0x18a   : > { %4555 = vmatmul.mubr.bf16.gmra.mrb[24].mxu1 %v5918_v56  ;;  %v3077_v56 = vld [vmem:[#allocation2 + $0x171] sm:$0xff] }
 0x18b   : > { %4779 = vmatmul.mubr.bf16.gmra.mrb[8].mxu0 %v3095_v55  ;;  %4558 = vmatprep.mubr.bf16.mxu1 %v5930_v57  ;;  %v3078_v57 = vld [vmem:[#allocation2 + $0x189] sm:$0xff]  ;;  %v3099_v25 = vpack.c.bf16 %v3077_v56, %v3076_v62 }
 0x18c   : > { %4782 = vmatprep.mubr.bf16.mxu0 %v3096_v23  ;;  %v3100_v59 = vpack.c.bf16 %v3079_v50, %v3078_v57 }
 0x192   : > { %4559 = vmatmul.mubr.bf16.gmra.mrb[28].mxu1 %v5962_v63  ;;  %v1855_v63 = vld [vmem:[#allocation2 + $0x188] sm:$0xff] }
 0x193   : > { %4783 = vmatmul.mubr.bf16.gmra.mrb[12].mxu0 %v3097_v43  ;;  %4594 = vmatprep.mubr.bf16.mxu1 %v6009_v18  ;;  %v3081_v18 = vld [vmem:[#allocation2 + $0x1b1] sm:$0xff]  ;;  %v1876_v2 = vpack.c.bf16 %v1856_v7, %v1855_v63 }
 0x194   : > { %4786 = vmatprep.mubr.bf16.mxu0 %v3098_v45  ;;  %v3101_v27 = vpack.c.bf16 %v3081_v18, %v3080_v9 }
 0x19a   : > { %4595 = vmatmul.mubr.bf16.vlgmr.msra.gmra.mrb[16].mxu1 %v1874_v52 }
 0x19b   : > { %4787 = vmatmul.mubr.bf16.gmra.mrb[16].mxu0 %v3099_v25  ;;  %4598 = vmatprep.mubr.bf16.mxu1 %v1875_v32 }
 0x19c   : > { %4790 = vmatprep.mubr.bf16.mxu0 %v3100_v59 }
 0x1a2   : > { %4599 = vmatmul.mubr.bf16.gmra.mrb[20].mxu1 %v1876_v2 }
 0x1a3   : > { %4791 = vmatmul.mubr.bf16.gmra.mrb[20].mxu0 %v3101_v27  ;;  %4602 = vmatprep.mubr.bf16.mxu1 %v1877_v31 }
 0x1a4   : > { %4794 = vmatprep.mubr.bf16.mxu0 %v3102_v6 }
 0x1aa   : > { %4603 = vmatmul.mubr.bf16.gmra.mrb[24].mxu1 %v1878_v20 }
 0x1ab   : > { %4795 = vmatmul.mubr.bf16.gmra.mrb[24].mxu0 %v3103_v40  ;;  %4606 = vmatprep.mubr.bf16.mxu1 %v1879_v30 }
 0x1ac   : > { %4798 = vmatprep.mubr.bf16.mxu0 %v3104_v33 }
 0x1b2   : > { %4607 = vmatmul.mubr.bf16.gmra.mrb[28].mxu1 %v1880_v12 }
 0x1b3   : > { %4799 = vmatmul.mubr.bf16.gmra.mrb[28].mxu0 %v3105_v60 }
 0x22d   : > { %v4532_v4 = vpop.f32.mrb[0].mxu1 }
 0x22e   : > { %v1674_v5 = vpop.f32.mrb[1].mxu1 }
 0x22f   : > { %v4533_v38 = vpop.f32.mrb[2].mxu1 }
 0x230   : > { %v1677_v35 = vpop.f32.mrb[3].mxu1 }
 0x235   : > { %v4536_v3 = vpop.f32.mrb[4].mxu1 }
 0x236   : > { %v1690_v13 = vpop.f32.mrb[5].mxu1 }
 0x237   : > { %v4537_v17 = vpop.f32.mrb[6].mxu1 }
 0x238   : > { %v1693_v28 = vpop.f32.mrb[7].mxu1 }
 0x23d   : > { %v4540_v44 = vpop.f32.mrb[8].mxu1 }
 0x23e   : > { %v1706_v26 = vpop.f32.mrb[9].mxu1 }
 0x23f   : > { %v4541_v22 = vpop.f32.mrb[10].mxu1 }
 0x240   : > { %v1709_v34 = vpop.f32.mrb[11].mxu1 }
 0x245   : > { %v4544_v54 = vpop.f32.mrb[12].mxu1 }
 0x246   : > { %v1722_v37 = vpop.f32.mrb[13].mxu1 }
 0x247   : > { %v4545_v55 = vpop.f32.mrb[14].mxu1 }
 0x248   : > { %v1725_v23 = vpop.f32.mrb[15].mxu1 }
 0x24e   : > { %v4772_v11 = vpop.f32.mrb[0].mxu0 }
 0x24f   : > { %v6055_v15 = vadd.f32 %v4772_v11, %v4532_v4  ;;  %v3205_v8 = vpop.f32.mrb[1].mxu0 }
 0x250   : > { %v6057_v16 = vadd.f32 %v3205_v8, %v1674_v5  ;;  %v4773_v43 = vpop.f32.mrb[2].mxu0 }
 0x251   : > { %v6059_v45 = vadd.f32 %v4773_v43, %v4533_v38  ;;  %v3208_v36 = vpop.f32.mrb[3].mxu0 }
 0x252   : > { %v6061_v58 = vadd.f32 %v3208_v36, %v1677_v35 }
 0x253   : > { %v4052_v62 = vpack.c.bf16 %v6059_v45, %v6055_v15 }
 0x254   : > { %v4047_v56 = vpack.c.bf16 %v6061_v58, %v6057_v16 }
 0x255   : > { %4139 = vst [vmem:[%s5307_s29 + $0x8] sm:$0xff] %v4052_v62  }
 0x256   : > { %4048 = vst [vmem:[%s5307_s29] sm:$0xff] %v4047_v56   ;;  %v4776_v21 = vpop.f32.mrb[4].mxu0 }
 0x257   : > { %v6069_v47 = vadd.f32 %v4776_v21, %v4536_v3  ;;  %v3221_v57 = vpop.f32.mrb[5].mxu0 }
 0x258   : > { %v6071_v50 = vadd.f32 %v3221_v57, %v1690_v13  ;;  %v4777_v52 = vpop.f32.mrb[6].mxu0 }
 0x259   : > { %v6073_v25 = vadd.f32 %v4777_v52, %v4537_v17  ;;  %v3224_v32 = vpop.f32.mrb[7].mxu0 }
 0x25a   : > { %v6075_v59 = vadd.f32 %v3224_v32, %v1693_v28 }
 0x25b   : > { %v4062_v63 = vpack.c.bf16 %v6073_v25, %v6069_v47 }
 0x25c   : > { %v4057_v7 = vpack.c.bf16 %v6075_v59, %v6071_v50 }
 0x25d   : > { %4141 = vst [vmem:[%s5307_s29 + $0x18] sm:$0xff] %v4062_v63  }
 0x25e   : > { %4140 = vst [vmem:[%s5307_s29 + $0x10] sm:$0xff] %v4057_v7   ;;  %v4780_v9 = vpop.f32.mrb[8].mxu0 }
 0x25f   : > { %v6083_v18 = vadd.f32 %v4780_v9, %v4540_v44  ;;  %v3237_v49 = vpop.f32.mrb[9].mxu0 }
 0x260   : > { %v6085_v42 = vadd.f32 %v3237_v49, %v1706_v26  ;;  %v4781_v29 = vpop.f32.mrb[10].mxu0 }
 0x261   : > { %v6087_v0 = vadd.f32 %v4781_v29, %v4541_v22  ;;  %v3240_v2 = vpop.f32.mrb[11].mxu0 }
 0x262   : > { %v6089_v27 = vadd.f32 %v3240_v2, %v1709_v34 }
 0x263   : > { %v4072_v31 = vpack.c.bf16 %v6087_v0, %v6083_v18 }
 0x264   : > { %v4067_v6 = vpack.c.bf16 %v6089_v27, %v6085_v42 }
 0x265   : > { %4143 = vst [vmem:[%s5307_s29 + $0x28] sm:$0xff] %v4072_v31  }
 0x266   : > { %4142 = vst [vmem:[%s5307_s29 + $0x20] sm:$0xff] %v4067_v6   ;;  %v4784_v24 = vpop.f32.mrb[12].mxu0 }
 0x267   : > { %v6097_v1 = vadd.f32 %v4784_v24, %v4544_v54  ;;  %v3253_v10 = vpop.f32.mrb[13].mxu0 }
 0x268   : > { %v6099_v46 = vadd.f32 %v3253_v10, %v1722_v37  ;;  %v4785_v61 = vpop.f32.mrb[14].mxu0 }
 0x269   : > { %v6101_v14 = vadd.f32 %v4785_v61, %v4545_v55  ;;  %v3256_v41 = vpop.f32.mrb[15].mxu0 }
 0x26a   : > { %v6103_v19 = vadd.f32 %v3256_v41, %v1725_v23 }
 0x26b   : > { %v4082_v20 = vpack.c.bf16 %v6101_v14, %v6097_v1 }
 0x26c   : > { %v4077_v40 = vpack.c.bf16 %v6103_v19, %v6099_v46 }
 0x26d   : > { %4145 = vst [vmem:[%s5307_s29 + $0x38] sm:$0xff] %v4082_v20   ;;  %v4596_v30 = vpop.f32.mrb[16].mxu1 }
 0x26e   : > { %4144 = vst [vmem:[%s5307_s29 + $0x30] sm:$0xff] %v4077_v40   ;;  %v4788_v33 = vpop.f32.mrb[16].mxu0  ;;  %v2044_v48 = vpop.f32.mrb[17].mxu1 }
 0x26f   : > { %v6111_v51 = vadd.f32 %v4788_v33, %v4596_v30  ;;  %v3269_v39 = vpop.f32.mrb[17].mxu0  ;;  %v4597_v53 = vpop.f32.mrb[18].mxu1 }
 0x270   : > { %v6113_v12 = vadd.f32 %v3269_v39, %v2044_v48  ;;  %v4789_v60 = vpop.f32.mrb[18].mxu0  ;;  %v2047_v4 = vpop.f32.mrb[19].mxu1 }
 0x271   : > { %v6115_v5 = vadd.f32 %v4789_v60, %v4597_v53  ;;  %v3272_v38 = vpop.f32.mrb[19].mxu0 }
 0x272   : > { %v6117_v35 = vadd.f32 %v3272_v38, %v2047_v4 }
 0x273   : > { %v4092_v3 = vpack.c.bf16 %v6115_v5, %v6111_v51 }
 0x274   : > { %v4087_v13 = vpack.c.bf16 %v6117_v35, %v6113_v12 }
 0x275   : > { %4147 = vst [vmem:[%s5307_s29 + $0x48] sm:$0xff] %v4092_v3   ;;  %v4600_v17 = vpop.f32.mrb[20].mxu1  ;;  %v5253_v3 = vmov (!%p3710_p4), 0.0  }
 0x276   : > { %4146 = vst [vmem:[%s5307_s29 + $0x40] sm:$0xff] %v4087_v13   ;;  %v4792_v28 = vpop.f32.mrb[20].mxu0  ;;  %v2060_v44 = vpop.f32.mrb[21].mxu1  ;;  %3527 = vst [vmem:[%s6289_s6] sm:$0x3] (!%p3710_p4), %v5253_v3 }
 0x277   : > { %v6125_v26 = vadd.f32 %v4792_v28, %v4600_v17  ;;  %v3285_v22 = vpop.f32.mrb[21].mxu0  ;;  %v4601_v34 = vpop.f32.mrb[22].mxu1 }
 0x278   : > { %v6127_v54 = vadd.f32 %v3285_v22, %v2060_v44  ;;  %v4793_v37 = vpop.f32.mrb[22].mxu0  ;;  %v2063_v55 = vpop.f32.mrb[23].mxu1 }
 0x279   : > { %v6129_v23 = vadd.f32 %v4793_v37, %v4601_v34  ;;  %v3288_v11 = vpop.f32.mrb[23].mxu0 }
 0x27a   : > { %v6131_v8 = vadd.f32 %v3288_v11, %v2063_v55 }
 0x27b   : > { %v4102_v43 = vpack.c.bf16 %v6129_v23, %v6125_v26 }
 0x27c   : > { %v4097_v36 = vpack.c.bf16 %v6131_v8, %v6127_v54 }
 0x27d   : > { %4149 = vst [vmem:[%s5307_s29 + $0x58] sm:$0xff] %v4102_v43   ;;  %v4604_v62 = vpop.f32.mrb[24].mxu1 }
 0x27e   : > { %4148 = vst [vmem:[%s5307_s29 + $0x50] sm:$0xff] %v4097_v36   ;;  %v4796_v56 = vpop.f32.mrb[24].mxu0  ;;  %v2076_v21 = vpop.f32.mrb[25].mxu1 }
 0x27f   : > { %v6139_v57 = vadd.f32 %v4796_v56, %v4604_v62  ;;  %v3301_v52 = vpop.f32.mrb[25].mxu0  ;;  %v4605_v32 = vpop.f32.mrb[26].mxu1 }
 0x280   : > { %v6141_v63 = vadd.f32 %v3301_v52, %v2076_v21  ;;  %v4797_v7 = vpop.f32.mrb[26].mxu0  ;;  %v2079_v9 = vpop.f32.mrb[27].mxu1 }
 0x281   : > { %v6143_v49 = vadd.f32 %v4797_v7, %v4605_v32  ;;  %v3304_v29 = vpop.f32.mrb[27].mxu0 }
 0x282   : > { %v6145_v2 = vadd.f32 %v3304_v29, %v2079_v9 }
 0x283   : > { %v4112_v31 = vpack.c.bf16 %v6143_v49, %v6139_v57 }
 0x284   : > { %v4107_v6 = vpack.c.bf16 %v6145_v2, %v6141_v63 }
 0x285   : > { %4151 = vst [vmem:[%s5307_s29 + $0x68] sm:$0xff] %v4112_v31   ;;  %v4608_v24 = vpop.f32.mrb[28].mxu1 }
 0x286   : > { %4150 = vst [vmem:[%s5307_s29 + $0x60] sm:$0xff] %v4107_v6   ;;  %v4800_v10 = vpop.f32.mrb[28].mxu0  ;;  %v2092_v61 = vpop.f32.mrb[29].mxu1 }
 0x287   : > { %v6153_v41 = vadd.f32 %v4800_v10, %v4608_v24  ;;  %v3317_v20 = vpop.f32.mrb[29].mxu0  ;;  %v4609_v40 = vpop.f32.mrb[30].mxu1 }
 0x288   : > { %v6155_v30 = vadd.f32 %v3317_v20, %v2092_v61  ;;  %v4801_v33 = vpop.f32.mrb[30].mxu0  ;;  %v2095_v48 = vpop.f32.mrb[31].mxu1  ;;  %3526 = sbr.rel (%p3710_p4) target bundleno = 655 (0x28f), region = 48 }
 0x289   : > { %v6157_v39 = vadd.f32 %v4801_v33, %v4609_v40  ;;  %v3320_v53 = vpop.f32.mrb[31].mxu0 }
 0x28a   : > { %v6159_v60 = vadd.f32 %v3320_v53, %v2095_v48 }
 0x28b   : > { %v4122_v4 = vpack.c.bf16 %v6157_v39, %v6153_v41 }
 0x28c   : > { %v4117_v38 = vpack.c.bf16 %v6159_v60, %v6155_v30 }
 0x28d   : > { %4153 = vst [vmem:[%s5307_s29 + $0x78] sm:$0xff] %v4122_v4  }
 0x28e   : > { %4152 = vst [vmem:[%s5307_s29 + $0x70] sm:$0xff] %v4117_v38  }
 0x28f PF: > { %v3529_v13 = vadd.f32 %v6061_v58, %v6057_v16  ;;  %v3569_v44 = vmul.f32 %v6057_v16, %v6057_v16  ;;  %v3570_v22 = vmul.f32 %v6061_v58, %v6061_v58  ;;  %v3571_v37 = vmul.f32 %v6055_v15, %v6055_v15 }
 0x290   : > { %v3572_v11 = vmul.f32 %v6059_v45, %v6059_v45  ;;  %v3573_v62 = vmul.f32 %v6071_v50, %v6071_v50  ;;  %v3574_v58 = vmul.f32 %v6075_v59, %v6075_v59  ;;  %v3575_v52 = vmul.f32 %v6069_v47, %v6069_v47 }
 0x291   : > { %v3530_v17 = vadd.f32 %v6055_v15, %v3529_v13  ;;  %v3601_v43 = vadd.f32 %v3570_v22, %v3569_v44  ;;  %v3576_v7 = vmul.f32 %v6073_v25, %v6073_v25  ;;  %v3577_v29 = vmul.f32 %v6085_v42, %v6085_v42 }
 0x292   : > { %v3578_v6 = vmul.f32 %v6089_v27, %v6089_v27  ;;  %v3579_v10 = vmul.f32 %v6083_v18, %v6083_v18  ;;  %v3580_v20 = vmul.f32 %v6087_v0, %v6087_v0  ;;  %v3581_v33 = vmul.f32 %v6099_v46, %v6099_v46 }
 0x293   : > { %v3531_v28 = vadd.f32 %v6059_v45, %v3530_v17  ;;  %v3602_v16 = vadd.f32 %v3601_v43, %v3571_v37  ;;  %v3582_v53 = vmul.f32 %v6103_v19, %v6103_v19  ;;  %v3583_v38 = vmul.f32 %v6097_v1, %v6097_v1 }
 0x294   : > { %v3584_v13 = vmul.f32 %v6101_v14, %v6101_v14  ;;  %v3586_v22 = vmul.f32 %v6117_v35, %v6117_v35  ;;  %v3587_v37 = vmul.f32 %v6111_v51, %v6111_v51 }
 0x295   : > { %v3532_v34 = vadd.f32 %v6071_v50, %v3531_v28  ;;  %v3603_v21 = vadd.f32 %v3602_v16, %v3572_v11  ;;  %v3585_v28 = vmul.f32 %v6113_v12, %v6113_v12  ;;  %v3588_v11 = vmul.f32 %v6115_v5, %v6115_v5 }
 0x296   : > { %v3590_v16 = vmul.f32 %v6131_v8, %v6131_v8 }
 0x297   : > { %v3533_v55 = vadd.f32 %v6075_v59, %v3532_v34  ;;  %v3604_v32 = vadd.f32 %v3603_v21, %v3573_v62 }
 0x299   : > { %v3534_v36 = vadd.f32 %v6069_v47, %v3533_v55  ;;  %v3605_v9 = vadd.f32 %v3604_v32, %v3574_v58  ;;  %v3591_v58 = vmul.f32 %v6125_v26, %v6125_v26  ;;  %v3593_v32 = vmul.f32 %v6141_v63, %v6141_v63 }
 0x29b   : > { %v3535_v56 = vadd.f32 %v6073_v25, %v3534_v36  ;;  %v3606_v31 = vadd.f32 %v3605_v9, %v3575_v52  ;;  %v3589_v36 = vmul.f32 %v6127_v54, %v6127_v54 }
 0x29d   : > { %v3536_v15 = vadd.f32 %v6085_v42, %v3535_v56  ;;  %v3607_v24 = vadd.f32 %v3606_v31, %v3576_v7  ;;  %v3594_v7 = vmul.f32 %v6145_v2, %v6145_v2  ;;  %v3596_v31 = vmul.f32 %v6143_v49, %v6143_v49 }
 0x29f   : > { %v3537_v45 = vadd.f32 %v6089_v27, %v3536_v15  ;;  %v3608_v61 = vadd.f32 %v3607_v24, %v3577_v29  ;;  %v3592_v15 = vmul.f32 %v6129_v23, %v6129_v23 }
 0x2a1   : > { %v3538_v50 = vadd.f32 %v6083_v18, %v3537_v45  ;;  %v3609_v40 = vadd.f32 %v3608_v61, %v3578_v6  ;;  %v3597_v6 = vmul.f32 %v6155_v30, %v6155_v30  ;;  %v3599_v61 = vmul.f32 %v6153_v41, %v6153_v41 }
 0x2a3   : > { %v3539_v59 = vadd.f32 %v6087_v0, %v3538_v50  ;;  %v3610_v48 = vadd.f32 %v3609_v40, %v3579_v10  ;;  %v3595_v50 = vmul.f32 %v6139_v57, %v6139_v57 }
 0x2a5   : > { %v3540_v47 = vadd.f32 %v6099_v46, %v3539_v59  ;;  %v3611_v4 = vadd.f32 %v3610_v48, %v3580_v20 }
 0x2a7   : > { %v3541_v25 = vadd.f32 %v6103_v19, %v3540_v47  ;;  %v3612_v3 = vadd.f32 %v3611_v4, %v3581_v33  ;;  %v3598_v47 = vmul.f32 %v6159_v60, %v6159_v60 }
 0x2a9   : > { %v3542_v42 = vadd.f32 %v6097_v1, %v3541_v25  ;;  %v3613_v17 = vadd.f32 %v3612_v3, %v3582_v53 }
 0x2ab   : > { %v3543_v27 = vadd.f32 %v6101_v14, %v3542_v42  ;;  %v3614_v44 = vadd.f32 %v3613_v17, %v3583_v38 }
 0x2ad   : > { %v3544_v18 = vadd.f32 %v6113_v12, %v3543_v27  ;;  %v3615_v34 = vadd.f32 %v3614_v44, %v3584_v13 }
 0x2af   : > { %v3545_v0 = vadd.f32 %v6117_v35, %v3544_v18  ;;  %v3616_v55 = vadd.f32 %v3615_v34, %v3585_v28 }
 0x2b1   : > { %v3546_v46 = vadd.f32 %v6111_v51, %v3545_v0  ;;  %v3617_v43 = vadd.f32 %v3616_v55, %v3586_v22  ;;  %v3568_v0 = vld [vmem:[%s6289_s6 + $0x1] sm:$0x1] }
 0x2b3   : > { %v3547_v19 = vadd.f32 %v6115_v5, %v3546_v46  ;;  %v3618_v62 = vadd.f32 %v3617_v43, %v3587_v37 }
 0x2b5   : > { %v3548_v1 = vadd.f32 %v6127_v54, %v3547_v19  ;;  %v3619_v56 = vadd.f32 %v3618_v62, %v3588_v11 }
 0x2b7   : > { %v3549_v14 = vadd.f32 %v6131_v8, %v3548_v1  ;;  %v3620_v21 = vadd.f32 %v3619_v56, %v3589_v36 }
 0x2b9   : > { %v3550_v12 = vadd.f32 %v6125_v26, %v3549_v14  ;;  %v3621_v52 = vadd.f32 %v3620_v21, %v3590_v16 }
 0x2bb   : > { %v3551_v35 = vadd.f32 %v6129_v23, %v3550_v12  ;;  %v3622_v45 = vadd.f32 %v3621_v52, %v3591_v58 }
 0x2bd   : > { %v3552_v51 = vadd.f32 %v6141_v63, %v3551_v35  ;;  %v3623_v9 = vadd.f32 %v3622_v45, %v3592_v15 }
 0x2bf   : > { %v3553_v5 = vadd.f32 %v6145_v2, %v3552_v51  ;;  %v3624_v29 = vadd.f32 %v3623_v9, %v3593_v32 }
 0x2c1   : > { %v3554_v54 = vadd.f32 %v6139_v57, %v3553_v5  ;;  %v3625_v59 = vadd.f32 %v3624_v29, %v3594_v7 }
 0x2c3   : > { %v3555_v8 = vadd.f32 %v6143_v49, %v3554_v54  ;;  %v3626_v24 = vadd.f32 %v3625_v59, %v3595_v50  ;;  %v3600_v49 = vmul.f32 %v6157_v39, %v6157_v39 }
 0x2c5   : > { %v3556_v26 = vadd.f32 %v6155_v30, %v3555_v8  ;;  %v3627_v10 = vadd.f32 %v3626_v24, %v3596_v31 }
 0x2c7   : > { %v3557_v23 = vadd.f32 %v6159_v60, %v3556_v26  ;;  %v3628_v25 = vadd.f32 %v3627_v10, %v3597_v6  ;;  %v3528_v60 = vld [vmem:[%s6289_s6] sm:$0x1] }
 0x2c9   : > { %v3558_v63 = vadd.f32 %v6153_v41, %v3557_v23  ;;  %v3629_v40 = vadd.f32 %v3628_v25, %v3598_v47 }
 0x2cb   : > { %v3559_v2 = vadd.f32 %v6157_v39, %v3558_v63  ;;  %v3630_v33 = vadd.f32 %v3629_v40, %v3599_v61 }
 0x2cd   : > { %v3560_v57 = vrot.slane %v3559_v2, 4  ;;  %v3631_v48 = vadd.f32 %v3630_v33, %v3600_v49 }
 0x2cf   : > { %v3561_v20 = vadd.f32 %v3560_v57, %v3559_v2  ;;  %v3632_v53 = vrot.slane %v3631_v48, 4 }
 0x2d1   : > { %v3562_v42 = vrot.slane %v3561_v20, 2  ;;  %v3633_v18 = vadd.f32 %v3632_v53, %v3631_v48 }
 0x2d3   : > { %v3563_v30 = vadd.f32 %v3562_v42, %v3561_v20  ;;  %v3634_v41 = vrot.slane %v3633_v18, 2 }
 0x2d5   : > { %v3564_v27 = vrot.slane %v3563_v30, 1  ;;  %v3635_v39 = vadd.f32 %v3634_v41, %v3633_v18 }
 0x2d7   : > { %v3565_v4 = vadd.f32 %v3564_v27, %v3563_v30  ;;  %v3636_v3 = vrot.slane %v3635_v39, 1 }
 0x2d9   : > { %v3566_v38 = vadd.f32 %v3565_v4, %v3528_v60  ;;  %v3637_v13 = vadd.f32 %v3636_v3, %v3635_v39 }
 0x2db   : > { %3567 = vst [vmem:[%s6289_s6] sm:$0x1] %v3566_v38  ;;  %v3638_v17 = vadd.f32 %v3637_v13, %v3568_v0 }
 0x2dd   : > { %3639 = vst [vmem:[%s6289_s6 + $0x1] sm:$0x1] %v3638_v17 }
 0x2de PF: > { %s17_s21 = sadd.s32 1, %s5250_s21  }
 0x2df   : > { %p14_p5 = scmp.ge.s32.totalorder %s17_s21, 4  }
 0x2e1   :  { %16 = sbr.rel (!%p14_p5) target bundleno = 1 (0x1), region = 96 }

</bundles_post_ra>
